<compile_context>
chip_gen: v7x
topology: tpu7x:2x2x1
jax: 0.10.0
libtpu: 0.0.40
codegen_flags: <defaults>
</compile_context>

<pallas_src>
import jax
import jax.numpy as jnp
from jax.experimental import pallas as pl
from jax.experimental.pallas import tpu as pltpu

# accurate f32 matmuls for both the XLA reference and the in-kernel dots
jax.config.update("jax_default_matmul_precision", "float32")

# ----------------------------- config --------------------------------------
HIDDEN_DIM = 32
SERIES_LENGTH = 16
N_EMBED = 64
EMBED_DIM = 32          # quantizer acts directly on encoder channels
STRIDE = 2
N_RES_BLOCKS = 2
BETA = 0.5

LATENT_LEN = (SERIES_LENGTH + 2 * 1 - 4) // STRIDE + 1     # first conv: k=4, s=2, p=1
N_K3 = 2 * N_RES_BLOCKS + 2                                # enc_c2, enc res x2, dec_c1, dec res x2
N_K1 = 2 * N_RES_BLOCKS + 1                                # enc res x2, post_quant, dec res x2

assert EMBED_DIM == HIDDEN_DIM
assert 2 * LATENT_LEN == SERIES_LENGTH                     # ConvT(k=4, s=2, p=1) restores length


# ------------------------- fused Pallas kernel ------------------------------
def _fused_vqvae_kernel(xr_ref, w_in_ref, b_in_ref, w3_ref, b3_ref, w1_ref, b1_ref,
                        cb_ref, esq_ref, wout_ref, bd_ref,      # inputs
                        out_ref, ssd_ref):                      # outputs (no scratch)
    f32 = jnp.float32
    L = LATENT_LEN
    C = HIDDEN_DIM
    M = out_ref.shape[1]            # TB * L rows stacked along the sublane axis
    TB = ssd_ref.shape[1]

    # per-sample boundary masks (row r belongs to sample r // L, position r % L)
    row = jax.lax.broadcasted_iota(jnp.int32, (M, 1), 0)
    jpos = row % L
    first_row = jpos == 0                     # previous-row tap is zero padding
    last_row = jpos == (L - 1)                # next-row tap is zero padding

    def im2col3(h):
        """[h[j-1] | h[j] | h[j+1]] with per-sample zero padding -> (M, 3*C)."""
        prev = jnp.where(first_row, 0.0, pltpu.roll(h, 1, 0))
        nxt = jnp.where(last_row, 0.0, pltpu.roll(h, M - 1, 0))   # roll by -1
        return jnp.concatenate([prev, h, nxt], axis=-1)

    def conv3(h, li, relu_in=False, relu_out=False):
        """Conv1d(C, C, 3, padding=1) as a single (M, 3C) x (3C, C) matmul."""
        if relu_in:
            h = jnp.maximum(h, 0.0)
        acc = jnp.dot(im2col3(h), w3_ref[li], preferred_element_type=f32) \
            + b3_ref[li:li + 1, :]
        if relu_out:
            acc = jnp.maximum(acc, 0.0)
        return acc

    # ---------------- encoder ----------------
    # Conv1d(1, C, 4, stride=2, padding=1) + ReLU; the 4 taps were folded into
    # lanes by the wrapper so this is one (M, 4) x (4, C) matmul.
    x4 = xr_ref[0]                                              # (M, 4)
    h = jnp.dot(x4, w_in_ref[...], preferred_element_type=f32) + b_in_ref[...]
    h = jnp.maximum(h, 0.0)                                     # (M, C)

    h = conv3(h, 0)                                             # encoder Conv1d(C, C, 3, p=1)
    for i in range(N_RES_BLOCKS):                               # pre-act res blocks
        t = conv3(h, 1 + i, relu_in=True, relu_out=True)
        h = h + jnp.dot(t, w1_ref[i], preferred_element_type=f32) + b1_ref[i:i + 1, :]

    # ---------------- vector quantizer ----------------
    z = h                                                       # (M, C)
    e = cb_ref[...]                                             # (N_EMBED, C)
    # argmin_n ||z - e_n||^2 == argmin_n (|e_n|^2 - 2 z.e_n); |e_n|^2 precomputed.
    cross = jax.lax.dot_general(z, e, (((1,), (1,)), ((), ())),
                                preferred_element_type=f32)     # (M, N)
    d = esq_ref[...] - 2.0 * cross
    col = jax.lax.broadcasted_iota(jnp.int32, d.shape, 1)
    dmin = jnp.min(d, axis=-1, keepdims=True)
    idx = jnp.min(jnp.where(d <= dmin, col, N_EMBED), axis=-1, keepdims=True)
    onehot = (col == idx).astype(f32)                           # (M, N)
    zq = jnp.dot(onehot, e, preferred_element_type=f32)         # (M, C)

    # codebook + beta*commitment loss: per-sample sum of squared diff.
    df = zq - z
    rowsum = jnp.sum(df * df, axis=1, keepdims=True)            # (M, 1)
    ridx = jax.lax.broadcasted_iota(jnp.int32, (TB, M), 1)
    sidx = jax.lax.broadcasted_iota(jnp.int32, (TB, M), 0)
    lo = sidx * L
    seg = jnp.logical_and(ridx >= lo, ridx < lo + L).astype(f32)    # (TB, M)
    ssd_ref[0] = jnp.dot(seg, rowsum, preferred_element_type=f32)   # (TB, 1)

    # ---------------- post-quant conv + decoder ----------------
    # straight-through: z + (zq - z).detach() == zq in the forward pass
    h = jnp.dot(zq, w1_ref[N_RES_BLOCKS], preferred_element_type=f32) \
        + b1_ref[N_RES_BLOCKS:N_RES_BLOCKS + 1, :]
    h = conv3(h, N_RES_BLOCKS + 1)                              # decoder Conv1d(C, C, 3, p=1)
    for i in range(N_RES_BLOCKS):
        t = conv3(h, N_RES_BLOCKS + 2 + i, relu_in=True, relu_out=True)
        h = h + jnp.dot(t, w1_ref[N_RES_BLOCKS + 1 + i], preferred_element_type=f32) \
              + b1_ref[N_RES_BLOCKS + 1 + i:N_RES_BLOCKS + 2 + i, :]

    # ConvTranspose1d(C, 1, 4, stride=2, padding=1) with pre-ReLU, polyphase:
    #   out[2m]   = h[m].w[:,1] + h[m-1].w[:,3] + b      (even lane)
    #   out[2m+1] = h[m].w[:,2] + h[m+1].w[:,0] + b      (odd lane)
    # packed into one (M, 3C) x (3C, 2) matmul; single lane-contiguous store.
    hr = jnp.maximum(h, 0.0)
    out_ref[0] = jnp.dot(im2col3(hr), wout_ref[...], preferred_element_type=f32) \
        + bd_ref[...]


# ------------------------------ forward --------------------------------------
def _pick_batch_tile(B):
    """TB samples per grid step.  TB_MAX=16 -> M = TB*L = 128 rows (full MXU
    sublane feed); keep >= 2 grid steps when B >= 2 so both v7x TensorCores
    get work (no-op on single-TC v5e/v6e)."""
    TB_MAX = 16
    if B >= 2 * TB_MAX:
        return TB_MAX
    return max(1, (B + 1) // 2)


def vqvae_forward(params, x_ncl):
    """x_ncl: (B, 1, series_length) — PyTorch NCL convention.  Returns (dec, diff)."""
    B = x_ncl.shape[0]
    L = LATENT_LEN
    C = HIDDEN_DIM

    TB = _pick_batch_tile(B)
    nb = -(-B // TB)
    Bp = nb * TB
    M = TB * L

    # 4-tap im2col of the stride-2 input conv, done once (layout plumbing only):
    # taps[b, j, k] = x_pad[b, 2j + k]
    xp = jnp.pad(x_ncl[:, 0, :].astype(jnp.float32), ((0, 0), (1, 1)))       # (B, S+2)
    taps = jnp.stack([xp[:, k:k + 2 * L:2] for k in range(4)], axis=-1)      # (B, L, 4)
    if Bp != B:
        taps = jnp.pad(taps, ((0, Bp - B), (0, 0), (0, 0)))
    xr = taps.reshape(nb, M, 4)

    def full(shape):
        return pl.BlockSpec(shape, lambda b, _n=len(shape): (0,) * _n)

    grid_spec = pltpu.PrefetchScalarGridSpec(
        num_scalar_prefetch=0,
        grid=(nb,),
        in_specs=[
            pl.BlockSpec((1, M, 4), lambda b: (b, 0, 0)),
            full((4, C)), full((1, C)),
            full((N_K3, 3 * C, C)), full((N_K3, C)),
            full((N_K1, C, C)), full((N_K1, C)),
            full((N_EMBED, EMBED_DIM)), full((1, N_EMBED)),
            full((3 * C, 2)), full((1, 1)),
        ],
        out_specs=(pl.BlockSpec((1, M, 2), lambda b: (b, 0, 0)),
                   pl.BlockSpec((1, TB, 1), lambda b: (b, 0, 0))),
    )

    mm = lambda m, k, n: 2 * m * k * n
    flops_per_sample = (mm(L, 4, C) + N_K3 * mm(L, 3 * C, C) + N_K1 * mm(L, C, C)
                        + mm(L, C, N_EMBED) + mm(L, N_EMBED, C) + mm(L, 3 * C, 2))
    param_bytes = 4 * sum(int(params[k].size) for k in
                          ("w_in", "b_in", "W3", "B3", "W1", "B1",
                           "codebook", "esq", "w_out", "bd"))
    io_bytes_per_sample = 4 * (4 * L + 2 * L + 1)
    cost = pl.CostEstimate(flops=Bp * flops_per_sample + nb * mm(TB, M, 1),
                           transcendentals=0,
                           bytes_accessed=nb * param_bytes + Bp * io_bytes_per_sample)

    out2, ssd = pl.pallas_call(
        _fused_vqvae_kernel,
        out_shape=(jax.ShapeDtypeStruct((nb, M, 2), jnp.float32),
                   jax.ShapeDtypeStruct((nb, TB, 1), jnp.float32)),
        grid_spec=grid_spec,
        compiler_params=pltpu.CompilerParams(dimension_semantics=("parallel",)),
        cost_estimate=cost,
    )(xr, params["w_in"], params["b_in"], params["W3"], params["B3"],
      params["W1"], params["B1"], params["codebook"], params["esq"],
      params["w_out"], params["bd"])

    dec = out2.reshape(Bp, L, 2)[:B].reshape(B, 1, 2 * L)       # interleave even/odd
    ssd_v = ssd.reshape(Bp)[:B]
    diff = (1.0 + BETA) * jnp.sum(ssd_v) / float(B * L * HIDDEN_DIM)
    return dec, diff


# ------------------------------- params --------------------------------------
def _conv_init(key, cout, cin, k):
    kw, kb = jax.random.split(key)
    bound = 1.0 / (cin * k) ** 0.5
    w = jax.random.uniform(kw, (cout, cin, k), jnp.float32, -bound, bound)
    b = jax.random.uniform(kb, (cout,), jnp.float32, -bound, bound)
    return w, b


def init_params(key):
    """Returns (packed, raw): `packed` feeds the fused Pallas kernel (matmul layouts,
    im2col-stacked K=3 weights, polyphase ConvT weights, precomputed |e|^2 —
    packed ONCE); `raw` keeps PyTorch layouts for the pure-JAX reference check."""
    C = HIDDEN_DIM
    keys = jax.random.split(key, 16)
    raw = {}
    raw["enc_in_w"], raw["enc_in_b"] = _conv_init(keys[0], C, 1, 4)
    raw["enc_c2_w"], raw["enc_c2_b"] = _conv_init(keys[1], C, C, 3)
    raw["enc_res"] = []
    for i in range(N_RES_BLOCKS):
        w3, b3 = _conv_init(keys[2 + 2 * i], C, C, 3)
        w1, b1 = _conv_init(keys[3 + 2 * i], C, C, 1)
        raw["enc_res"].append({"w3": w3, "b3": b3, "w1": w1, "b1": b1})
    raw["codebook"] = jax.random.uniform(keys[6], (N_EMBED, EMBED_DIM), jnp.float32,
                                         -1.0 / N_EMBED, 1.0 / N_EMBED)
    raw["pq_w"], raw["pq_b"] = _conv_init(keys[7], C, C, 1)
    raw["dec_c1_w"], raw["dec_c1_b"] = _conv_init(keys[8], C, C, 3)
    raw["dec_res"] = []
    for i in range(N_RES_BLOCKS):
        w3, b3 = _conv_init(keys[9 + 2 * i], C, C, 3)
        w1, b1 = _conv_init(keys[10 + 2 * i], C, C, 1)
        raw["dec_res"].append({"w3": w3, "b3": b3, "w1": w1, "b1": b1})
    kw, kb = jax.random.split(keys[13])
    bound = 1.0 / (C * 4) ** 0.5
    raw["dec_out_w"] = jax.random.uniform(kw, (C, 1, 4), jnp.float32,
                                          -bound, bound)   # ConvTranspose1d (Cin, Cout, K)
    raw["dec_out_b"] = jax.random.uniform(kb, (1,), jnp.float32, -bound, bound)

    # ---- pack once into matmul layouts (no per-forward transposes) ----
    # (Cout,Cin,3) -> (3*Cin, Cout): rows ordered [k=0 | k=1 | k=2], matching the
    # in-kernel im2col lane order [h[j-1] | h[j] | h[j+1]].
    pack3 = lambda w: jnp.transpose(w, (2, 1, 0)).reshape(3 * C, C)
    pack1 = lambda w: jnp.transpose(w[:, :, 0], (1, 0))     # (Cout,Cin,1) -> (Cin,Cout)
    k3_w = [raw["enc_c2_w"]] + [r["w3"] for r in raw["enc_res"]] \
         + [raw["dec_c1_w"]] + [r["w3"] for r in raw["dec_res"]]
    k3_b = [raw["enc_c2_b"]] + [r["b3"] for r in raw["enc_res"]] \
         + [raw["dec_c1_b"]] + [r["b3"] for r in raw["dec_res"]]
    k1_w = [r["w1"] for r in raw["enc_res"]] + [raw["pq_w"]] \
         + [r["w1"] for r in raw["dec_res"]]
    k1_b = [r["b1"] for r in raw["enc_res"]] + [raw["pq_b"]] \
         + [r["b1"] for r in raw["dec_res"]]

    # polyphase ConvTranspose1d weights packed against the (3C) im2col slab:
    #   even = h[m-1].w[:,3] + h[m].w[:,1] ; odd = h[m].w[:,2] + h[m+1].w[:,0]
    wd = raw["dec_out_w"][:, 0, :]                               # (C, 4)
    w_out = jnp.zeros((3 * C, 2), jnp.float32)
    w_out = w_out.at[0 * C:1 * C, 0].set(wd[:, 3])
    w_out = w_out.at[1 * C:2 * C, 0].set(wd[:, 1])
    w_out = w_out.at[1 * C:2 * C, 1].set(wd[:, 2])
    w_out = w_out.at[2 * C:3 * C, 1].set(wd[:, 0])

    packed = {
        "w_in": jnp.transpose(raw["enc_in_w"][:, 0, :], (1, 0)),   # (4, C)
        "b_in": raw["enc_in_b"].reshape(1, C),
        "W3": jnp.stack([pack3(w) for w in k3_w]),                 # (6, 3C, C)
        "B3": jnp.stack(k3_b),                                     # (6, C)
        "W1": jnp.stack([pack1(w) for w in k1_w]),                 # (5, C, C)
        "B1": jnp.stack(k1_b),                                     # (5, C)
        "codebook": raw["codebook"],                               # (N, C)
        "esq": jnp.sum(raw["codebook"] ** 2, axis=1).reshape(1, N_EMBED),
        "w_out": w_out,                                            # (3C, 2)
        "bd": raw["dec_out_b"].reshape(1, 1),
    }
    return packed, raw


# --------------------- pure-JAX reference (for checking) ---------------------
def _ref_im2col(x_nlc, k, stride, pad):
    B, L, C = x_nlc.shape
    xp = jnp.pad(x_nlc, ((0, 0), (pad, pad), (0, 0)))
    lo = (L + 2 * pad - k) // stride + 1
    cols = [xp[:, j:j + (lo - 1) * stride + 1:stride, :] for j in range(k)]
    return jnp.stack(cols, axis=2).reshape(B * lo, k * C), lo


def _ref_conv1d(x_nlc, w, b, *, stride=1, pad=0):
    B, _, Cin = x_nlc.shape
    Cout, _, K = w.shape
    p, lo = _ref_im2col(x_nlc, K, stride, pad)
    w2 = jnp.transpose(w, (2, 1, 0)).reshape(K * Cin, Cout)
    return (p @ w2 + b).reshape(B, lo, Cout)


def _ref_conv_transpose1d(x_nlc, w_t, b, *, stride, pad):
    B, L, Cin = x_nlc.shape
    _, Cout, K = w_t.shape
    ld = (L - 1) * stride + 1
    xd = jnp.zeros((B, ld, Cin), x_nlc.dtype).at[:, ::stride, :].set(x_nlc)
    w_conv = jnp.flip(jnp.transpose(w_t, (1, 0, 2)), axis=2)
    return _ref_conv1d(xd, w_conv, b, stride=1, pad=K - 1 - pad)


def _ref_res_block(h, rp):
    t = jax.nn.relu(_ref_conv1d(jax.nn.relu(h), rp["w3"], rp["b3"], pad=1))
    return h + _ref_conv1d(t, rp["w1"], rp["b1"])


def ref_forward(raw, x_ncl):
    x = jnp.transpose(x_ncl, (0, 2, 1)).astype(jnp.float32)
    h = jax.nn.relu(_ref_conv1d(x, raw["enc_in_w"], raw["enc_in_b"], stride=STRIDE, pad=1))
    h = _ref_conv1d(h, raw["enc_c2_w"], raw["enc_c2_b"], pad=1)
    for rp in raw["enc_res"]:
        h = _ref_res_block(h, rp)
    B, Lq, D = h.shape
    z = h.reshape(B * Lq, D)
    e = raw["codebook"]
    d = jnp.sum(z * z, 1, keepdims=True) + jnp.sum(e * e, 1)[None, :] - 2.0 * z @ e.T
    zq = e[jnp.argmin(d, axis=1)]
    diff = (1.0 + BETA) * jnp.mean((zq - z) ** 2)
    q = _ref_conv1d(zq.reshape(B, Lq, D), raw["pq_w"], raw["pq_b"])
    h = _ref_conv1d(q, raw["dec_c1_w"], raw["dec_c1_b"], pad=1)
    for rp in raw["dec_res"]:
        h = _ref_res_block(h, rp)
    dec = _ref_conv_transpose1d(jax.nn.relu(h), raw["dec_out_w"], raw["dec_out_b"],
                                stride=STRIDE, pad=1)
    return jnp.transpose(dec, (0, 2, 1)), diff


# ------------------------------- main ---------------------------------------
if __name__ == "__main__":
    key = jax.random.PRNGKey(0)
    pkey, xkey = jax.random.split(key)
    packed, raw = init_params(pkey)
    x = jax.random.normal(xkey, (2, 1, SERIES_LENGTH), jnp.float32)

    dec, diff = jax.jit(vqvae_forward)(packed, x)
    dec = jax.block_until_ready(dec)
    diff = jax.block_until_ready(diff)

    assert dec.shape == (2, 1, SERIES_LENGTH), dec.shape
    assert bool(jnp.isfinite(dec).all()) and bool(jnp.isfinite(diff))

    # pure-JAX reference check (loose tolerance: MXU f32 pass decomposition may
    # differ slightly between XLA and Mosaic)
    dec_ref, diff_ref = ref_forward(raw, x)
    assert float(jnp.max(jnp.abs(dec - dec_ref))) < 5e-2
    assert abs(float(diff) - float(diff_ref)) < 5e-2 * max(1.0, abs(float(diff_ref)))

    print("KERNEL_OK")
</pallas_src>

<mosaic_0001>
module attributes {stable_mosaic.version = 11 : i64} {
  func.func @_fused_vqvae_kernel(%arg0: i32, %arg1: memref<1x8x4xf32, #tpu.memory_space<vmem>>, %arg2: memref<4x32xf32, #tpu.memory_space<vmem>>, %arg3: memref<1x32xf32, #tpu.memory_space<vmem>>, %arg4: memref<6x96x32xf32, #tpu.memory_space<vmem>>, %arg5: memref<6x32xf32, #tpu.memory_space<vmem>>, %arg6: memref<5x32x32xf32, #tpu.memory_space<vmem>>, %arg7: memref<5x32xf32, #tpu.memory_space<vmem>>, %arg8: memref<64x32xf32, #tpu.memory_space<vmem>>, %arg9: memref<1x64xf32, #tpu.memory_space<vmem>>, %arg10: memref<96x2xf32, #tpu.memory_space<vmem>>, %arg11: memref<1x1xf32, #tpu.memory_space<vmem>>, %arg12: memref<1x8x2xf32, #tpu.memory_space<vmem>>, %arg13: memref<1x1x1xf32, #tpu.memory_space<vmem>>) attributes {dimension_semantics = [#tpu.dimension_semantics<parallel>], iteration_bounds = array<i64: 2>, scalar_prefetch = 0 : i64, scratch_operands = 0 : i64, tpu.core_type = #tpu.core_type<tc>, window_params = [{transform_indices = @transform_0, window_bounds = array<i64: 1, 8, 4>}, {pipeline_mode = #tpu.pipeline_mode<synchronous>, transform_indices = @transform_1, window_bounds = array<i64: 4, 32>}, {pipeline_mode = #tpu.pipeline_mode<synchronous>, transform_indices = @transform_2, window_bounds = array<i64: 1, 32>}, {pipeline_mode = #tpu.pipeline_mode<synchronous>, transform_indices = @transform_3, window_bounds = array<i64: 6, 96, 32>}, {pipeline_mode = #tpu.pipeline_mode<synchronous>, transform_indices = @transform_4, window_bounds = array<i64: 6, 32>}, {pipeline_mode = #tpu.pipeline_mode<synchronous>, transform_indices = @transform_5, window_bounds = array<i64: 5, 32, 32>}, {pipeline_mode = #tpu.pipeline_mode<synchronous>, transform_indices = @transform_6, window_bounds = array<i64: 5, 32>}, {pipeline_mode = #tpu.pipeline_mode<synchronous>, transform_indices = @transform_7, window_bounds = array<i64: 64, 32>}, {pipeline_mode = #tpu.pipeline_mode<synchronous>, transform_indices = @transform_8, window_bounds = array<i64: 1, 64>}, {pipeline_mode = #tpu.pipeline_mode<synchronous>, transform_indices = @transform_9, window_bounds = array<i64: 96, 2>}, {pipeline_mode = #tpu.pipeline_mode<synchronous>, transform_indices = @transform_10, window_bounds = array<i64: 1, 1>}, {transform_indices = @transform_11, window_bounds = array<i64: 1, 8, 2>}, {transform_indices = @transform_12, window_bounds = array<i64: 1, 1, 1>}]} {
    %0 = tpu.iota {dimensions = array<i32: 0>} : vector<8x1xi32>
    %c8_i32 = arith.constant 8 : i32
    %c0_i32 = arith.constant 0 : i32
    %1 = arith.cmpi eq, %c8_i32, %c0_i32 : i32
    %c1_i32 = arith.constant 1 : i32
    %2 = arith.select %1, %c1_i32, %c8_i32 : i32
    %3 = vector.broadcast %2 : i32 to vector<8x1xi32>
    %4 = arith.remsi %0, %3 : vector<8x1xi32>
    %c0_i32_0 = arith.constant 0 : i32
    %5 = vector.broadcast %c0_i32_0 : i32 to vector<8x1xi32>
    %6 = arith.cmpi ne, %4, %5 : vector<8x1xi32>
    %c0_i32_1 = arith.constant 0 : i32
    %7 = vector.broadcast %c0_i32_1 : i32 to vector<8x1xi32>
    %8 = arith.cmpi slt, %4, %7 : vector<8x1xi32>
    %c0_i32_2 = arith.constant 0 : i32
    %9 = arith.cmpi slt, %2, %c0_i32_2 : i32
    %10 = vector.broadcast %9 : i1 to vector<8x1xi1>
    %11 = vector.broadcast %10 : vector<8x1xi1> to vector<8x1xi1>
    %12 = arith.xori %8, %11 : vector<8x1xi1>
    %13 = arith.andi %12, %6 : vector<8x1xi1>
    %14 = vector.broadcast %2 : i32 to vector<8x1xi32>
    %15 = arith.addi %4, %14 : vector<8x1xi32>
    %16 = arith.select %13, %15, %4 : vector<8x1xi1>, vector<8x1xi32>
    %c0_i32_3 = arith.constant 0 : i32
    %17 = vector.broadcast %c0_i32_3 : i32 to vector<8x1xi32>
    %18 = arith.cmpi eq, %16, %17 : vector<8x1xi32>
    %c7_i32 = arith.constant 7 : i32
    %19 = vector.broadcast %c7_i32 : i32 to vector<8x1xi32>
    %20 = arith.cmpi eq, %16, %19 : vector<8x1xi32>
    %c0 = arith.constant 0 : index
    %c0_4 = arith.constant 0 : index
    %c0_5 = arith.constant 0 : index
    %21 = vector.load %arg1[%c0, %c0_4, %c0_5] : memref<1x8x4xf32, #tpu.memory_space<vmem>>, vector<1x8x4xf32>
    %22 = vector.shape_cast %21 : vector<1x8x4xf32> to vector<8x4xf32>
    %c0_6 = arith.constant 0 : index
    %c0_7 = arith.constant 0 : index
    %23 = vector.load %arg2[%c0_6, %c0_7] : memref<4x32xf32, #tpu.memory_space<vmem>>, vector<4x32xf32>
    %cst = arith.constant dense<0.000000e+00> : vector<8x32xf32>
    %24 = tpu.matmul %22, %23, %cst {dimension_numbers = #tpu.dot_dimension_numbers<[1], [0], [0], [1], [0, 0, 1, 1], [], []>, precision = #tpu.contract_precision<fp32>} : vector<8x4xf32>, vector<4x32xf32>, vector<8x32xf32> -> vector<8x32xf32>
    %c0_8 = arith.constant 0 : index
    %c0_9 = arith.constant 0 : index
    %25 = vector.load %arg3[%c0_8, %c0_9] : memref<1x32xf32, #tpu.memory_space<vmem>>, vector<1x32xf32>
    %26 = vector.broadcast %25 : vector<1x32xf32> to vector<8x32xf32>
    %27 = arith.addf %24, %26 : vector<8x32xf32>
    %cst_10 = arith.constant 0.000000e+00 : f32
    %28 = vector.broadcast %cst_10 : f32 to vector<8x32xf32>
    %29 = arith.maximumf %27, %28 : vector<8x32xf32>
    %c1_i32_11 = arith.constant 1 : i32
    %30 = tpu.dynamic_rotate %29 by %c1_i32_11 dim 0 : vector<8x32xf32>, i32 -> vector<8x32xf32>
    %cst_12 = arith.constant 0.000000e+00 : f32
    %31 = vector.shape_cast %18 : vector<8x1xi1> to vector<8x1xi1>
    %32 = vector.broadcast %31 : vector<8x1xi1> to vector<8x32xi1>
    %33 = vector.broadcast %cst_12 : f32 to vector<8x32xf32>
    %34 = arith.select %32, %33, %30 : vector<8x32xi1>, vector<8x32xf32>
    %c7_i32_13 = arith.constant 7 : i32
    %35 = tpu.dynamic_rotate %29 by %c7_i32_13 dim 0 : vector<8x32xf32>, i32 -> vector<8x32xf32>
    %cst_14 = arith.constant 0.000000e+00 : f32
    %36 = vector.shape_cast %20 : vector<8x1xi1> to vector<8x1xi1>
    %37 = vector.broadcast %36 : vector<8x1xi1> to vector<8x32xi1>
    %38 = vector.broadcast %cst_14 : f32 to vector<8x32xf32>
    %39 = arith.select %37, %38, %35 : vector<8x32xi1>, vector<8x32xf32>
    %40 = tpu.concatenate %34, %29, %39 in 1 : vector<8x32xf32>, vector<8x32xf32>, vector<8x32xf32> -> vector<8x96xf32>
    %c0_15 = arith.constant 0 : index
    %c0_16 = arith.constant 0 : index
    %c0_17 = arith.constant 0 : index
    %41 = vector.load %arg4[%c0_15, %c0_16, %c0_17] : memref<6x96x32xf32, #tpu.memory_space<vmem>>, vector<1x96x32xf32>
    %42 = vector.shape_cast %41 : vector<1x96x32xf32> to vector<96x32xf32>
    %cst_18 = arith.constant dense<0.000000e+00> : vector<8x32xf32>
    %43 = tpu.matmul %40, %42, %cst_18 {dimension_numbers = #tpu.dot_dimension_numbers<[1], [0], [0], [1], [0, 0, 1, 1], [], []>, precision = #tpu.contract_precision<fp32>} : vector<8x96xf32>, vector<96x32xf32>, vector<8x32xf32> -> vector<8x32xf32>
    %c0_19 = arith.constant 0 : index
    %c0_20 = arith.constant 0 : index
    %44 = vector.load %arg5[%c0_19, %c0_20] : memref<6x32xf32, #tpu.memory_space<vmem>>, vector<1x32xf32>
    %45 = vector.broadcast %44 : vector<1x32xf32> to vector<8x32xf32>
    %46 = arith.addf %43, %45 : vector<8x32xf32>
    %cst_21 = arith.constant 0.000000e+00 : f32
    %47 = vector.broadcast %cst_21 : f32 to vector<8x32xf32>
    %48 = arith.maximumf %46, %47 : vector<8x32xf32>
    %c1_i32_22 = arith.constant 1 : i32
    %49 = tpu.dynamic_rotate %48 by %c1_i32_22 dim 0 : vector<8x32xf32>, i32 -> vector<8x32xf32>
    %cst_23 = arith.constant 0.000000e+00 : f32
    %50 = vector.shape_cast %18 : vector<8x1xi1> to vector<8x1xi1>
    %51 = vector.broadcast %50 : vector<8x1xi1> to vector<8x32xi1>
    %52 = vector.broadcast %cst_23 : f32 to vector<8x32xf32>
    %53 = arith.select %51, %52, %49 : vector<8x32xi1>, vector<8x32xf32>
    %c7_i32_24 = arith.constant 7 : i32
    %54 = tpu.dynamic_rotate %48 by %c7_i32_24 dim 0 : vector<8x32xf32>, i32 -> vector<8x32xf32>
    %cst_25 = arith.constant 0.000000e+00 : f32
    %55 = vector.shape_cast %20 : vector<8x1xi1> to vector<8x1xi1>
    %56 = vector.broadcast %55 : vector<8x1xi1> to vector<8x32xi1>
    %57 = vector.broadcast %cst_25 : f32 to vector<8x32xf32>
    %58 = arith.select %56, %57, %54 : vector<8x32xi1>, vector<8x32xf32>
    %59 = tpu.concatenate %53, %48, %58 in 1 : vector<8x32xf32>, vector<8x32xf32>, vector<8x32xf32> -> vector<8x96xf32>
    %c1 = arith.constant 1 : index
    %c0_26 = arith.constant 0 : index
    %c0_27 = arith.constant 0 : index
    %60 = vector.load %arg4[%c1, %c0_26, %c0_27] : memref<6x96x32xf32, #tpu.memory_space<vmem>>, vector<1x96x32xf32>
    %61 = vector.shape_cast %60 : vector<1x96x32xf32> to vector<96x32xf32>
    %cst_28 = arith.constant dense<0.000000e+00> : vector<8x32xf32>
    %62 = tpu.matmul %59, %61, %cst_28 {dimension_numbers = #tpu.dot_dimension_numbers<[1], [0], [0], [1], [0, 0, 1, 1], [], []>, precision = #tpu.contract_precision<fp32>} : vector<8x96xf32>, vector<96x32xf32>, vector<8x32xf32> -> vector<8x32xf32>
    %c1_29 = arith.constant 1 : index
    %c0_30 = arith.constant 0 : index
    %63 = vector.load %arg5[%c1_29, %c0_30] : memref<6x32xf32, #tpu.memory_space<vmem>>, vector<1x32xf32>
    %64 = vector.broadcast %63 : vector<1x32xf32> to vector<8x32xf32>
    %65 = arith.addf %62, %64 : vector<8x32xf32>
    %cst_31 = arith.constant 0.000000e+00 : f32
    %66 = vector.broadcast %cst_31 : f32 to vector<8x32xf32>
    %67 = arith.maximumf %65, %66 : vector<8x32xf32>
    %c0_32 = arith.constant 0 : index
    %c0_33 = arith.constant 0 : index
    %c0_34 = arith.constant 0 : index
    %68 = vector.load %arg6[%c0_32, %c0_33, %c0_34] : memref<5x32x32xf32, #tpu.memory_space<vmem>>, vector<1x32x32xf32>
    %69 = vector.shape_cast %68 : vector<1x32x32xf32> to vector<32x32xf32>
    %cst_35 = arith.constant dense<0.000000e+00> : vector<8x32xf32>
    %70 = tpu.matmul %67, %69, %cst_35 {dimension_numbers = #tpu.dot_dimension_numbers<[1], [0], [0], [1], [0, 0, 1, 1], [], []>, precision = #tpu.contract_precision<fp32>} : vector<8x32xf32>, vector<32x32xf32>, vector<8x32xf32> -> vector<8x32xf32>
    %71 = arith.addf %46, %70 : vector<8x32xf32>
    %c0_36 = arith.constant 0 : index
    %c0_37 = arith.constant 0 : index
    %72 = vector.load %arg7[%c0_36, %c0_37] : memref<5x32xf32, #tpu.memory_space<vmem>>, vector<1x32xf32>
    %73 = vector.broadcast %72 : vector<1x32xf32> to vector<8x32xf32>
    %74 = arith.addf %71, %73 : vector<8x32xf32>
    %cst_38 = arith.constant 0.000000e+00 : f32
    %75 = vector.broadcast %cst_38 : f32 to vector<8x32xf32>
    %76 = arith.maximumf %74, %75 : vector<8x32xf32>
    %c1_i32_39 = arith.constant 1 : i32
    %77 = tpu.dynamic_rotate %76 by %c1_i32_39 dim 0 : vector<8x32xf32>, i32 -> vector<8x32xf32>
    %cst_40 = arith.constant 0.000000e+00 : f32
    %78 = vector.shape_cast %18 : vector<8x1xi1> to vector<8x1xi1>
    %79 = vector.broadcast %78 : vector<8x1xi1> to vector<8x32xi1>
    %80 = vector.broadcast %cst_40 : f32 to vector<8x32xf32>
    %81 = arith.select %79, %80, %77 : vector<8x32xi1>, vector<8x32xf32>
    %c7_i32_41 = arith.constant 7 : i32
    %82 = tpu.dynamic_rotate %76 by %c7_i32_41 dim 0 : vector<8x32xf32>, i32 -> vector<8x32xf32>
    %cst_42 = arith.constant 0.000000e+00 : f32
    %83 = vector.shape_cast %20 : vector<8x1xi1> to vector<8x1xi1>
    %84 = vector.broadcast %83 : vector<8x1xi1> to vector<8x32xi1>
    %85 = vector.broadcast %cst_42 : f32 to vector<8x32xf32>
    %86 = arith.select %84, %85, %82 : vector<8x32xi1>, vector<8x32xf32>
    %87 = tpu.concatenate %81, %76, %86 in 1 : vector<8x32xf32>, vector<8x32xf32>, vector<8x32xf32> -> vector<8x96xf32>
    %c2 = arith.constant 2 : index
    %c0_43 = arith.constant 0 : index
    %c0_44 = arith.constant 0 : index
    %88 = vector.load %arg4[%c2, %c0_43, %c0_44] : memref<6x96x32xf32, #tpu.memory_space<vmem>>, vector<1x96x32xf32>
    %89 = vector.shape_cast %88 : vector<1x96x32xf32> to vector<96x32xf32>
    %cst_45 = arith.constant dense<0.000000e+00> : vector<8x32xf32>
    %90 = tpu.matmul %87, %89, %cst_45 {dimension_numbers = #tpu.dot_dimension_numbers<[1], [0], [0], [1], [0, 0, 1, 1], [], []>, precision = #tpu.contract_precision<fp32>} : vector<8x96xf32>, vector<96x32xf32>, vector<8x32xf32> -> vector<8x32xf32>
    %c2_46 = arith.constant 2 : index
    %c0_47 = arith.constant 0 : index
    %91 = vector.load %arg5[%c2_46, %c0_47] : memref<6x32xf32, #tpu.memory_space<vmem>>, vector<1x32xf32>
    %92 = vector.broadcast %91 : vector<1x32xf32> to vector<8x32xf32>
    %93 = arith.addf %90, %92 : vector<8x32xf32>
    %cst_48 = arith.constant 0.000000e+00 : f32
    %94 = vector.broadcast %cst_48 : f32 to vector<8x32xf32>
    %95 = arith.maximumf %93, %94 : vector<8x32xf32>
    %c1_49 = arith.constant 1 : index
    %c0_50 = arith.constant 0 : index
    %c0_51 = arith.constant 0 : index
    %96 = vector.load %arg6[%c1_49, %c0_50, %c0_51] : memref<5x32x32xf32, #tpu.memory_space<vmem>>, vector<1x32x32xf32>
    %97 = vector.shape_cast %96 : vector<1x32x32xf32> to vector<32x32xf32>
    %cst_52 = arith.constant dense<0.000000e+00> : vector<8x32xf32>
    %98 = tpu.matmul %95, %97, %cst_52 {dimension_numbers = #tpu.dot_dimension_numbers<[1], [0], [0], [1], [0, 0, 1, 1], [], []>, precision = #tpu.contract_precision<fp32>} : vector<8x32xf32>, vector<32x32xf32>, vector<8x32xf32> -> vector<8x32xf32>
    %99 = arith.addf %74, %98 : vector<8x32xf32>
    %c1_53 = arith.constant 1 : index
    %c0_54 = arith.constant 0 : index
    %100 = vector.load %arg7[%c1_53, %c0_54] : memref<5x32xf32, #tpu.memory_space<vmem>>, vector<1x32xf32>
    %101 = vector.broadcast %100 : vector<1x32xf32> to vector<8x32xf32>
    %102 = arith.addf %99, %101 : vector<8x32xf32>
    %c0_55 = arith.constant 0 : index
    %c0_56 = arith.constant 0 : index
    %103 = vector.load %arg8[%c0_55, %c0_56] : memref<64x32xf32, #tpu.memory_space<vmem>>, vector<64x32xf32>
    %cst_57 = arith.constant dense<0.000000e+00> : vector<8x64xf32>
    %104 = tpu.matmul %102, %103, %cst_57 {dimension_numbers = #tpu.dot_dimension_numbers<[1], [1], [0], [0], [0, 0, 1, 0], [], []>, precision = #tpu.contract_precision<fp32>} : vector<8x32xf32>, vector<64x32xf32>, vector<8x64xf32> -> vector<8x64xf32>
    %c0_58 = arith.constant 0 : index
    %c0_59 = arith.constant 0 : index
    %105 = vector.load %arg9[%c0_58, %c0_59] : memref<1x64xf32, #tpu.memory_space<vmem>>, vector<1x64xf32>
    %cst_60 = arith.constant 2.000000e+00 : f32
    %106 = vector.broadcast %cst_60 : f32 to vector<8x64xf32>
    %107 = arith.mulf %106, %104 : vector<8x64xf32>
    %108 = vector.broadcast %105 : vector<1x64xf32> to vector<8x64xf32>
    %109 = arith.subf %108, %107 : vector<8x64xf32>
    %110 = tpu.iota {dimensions = array<i32: 1>} : vector<8x64xi32>
    %cst_61 = arith.constant dense<0x7F800000> : vector<8xf32>
    %111 = vector.multi_reduction <minimumf>, %109, %cst_61 [1] : vector<8x64xf32> to vector<8xf32>
    %112 = vector.shape_cast %111 : vector<8xf32> to vector<8x1xf32>
    %113 = vector.broadcast %112 : vector<8x1xf32> to vector<8x64xf32>
    %114 = arith.cmpf ole, %109, %113 : vector<8x64xf32>
    %c64_i32 = arith.constant 64 : i32
    %115 = vector.broadcast %c64_i32 : i32 to vector<8x64xi32>
    %116 = arith.select %114, %110, %115 : vector<8x64xi1>, vector<8x64xi32>
    %cst_62 = arith.constant dense<2147483647> : vector<8xi32>
    %117 = vector.multi_reduction <minsi>, %116, %cst_62 [1] : vector<8x64xi32> to vector<8xi32>
    %118 = vector.shape_cast %117 : vector<8xi32> to vector<8x1xi32>
    %119 = vector.broadcast %118 : vector<8x1xi32> to vector<8x64xi32>
    %120 = arith.cmpi eq, %110, %119 : vector<8x64xi32>
    %121 = arith.extui %120 : vector<8x64xi1> to vector<8x64xi32>
    %122 = arith.sitofp %121 : vector<8x64xi32> to vector<8x64xf32>
    %cst_63 = arith.constant dense<0.000000e+00> : vector<8x32xf32>
    %123 = tpu.matmul %122, %103, %cst_63 {dimension_numbers = #tpu.dot_dimension_numbers<[1], [0], [0], [1], [0, 0, 1, 1], [], []>, precision = #tpu.contract_precision<fp32>} : vector<8x64xf32>, vector<64x32xf32>, vector<8x32xf32> -> vector<8x32xf32>
    %124 = arith.subf %123, %102 : vector<8x32xf32>
    %125 = arith.mulf %124, %124 : vector<8x32xf32>
    %cst_64 = arith.constant dense<0.000000e+00> : vector<8xf32>
    %126 = vector.multi_reduction <add>, %125, %cst_64 [1] : vector<8x32xf32> to vector<8xf32>
    %127 = vector.shape_cast %126 : vector<8xf32> to vector<8x1xf32>
    %128 = tpu.iota {dimensions = array<i32: 1>} : vector<1x8xi32>
    %129 = tpu.iota {dimensions = array<i32: 0>} : vector<1x8xi32>
    %c8_i32_65 = arith.constant 8 : i32
    %130 = vector.broadcast %c8_i32_65 : i32 to vector<1x8xi32>
    %131 = arith.muli %129, %130 : vector<1x8xi32>
    %132 = arith.cmpi sge, %128, %131 : vector<1x8xi32>
    %c8_i32_66 = arith.constant 8 : i32
    %133 = vector.broadcast %c8_i32_66 : i32 to vector<1x8xi32>
    %134 = arith.addi %131, %133 : vector<1x8xi32>
    %135 = arith.cmpi slt, %128, %134 : vector<1x8xi32>
    %136 = arith.andi %132, %135 : vector<1x8xi1>
    %137 = arith.extui %136 : vector<1x8xi1> to vector<1x8xi32>
    %138 = arith.sitofp %137 : vector<1x8xi32> to vector<1x8xf32>
    %cst_67 = arith.constant dense<0.000000e+00> : vector<1x1xf32>
    %139 = tpu.matmul %138, %127, %cst_67 {dimension_numbers = #tpu.dot_dimension_numbers<[1], [0], [0], [1], [0, 0, 1, 1], [], []>, precision = #tpu.contract_precision<fp32>} : vector<1x8xf32>, vector<8x1xf32>, vector<1x1xf32> -> vector<1x1xf32>
    %c0_68 = arith.constant 0 : index
    %c0_69 = arith.constant 0 : index
    %c0_70 = arith.constant 0 : index
    %140 = vector.load %arg13[%c0_68, %c0_69, %c0_70] : memref<1x1x1xf32, #tpu.memory_space<vmem>>, vector<1x1x1xf32>
    %141 = vector.shape_cast %140 : vector<1x1x1xf32> to vector<1x1xf32>
    %142 = vector.shape_cast %139 : vector<1x1xf32> to vector<1x1x1xf32>
    tpu.vector_store %arg13[%c0_68, %c0_69, %c0_70], %142 {strides = array<i32>} : memref<1x1x1xf32, #tpu.memory_space<vmem>>, vector<1x1x1xf32>,
    %c2_71 = arith.constant 2 : index
    %c0_72 = arith.constant 0 : index
    %c0_73 = arith.constant 0 : index
    %143 = vector.load %arg6[%c2_71, %c0_72, %c0_73] : memref<5x32x32xf32, #tpu.memory_space<vmem>>, vector<1x32x32xf32>
    %144 = vector.shape_cast %143 : vector<1x32x32xf32> to vector<32x32xf32>
    %cst_74 = arith.constant dense<0.000000e+00> : vector<8x32xf32>
    %145 = tpu.matmul %123, %144, %cst_74 {dimension_numbers = #tpu.dot_dimension_numbers<[1], [0], [0], [1], [0, 0, 1, 1], [], []>, precision = #tpu.contract_precision<fp32>} : vector<8x32xf32>, vector<32x32xf32>, vector<8x32xf32> -> vector<8x32xf32>
    %c2_75 = arith.constant 2 : index
    %c0_76 = arith.constant 0 : index
    %146 = vector.load %arg7[%c2_75, %c0_76] : memref<5x32xf32, #tpu.memory_space<vmem>>, vector<1x32xf32>
    %147 = vector.broadcast %146 : vector<1x32xf32> to vector<8x32xf32>
    %148 = arith.addf %145, %147 : vector<8x32xf32>
    %c1_i32_77 = arith.constant 1 : i32
    %149 = tpu.dynamic_rotate %148 by %c1_i32_77 dim 0 : vector<8x32xf32>, i32 -> vector<8x32xf32>
    %cst_78 = arith.constant 0.000000e+00 : f32
    %150 = vector.shape_cast %18 : vector<8x1xi1> to vector<8x1xi1>
    %151 = vector.broadcast %150 : vector<8x1xi1> to vector<8x32xi1>
    %152 = vector.broadcast %cst_78 : f32 to vector<8x32xf32>
    %153 = arith.select %151, %152, %149 : vector<8x32xi1>, vector<8x32xf32>
    %c7_i32_79 = arith.constant 7 : i32
    %154 = tpu.dynamic_rotate %148 by %c7_i32_79 dim 0 : vector<8x32xf32>, i32 -> vector<8x32xf32>
    %cst_80 = arith.constant 0.000000e+00 : f32
    %155 = vector.shape_cast %20 : vector<8x1xi1> to vector<8x1xi1>
    %156 = vector.broadcast %155 : vector<8x1xi1> to vector<8x32xi1>
    %157 = vector.broadcast %cst_80 : f32 to vector<8x32xf32>
    %158 = arith.select %156, %157, %154 : vector<8x32xi1>, vector<8x32xf32>
    %159 = tpu.concatenate %153, %148, %158 in 1 : vector<8x32xf32>, vector<8x32xf32>, vector<8x32xf32> -> vector<8x96xf32>
    %c3 = arith.constant 3 : index
    %c0_81 = arith.constant 0 : index
    %c0_82 = arith.constant 0 : index
    %160 = vector.load %arg4[%c3, %c0_81, %c0_82] : memref<6x96x32xf32, #tpu.memory_space<vmem>>, vector<1x96x32xf32>
    %161 = vector.shape_cast %160 : vector<1x96x32xf32> to vector<96x32xf32>
    %cst_83 = arith.constant dense<0.000000e+00> : vector<8x32xf32>
    %162 = tpu.matmul %159, %161, %cst_83 {dimension_numbers = #tpu.dot_dimension_numbers<[1], [0], [0], [1], [0, 0, 1, 1], [], []>, precision = #tpu.contract_precision<fp32>} : vector<8x96xf32>, vector<96x32xf32>, vector<8x32xf32> -> vector<8x32xf32>
    %c3_84 = arith.constant 3 : index
    %c0_85 = arith.constant 0 : index
    %163 = vector.load %arg5[%c3_84, %c0_85] : memref<6x32xf32, #tpu.memory_space<vmem>>, vector<1x32xf32>
    %164 = vector.broadcast %163 : vector<1x32xf32> to vector<8x32xf32>
    %165 = arith.addf %162, %164 : vector<8x32xf32>
    %cst_86 = arith.constant 0.000000e+00 : f32
    %166 = vector.broadcast %cst_86 : f32 to vector<8x32xf32>
    %167 = arith.maximumf %165, %166 : vector<8x32xf32>
    %c1_i32_87 = arith.constant 1 : i32
    %168 = tpu.dynamic_rotate %167 by %c1_i32_87 dim 0 : vector<8x32xf32>, i32 -> vector<8x32xf32>
    %cst_88 = arith.constant 0.000000e+00 : f32
    %169 = vector.shape_cast %18 : vector<8x1xi1> to vector<8x1xi1>
    %170 = vector.broadcast %169 : vector<8x1xi1> to vector<8x32xi1>
    %171 = vector.broadcast %cst_88 : f32 to vector<8x32xf32>
    %172 = arith.select %170, %171, %168 : vector<8x32xi1>, vector<8x32xf32>
    %c7_i32_89 = arith.constant 7 : i32
    %173 = tpu.dynamic_rotate %167 by %c7_i32_89 dim 0 : vector<8x32xf32>, i32 -> vector<8x32xf32>
    %cst_90 = arith.constant 0.000000e+00 : f32
    %174 = vector.shape_cast %20 : vector<8x1xi1> to vector<8x1xi1>
    %175 = vector.broadcast %174 : vector<8x1xi1> to vector<8x32xi1>
    %176 = vector.broadcast %cst_90 : f32 to vector<8x32xf32>
    %177 = arith.select %175, %176, %173 : vector<8x32xi1>, vector<8x32xf32>
    %178 = tpu.concatenate %172, %167, %177 in 1 : vector<8x32xf32>, vector<8x32xf32>, vector<8x32xf32> -> vector<8x96xf32>
    %c4 = arith.constant 4 : index
    %c0_91 = arith.constant 0 : index
    %c0_92 = arith.constant 0 : index
    %179 = vector.load %arg4[%c4, %c0_91, %c0_92] : memref<6x96x32xf32, #tpu.memory_space<vmem>>, vector<1x96x32xf32>
    %180 = vector.shape_cast %179 : vector<1x96x32xf32> to vector<96x32xf32>
    %cst_93 = arith.constant dense<0.000000e+00> : vector<8x32xf32>
    %181 = tpu.matmul %178, %180, %cst_93 {dimension_numbers = #tpu.dot_dimension_numbers<[1], [0], [0], [1], [0, 0, 1, 1], [], []>, precision = #tpu.contract_precision<fp32>} : vector<8x96xf32>, vector<96x32xf32>, vector<8x32xf32> -> vector<8x32xf32>
    %c4_94 = arith.constant 4 : index
    %c0_95 = arith.constant 0 : index
    %182 = vector.load %arg5[%c4_94, %c0_95] : memref<6x32xf32, #tpu.memory_space<vmem>>, vector<1x32xf32>
    %183 = vector.broadcast %182 : vector<1x32xf32> to vector<8x32xf32>
    %184 = arith.addf %181, %183 : vector<8x32xf32>
    %cst_96 = arith.constant 0.000000e+00 : f32
    %185 = vector.broadcast %cst_96 : f32 to vector<8x32xf32>
    %186 = arith.maximumf %184, %185 : vector<8x32xf32>
    %c3_97 = arith.constant 3 : index
    %c0_98 = arith.constant 0 : index
    %c0_99 = arith.constant 0 : index
    %187 = vector.load %arg6[%c3_97, %c0_98, %c0_99] : memref<5x32x32xf32, #tpu.memory_space<vmem>>, vector<1x32x32xf32>
    %188 = vector.shape_cast %187 : vector<1x32x32xf32> to vector<32x32xf32>
    %cst_100 = arith.constant dense<0.000000e+00> : vector<8x32xf32>
    %189 = tpu.matmul %186, %188, %cst_100 {dimension_numbers = #tpu.dot_dimension_numbers<[1], [0], [0], [1], [0, 0, 1, 1], [], []>, precision = #tpu.contract_precision<fp32>} : vector<8x32xf32>, vector<32x32xf32>, vector<8x32xf32> -> vector<8x32xf32>
    %190 = arith.addf %165, %189 : vector<8x32xf32>
    %c3_101 = arith.constant 3 : index
    %c0_102 = arith.constant 0 : index
    %191 = vector.load %arg7[%c3_101, %c0_102] : memref<5x32xf32, #tpu.memory_space<vmem>>, vector<1x32xf32>
    %192 = vector.broadcast %191 : vector<1x32xf32> to vector<8x32xf32>
    %193 = arith.addf %190, %192 : vector<8x32xf32>
    %cst_103 = arith.constant 0.000000e+00 : f32
    %194 = vector.broadcast %cst_103 : f32 to vector<8x32xf32>
    %195 = arith.maximumf %193, %194 : vector<8x32xf32>
    %c1_i32_104 = arith.constant 1 : i32
    %196 = tpu.dynamic_rotate %195 by %c1_i32_104 dim 0 : vector<8x32xf32>, i32 -> vector<8x32xf32>
    %cst_105 = arith.constant 0.000000e+00 : f32
    %197 = vector.shape_cast %18 : vector<8x1xi1> to vector<8x1xi1>
    %198 = vector.broadcast %197 : vector<8x1xi1> to vector<8x32xi1>
    %199 = vector.broadcast %cst_105 : f32 to vector<8x32xf32>
    %200 = arith.select %198, %199, %196 : vector<8x32xi1>, vector<8x32xf32>
    %c7_i32_106 = arith.constant 7 : i32
    %201 = tpu.dynamic_rotate %195 by %c7_i32_106 dim 0 : vector<8x32xf32>, i32 -> vector<8x32xf32>
    %cst_107 = arith.constant 0.000000e+00 : f32
    %202 = vector.shape_cast %20 : vector<8x1xi1> to vector<8x1xi1>
    %203 = vector.broadcast %202 : vector<8x1xi1> to vector<8x32xi1>
    %204 = vector.broadcast %cst_107 : f32 to vector<8x32xf32>
    %205 = arith.select %203, %204, %201 : vector<8x32xi1>, vector<8x32xf32>
    %206 = tpu.concatenate %200, %195, %205 in 1 : vector<8x32xf32>, vector<8x32xf32>, vector<8x32xf32> -> vector<8x96xf32>
    %c5 = arith.constant 5 : index
    %c0_108 = arith.constant 0 : index
    %c0_109 = arith.constant 0 : index
    %207 = vector.load %arg4[%c5, %c0_108, %c0_109] : memref<6x96x32xf32, #tpu.memory_space<vmem>>, vector<1x96x32xf32>
    %208 = vector.shape_cast %207 : vector<1x96x32xf32> to vector<96x32xf32>
    %cst_110 = arith.constant dense<0.000000e+00> : vector<8x32xf32>
    %209 = tpu.matmul %206, %208, %cst_110 {dimension_numbers = #tpu.dot_dimension_numbers<[1], [0], [0], [1], [0, 0, 1, 1], [], []>, precision = #tpu.contract_precision<fp32>} : vector<8x96xf32>, vector<96x32xf32>, vector<8x32xf32> -> vector<8x32xf32>
    %c5_111 = arith.constant 5 : index
    %c0_112 = arith.constant 0 : index
    %210 = vector.load %arg5[%c5_111, %c0_112] : memref<6x32xf32, #tpu.memory_space<vmem>>, vector<1x32xf32>
    %211 = vector.broadcast %210 : vector<1x32xf32> to vector<8x32xf32>
    %212 = arith.addf %209, %211 : vector<8x32xf32>
    %cst_113 = arith.constant 0.000000e+00 : f32
    %213 = vector.broadcast %cst_113 : f32 to vector<8x32xf32>
    %214 = arith.maximumf %212, %213 : vector<8x32xf32>
    %c4_114 = arith.constant 4 : index
    %c0_115 = arith.constant 0 : index
    %c0_116 = arith.constant 0 : index
    %215 = vector.load %arg6[%c4_114, %c0_115, %c0_116] : memref<5x32x32xf32, #tpu.memory_space<vmem>>, vector<1x32x32xf32>
    %216 = vector.shape_cast %215 : vector<1x32x32xf32> to vector<32x32xf32>
    %cst_117 = arith.constant dense<0.000000e+00> : vector<8x32xf32>
    %217 = tpu.matmul %214, %216, %cst_117 {dimension_numbers = #tpu.dot_dimension_numbers<[1], [0], [0], [1], [0, 0, 1, 1], [], []>, precision = #tpu.contract_precision<fp32>} : vector<8x32xf32>, vector<32x32xf32>, vector<8x32xf32> -> vector<8x32xf32>
    %218 = arith.addf %193, %217 : vector<8x32xf32>
    %c4_118 = arith.constant 4 : index
    %c0_119 = arith.constant 0 : index
    %219 = vector.load %arg7[%c4_118, %c0_119] : memref<5x32xf32, #tpu.memory_space<vmem>>, vector<1x32xf32>
    %220 = vector.broadcast %219 : vector<1x32xf32> to vector<8x32xf32>
    %221 = arith.addf %218, %220 : vector<8x32xf32>
    %cst_120 = arith.constant 0.000000e+00 : f32
    %222 = vector.broadcast %cst_120 : f32 to vector<8x32xf32>
    %223 = arith.maximumf %221, %222 : vector<8x32xf32>
    %c1_i32_121 = arith.constant 1 : i32
    %224 = tpu.dynamic_rotate %223 by %c1_i32_121 dim 0 : vector<8x32xf32>, i32 -> vector<8x32xf32>
    %cst_122 = arith.constant 0.000000e+00 : f32
    %225 = vector.shape_cast %18 : vector<8x1xi1> to vector<8x1xi1>
    %226 = vector.broadcast %225 : vector<8x1xi1> to vector<8x32xi1>
    %227 = vector.broadcast %cst_122 : f32 to vector<8x32xf32>
    %228 = arith.select %226, %227, %224 : vector<8x32xi1>, vector<8x32xf32>
    %c7_i32_123 = arith.constant 7 : i32
    %229 = tpu.dynamic_rotate %223 by %c7_i32_123 dim 0 : vector<8x32xf32>, i32 -> vector<8x32xf32>
    %cst_124 = arith.constant 0.000000e+00 : f32
    %230 = vector.shape_cast %20 : vector<8x1xi1> to vector<8x1xi1>
    %231 = vector.broadcast %230 : vector<8x1xi1> to vector<8x32xi1>
    %232 = vector.broadcast %cst_124 : f32 to vector<8x32xf32>
    %233 = arith.select %231, %232, %229 : vector<8x32xi1>, vector<8x32xf32>
    %234 = tpu.concatenate %228, %223, %233 in 1 : vector<8x32xf32>, vector<8x32xf32>, vector<8x32xf32> -> vector<8x96xf32>
    %c0_125 = arith.constant 0 : index
    %c0_126 = arith.constant 0 : index
    %235 = vector.load %arg10[%c0_125, %c0_126] : memref<96x2xf32, #tpu.memory_space<vmem>>, vector<96x2xf32>
    %cst_127 = arith.constant dense<0.000000e+00> : vector<8x2xf32>
    %236 = tpu.matmul %234, %235, %cst_127 {dimension_numbers = #tpu.dot_dimension_numbers<[1], [0], [0], [1], [0, 0, 1, 1], [], []>, precision = #tpu.contract_precision<fp32>} : vector<8x96xf32>, vector<96x2xf32>, vector<8x2xf32> -> vector<8x2xf32>
    %c0_128 = arith.constant 0 : index
    %c0_129 = arith.constant 0 : index
    %237 = vector.load %arg11[%c0_128, %c0_129] : memref<1x1xf32, #tpu.memory_space<vmem>>, vector<1x1xf32>
    %238 = vector.broadcast %237 : vector<1x1xf32> to vector<8x2xf32>
    %239 = arith.addf %236, %238 : vector<8x2xf32>
    %c0_130 = arith.constant 0 : index
    %c0_131 = arith.constant 0 : index
    %c0_132 = arith.constant 0 : index
    %240 = vector.load %arg12[%c0_130, %c0_131, %c0_132] : memref<1x8x2xf32, #tpu.memory_space<vmem>>, vector<1x8x2xf32>
    %241 = vector.shape_cast %240 : vector<1x8x2xf32> to vector<8x2xf32>
    %242 = vector.shape_cast %239 : vector<8x2xf32> to vector<1x8x2xf32>
    tpu.vector_store %arg12[%c0_130, %c0_131, %c0_132], %242 {strides = array<i32>} : memref<1x8x2xf32, #tpu.memory_space<vmem>>, vector<1x8x2xf32>,
    return
  }
  func.func @transform_0(%arg0: i32) -> (i32, i32, i32) {
    %c0_i32 = arith.constant 0 : i32
    %c0_i32_0 = arith.constant 0 : i32
    %c0_i32_1 = arith.constant 0 : i32
    return %arg0, %c0_i32, %c0_i32_0 : i32, i32, i32
  }
  func.func @transform_1(%arg0: i32) -> (i32, i32) {
    %c0_i32 = arith.constant 0 : i32
    %c0_i32_0 = arith.constant 0 : i32
    %c0_i32_1 = arith.constant 0 : i32
    return %c0_i32, %c0_i32_0 : i32, i32
  }
  func.func @transform_2(%arg0: i32) -> (i32, i32) {
    %c0_i32 = arith.constant 0 : i32
    %c0_i32_0 = arith.constant 0 : i32
    %c0_i32_1 = arith.constant 0 : i32
    return %c0_i32, %c0_i32_0 : i32, i32
  }
  func.func @transform_3(%arg0: i32) -> (i32, i32, i32) {
    %c0_i32 = arith.constant 0 : i32
    %c0_i32_0 = arith.constant 0 : i32
    %c0_i32_1 = arith.constant 0 : i32
    %c0_i32_2 = arith.constant 0 : i32
    return %c0_i32, %c0_i32_0, %c0_i32_1 : i32, i32, i32
  }
  func.func @transform_4(%arg0: i32) -> (i32, i32) {
    %c0_i32 = arith.constant 0 : i32
    %c0_i32_0 = arith.constant 0 : i32
    %c0_i32_1 = arith.constant 0 : i32
    return %c0_i32, %c0_i32_0 : i32, i32
  }
  func.func @transform_5(%arg0: i32) -> (i32, i32, i32) {
    %c0_i32 = arith.constant 0 : i32
    %c0_i32_0 = arith.constant 0 : i32
    %c0_i32_1 = arith.constant 0 : i32
    %c0_i32_2 = arith.constant 0 : i32
    return %c0_i32, %c0_i32_0, %c0_i32_1 : i32, i32, i32
  }
  func.func @transform_6(%arg0: i32) -> (i32, i32) {
    %c0_i32 = arith.constant 0 : i32
    %c0_i32_0 = arith.constant 0 : i32
    %c0_i32_1 = arith.constant 0 : i32
    return %c0_i32, %c0_i32_0 : i32, i32
  }
  func.func @transform_7(%arg0: i32) -> (i32, i32) {
    %c0_i32 = arith.constant 0 : i32
    %c0_i32_0 = arith.constant 0 : i32
    %c0_i32_1 = arith.constant 0 : i32
    return %c0_i32, %c0_i32_0 : i32, i32
  }
  func.func @transform_8(%arg0: i32) -> (i32, i32) {
    %c0_i32 = arith.constant 0 : i32
    %c0_i32_0 = arith.constant 0 : i32
    %c0_i32_1 = arith.constant 0 : i32
    return %c0_i32, %c0_i32_0 : i32, i32
  }
  func.func @transform_9(%arg0: i32) -> (i32, i32) {
    %c0_i32 = arith.constant 0 : i32
    %c0_i32_0 = arith.constant 0 : i32
    %c0_i32_1 = arith.constant 0 : i32
    return %c0_i32, %c0_i32_0 : i32, i32
  }
  func.func @transform_10(%arg0: i32) -> (i32, i32) {
    %c0_i32 = arith.constant 0 : i32
    %c0_i32_0 = arith.constant 0 : i32
    %c0_i32_1 = arith.constant 0 : i32
    return %c0_i32, %c0_i32_0 : i32, i32
  }
  func.func @transform_11(%arg0: i32) -> (i32, i32, i32) {
    %c0_i32 = arith.constant 0 : i32
    %c0_i32_0 = arith.constant 0 : i32
    %c0_i32_1 = arith.constant 0 : i32
    return %arg0, %c0_i32, %c0_i32_0 : i32, i32, i32
  }
  func.func @transform_12(%arg0: i32) -> (i32, i32, i32) {
    %c0_i32 = arith.constant 0 : i32
    %c0_i32_0 = arith.constant 0 : i32
    %c0_i32_1 = arith.constant 0 : i32
    return %arg0, %c0_i32, %c0_i32_0 : i32, i32, i32
  }
}

</mosaic_0001>

<bundles_post_ra>
// kernel: vqvae_forward.1
= control target key start
LH: loop header
LB: loop body
LE: loop exit
PB: predicated region body
PF: predicated region fallthrough
CT: control target
= control target key end

     0   :  { %s13466_s23 = smov 0   ;;  %s15807_s0 = inlined_call_operand.vmem [shape: f32[2,8,4], index: 0, kind: input, shape index: {}]   ;;  %s15808_s1 = inlined_call_operand.vmem [shape: f32[4,32], index: 1, kind: input, shape index: {}]   ;;  %s15809_s2 = inlined_call_operand.vmem [shape: f32[1,32], index: 2, kind: input, shape index: {}]   ;;  %s15810_s3 = inlined_call_operand.vmem [shape: f32[6,96,32], index: 3, kind: input, shape index: {}]   ;;  %s15811_s4 = inlined_call_operand.vmem [shape: f32[6,32], index: 4, kind: input, shape index: {}]   ;;  %s15812_s5 = inlined_call_operand.vmem [shape: f32[5,32,32], index: 5, kind: input, shape index: {}]   ;;  %s15813_s6 = inlined_call_operand.vmem [shape: f32[5,32], index: 6, kind: input, shape index: {}]   ;;  %s15814_s7 = inlined_call_operand.vmem [shape: f32[64,32], index: 7, kind: input, shape index: {}]   ;;  %s15815_s8 = inlined_call_operand.vmem [shape: f32[1,64], index: 8, kind: input, shape index: {}]   ;;  %s15816_s9 = inlined_call_operand.vmem [shape: f32[96,2], index: 9, kind: input, shape index: {}]   ;;  %s15817_s10 = inlined_call_operand.<no memory space> [shape: f32[1,1], index: 10, kind: input, shape index: {}]   ;;  %s15818_s11 = inlined_call_operand.vmem [shape: f32[2,8,2], index: 11, kind: output, shape index: {0}]   ;;  %s15819_s12 = inlined_call_operand.vmem [shape: f32[2,1,1], index: 12, kind: output, shape index: {1}]  }
   0x1   :  { %v18_v0 = vstv %s15817_s10 }
   0x2   :  { %19 = vst [vmem:[#allocation2] sm:$0x1] %v18_v0 }
   0x3 LB: > { %s9474_s24 = sadd.s32 4294967295, %s13390_s23   ;;  %p9478_p0 = scmp.ge.s32.totalorder %s13390_s23, 1  ;;  %s13390_s23 = sphi %s13466_s23, %s25_s23  }
   0x4   : > { %p366_p1 = scmp.lt.s32.totalorder %s13390_s23, 3 }
   0x6   : > { %p367_p2 = pnand %p9478_p0, %p366_p1 }
   0x7   : > { %v437_v1 = vld [vmem:[%s15808_s1] sm:$0xf] (!%p367_p2)  ;;  %vm449_vm0 = vcmask (!%p367_p2), 1043456   ;;  %p409_p3 = scmp.lt.s32.totalorder (!%p367_p2), %s9474_s24, 1  ;;  %v13392_v2 = vmov (!%p367_p2), 0.0   ;;  %vm13393_vm1 = vmmov (!%p367_p2), 0  }
   0x8   : > { %370 = sbr.rel (%p367_p2) target bundleno = 5973 (0x1755), region = 64  ;;  %10409 = vmatprep.subr.mxu0 (!%p367_p2), %v13392_v2  ;;  %v451_v3 = vsel (!%p367_p2), %vm449_vm0, %v437_v1, 0  ;;  %10411 = vmatprep.mubr.msk.f32.mxu0 (!%p367_p2), %vm13393_vm1, %v13392_v2  ;;  %vm445_vm2 = vcmask (!%p367_p2), 31744   ;;  %v920_v16 = vld [vmem:[%s15810_s3] sm:$0xff] (!%p367_p2)  ;;  %v921_v17 = vld [vmem:[%s15810_s3 + $0x8] sm:$0xff] (!%p367_p2)  ;;  %v922_v18 = vld [vmem:[%s15810_s3 + $0x10] sm:$0xff] (!%p367_p2) }
   0x9   : > { %v454_v4 = vand.u32 (!%p367_p2), 4294901760, %v451_v3  ;;  %10490 = vmatprep.mubr.msk.f32.mxu1 (!%p367_p2), %vm13393_vm1, %v13392_v2  ;;  %v13394_v19 = vmov (!%p367_p2), 0.0|0.0   ;;  %v942_v20 = vand.u32 (!%p367_p2), 4294901760, %v920_v16  ;;  %v945_v21 = vand.u32 (!%p367_p2), 4294901760, %v921_v17  ;;  %v923_v22 = vld [vmem:[%s15810_s3 + $0x18] sm:$0xff] (!%p367_p2)  ;;  %v13524_v24 = vld [vmem:[%s15810_s3 + $0x20] sm:$0xff] (!%p367_p2) }
   0xa   : > { %12179 = vmatprep.subr.bf16.mxu1 (!%p367_p2), %v13394_v19  ;;  %v948_v23 = vand.u32 (!%p367_p2), 4294901760, %v922_v18  ;;  %v13529_v25 = vld [vmem:[%s15810_s3 + $0x28] sm:$0xff] (!%p367_p2)  ;;  %v951_v26 = vand.u32 (!%p367_p2), 4294901760, %v923_v22  ;;  %v954_v27 = vand.u32 (!%p367_p2), 4294901760, %v13524_v24  ;;  %v13536_v29 = vld [vmem:[%s15810_s3 + $0x30] sm:$0xff] (!%p367_p2)  ;;  %v13541_v30 = vld [vmem:[%s15810_s3 + $0x38] sm:$0xff] (!%p367_p2) }
   0xb   : > { %10410 = vmatpush3.msra.mxu0 (!%p367_p2), %v454_v4  ;;  %v531_v5 = vsub.f32 (!%p367_p2), %v451_v3, %v454_v4  ;;  %v957_v28 = vand.u32 (!%p367_p2), 4294901760, %v13529_v25  ;;  %v13543_v31 = vsub.f32 (!%p367_p2), %v920_v16, %v942_v20  ;;  %v13545_v32 = vsub.f32 (!%p367_p2), %v921_v17, %v945_v21  ;;  %s13395_s22 = smov (!%p367_p2), 32   ;;  %s13396_s25 = smov (!%p367_p2), 64  }
   0xc   : > { %10414 = vmatprep.subr.mxu0 (!%p367_p2), %v13392_v2  ;;  %v13547_v33 = vsub.f32 (!%p367_p2), %v922_v18, %v948_v23  ;;  %v13549_v34 = vpack.c.bf16 (!%p367_p2), %v945_v21, %v942_v20  ;;  %v13551_v35 = vsub.f32 (!%p367_p2), %v923_v22, %v951_v26  ;;  %v13556_v36 = vsub.f32 (!%p367_p2), %v13524_v24, %v954_v27 }
   0xd   : > { %v532_v8 = vand.u32 (!%p367_p2), 4294901760, %v531_v5  ;;  %v13561_v37 = vsub.f32 (!%p367_p2), %v13529_v25, %v957_v28  ;;  %v960_v38 = vand.u32 (!%p367_p2), 4294901760, %v13536_v29  ;;  %v1031_v39 = vand.u32 (!%p367_p2), 4294901760, %v13543_v31 }
   0xe   : > { %v1038_v40 = vand.u32 (!%p367_p2), 4294901760, %v13545_v32  ;;  %v1045_v41 = vand.u32 (!%p367_p2), 4294901760, %v13547_v33  ;;  %v963_v42 = vand.u32 (!%p367_p2), 4294901760, %v13541_v30  ;;  %v1052_v43 = vand.u32 (!%p367_p2), 4294901760, %v13551_v35 }
   0xf   : > { %s15825_s24 = smov (!%p409_p3, %s9474_s24), 1  ;;  %v533_v11 = vsub.f32 %v531_v5, %v532_v8  ;;  %v1059_v44 = vand.u32 4294901760, %v13556_v36  ;;  %v1066_v45 = vand.u32 4294901760, %v13561_v37  ;;  %v13576_v46 = vsub.f32 %v13536_v29, %v960_v38 }
  0x10   : > { %s9479_s10 = sshll.u32 %s15825_s24, 3  ;;  %v1032_v47 = vsub.f32 %v13543_v31, %v1031_v39  ;;  %v1039_v48 = vsub.f32 %v13545_v32, %v1038_v40  ;;  %v1046_v49 = vsub.f32 %v13547_v33, %v1045_v41  ;;  %v13590_v50 = vsub.f32 %v13541_v30, %v963_v42  ;;  %s419_s28 = scalar_lea.vmem %s15819_s12, %s15825_s24 }
  0x11   : > { %s412_s29 = scalar_lea.vmem %s15807_s0, %s9479_s10  ;;  %v534_v14 = vand.u32 4294901760, %v533_v11  ;;  %v1053_v51 = vsub.f32 %v13551_v35, %v1052_v43  ;;  %v1060_v52 = vsub.f32 %v13556_v36, %v1059_v44  ;;  %v1067_v53 = vsub.f32 %v13561_v37, %v1066_v45 }
  0x12   : > { %v436_v6 = vld [vmem:[%s412_s29] sm:$0xff]  ;;  %v1073_v54 = vand.u32 4294901760, %v13576_v46  ;;  %v1033_v55 = vand.u32 4294901760, %v1032_v47  ;;  %v1040_v56 = vand.u32 4294901760, %v1039_v48  ;;  %v1047_v57 = vand.u32 4294901760, %v1046_v49  ;;  %s416_s29 = scalar_lea.vmem %s15818_s11, %s9479_s10 }
  0x13   : > { %v447_v7 = vsel %vm445_vm2, %v436_v6, 0  ;;  %v1080_v58 = vand.u32 4294901760, %v13590_v50  ;;  %v1054_v59 = vand.u32 4294901760, %v1053_v51  ;;  %v13603_v61 = vpack.c.bf16 %v951_v26, %v948_v23 }
  0x14   : > { %v519_v9 = vand.u32 4294901760, %v447_v7  ;;  %v12180_v60 = vpack.c.bf16 %v1040_v56, %v1033_v55  ;;  %v1061_v62 = vand.u32 4294901760, %v1060_v52  ;;  %v1068_v0 = vand.u32 4294901760, %v1067_v53 }
  0x15   : > { %v12183_v63 = vpack.c.bf16 %v1054_v59, %v1047_v57  ;;  %v1074_v1 = vsub.f32 %v13576_v46, %v1073_v54  ;;  %v1081_v3 = vsub.f32 %v13590_v50, %v1080_v58  ;;  %v13657_v56 = vpack.c.bf16 %v957_v28, %v954_v27  ;;  %v9481_v27 = vld [vmem:[%s15809_s2] ss:$0 sm:$0xff] }
  0x16   : > { %v520_v10 = vsub.f32 %v447_v7, %v519_v9  ;;  %12181 = vmatpush3.bf16.msra.mxu1 %v12180_v60  ;;  %v420_v57 = vlaneseq  ;;  %v13666_v24 = vpack.c.bf16 %v963_v42, %v960_v38  ;;  %vm916_vm5 = vcmask 261120  }
  0x17   : > { %12182 = vmatprep.subr.bf16.mxu1 %v13394_v19  ;;  %v1082_v6 = vand.u32 4294901760, %v1081_v3  ;;  %vm918_vm6 = vcmask 523264   ;;  %vm937_vm7 = vcmask 785408   ;;  %vm4939_vm14 = vcmask 64512  }
  0x18   : > { %v521_v12 = vand.u32 4294901760, %v520_v10  ;;  %v13669_v25 = vshrl.u32 %v420_v57, 7  ;;  %vm5389_vm15 = vcmask 0   ;;  %vm9394_vm0 = vcmask 15360  }
  0x1a   : > { %v522_v13 = vsub.f32 %v520_v10, %v521_v12  ;;  %12184 = vmatpush3.bf16.msra.mxu1 %v12183_v63  ;;  %v426_v29 = vand.u32 7, %v13669_v25 }
  0x1b   : > { %12185 = vmatprep.subr.bf16.mxu1 %v13394_v19 }
  0x1c   : > { %v523_v15 = vand.u32 4294901760, %v522_v13  ;;  %vm13682_vm3 = vcmp.eq.s32.totalorder %v426_v29, 7  ;;  %vm13698_vm4 = vcmp.eq.s32.totalorder %v426_v29, 0 }
  0x1e   : > { %10412 = vmatmul.mubr.f32.vlgmr.msra.gmra.mrb[0].mxu0 %v523_v15  ;;  %v931_v15 = vld [vmem:[%s15810_s3 + $0x58] sm:$0xff] }
  0x1f   : > { %10415 = vmatpush3.msra.mxu0 %v534_v14  ;;  %10416 = vmatprep.mubr.msk.f32.mxu0 %vm13393_vm1, %v13392_v2  ;;  %v930_v14 = vld [vmem:[%s15810_s3 + $0x50] sm:$0xff]  ;;  %v975_v20 = vand.u32 4294901760, %v931_v15 }
  0x20   : > { %10419 = vmatprep.subr.mxu0 %v13392_v2  ;;  %v972_v18 = vand.u32 4294901760, %v930_v14 }
  0x21   : > { %v13643_v26 = vsub.f32 %v931_v15, %v975_v20 }
  0x22   : > { %v13641_v23 = vsub.f32 %v930_v14, %v972_v18 }
  0x23   : > { %v1108_v51 = vand.u32 4294901760, %v13643_v26 }
  0x24   : > { %v1101_v49 = vand.u32 4294901760, %v13641_v23 }
  0x25   : > { %v1109_v55 = vsub.f32 %v13643_v26, %v1108_v51 }
  0x26   : > { %10417 = vmatmul.mubr.f32.vlgmr.msra.gmra.mrb[0].mxu0 %v519_v9  ;;  %v1102_v53 = vsub.f32 %v13641_v23, %v1101_v49 }
  0x27   : > { %10420 = vmatpush3.msra.mxu0 %v531_v5  ;;  %10421 = vmatprep.mubr.msk.f32.mxu0 %vm13393_vm1, %v13392_v2  ;;  %v1075_v5 = vand.u32 4294901760, %v1074_v1  ;;  %v1110_v60 = vand.u32 4294901760, %v1109_v55  ;;  %v13686_v1 = vpack.c.bf16 %v975_v20, %v972_v18  ;;  %v12198_v20 = vpack.c.bf16 %v13545_v32, %v13543_v31 }
  0x28   : > { %10424 = vmatprep.subr.mxu0 %v13392_v2  ;;  %v1103_v59 = vand.u32 4294901760, %v1102_v53  ;;  %v12204_v53 = vpack.c.bf16 %v13561_v37, %v13556_v36  ;;  %v12240_v31 = vpack.c.bf16 %v1066_v45, %v1059_v44  ;;  %v12243_v32 = vpack.c.bf16 %v1080_v58, %v1073_v54  ;;  %v9484_v36 = vld [vmem:[%s15810_s3 + $0x68] sm:$0xff]  ;;  %v9485_v37 = vld [vmem:[%s15810_s3 + $0x70] sm:$0xff] }
  0x29   : > { %v12189_v7 = vpack.c.bf16 %v1082_v6, %v1075_v5  ;;  %v12213_v6 = vpack.c.bf16 %v13643_v26, %v13641_v23 }
  0x2e   : > { %10422 = vmatmul.mubr.f32.vlgmr.msra.gmra.mrb[0].mxu0 %v520_v10 }
  0x2f   : > { %10425 = vmatpush3.msra.mxu0 %v454_v4  ;;  %10426 = vmatprep.mubr.msk.f32.mxu0 %vm13393_vm1, %v13392_v2 }
  0x30   : > { %10429 = vmatprep.subr.mxu0 %v13392_v2 }
  0x36   : > { %10427 = vmatmul.mubr.f32.vlgmr.msra.gmra.mrb[0].mxu0 %v521_v12 }
  0x37   : > { %10430 = vmatpush3.msra.mxu0 %v532_v8  ;;  %10431 = vmatprep.mubr.msk.f32.mxu0 %vm13393_vm1, %v13392_v2  ;;  %v928_v8 = vld [vmem:[%s15810_s3 + $0x40] sm:$0xff] }
  0x38   : > { %10434 = vmatprep.subr.mxu0 %v13392_v2  ;;  %v966_v10 = vand.u32 4294901760, %v928_v8 }
  0x3a   : > { %v13623_v12 = vsub.f32 %v928_v8, %v966_v10 }
  0x3c   : > { %v1087_v16 = vand.u32 4294901760, %v13623_v12 }
  0x3e   : > { %10432 = vmatmul.mubr.f32.vlgmr.msra.gmra.mrb[0].mxu0 %v519_v9  ;;  %v1088_v21 = vsub.f32 %v13623_v12, %v1087_v16 }
  0x3f   : > { %10435 = vmatpush3.msra.mxu0 %v454_v4  ;;  %10436 = vmatprep.mubr.msk.f32.mxu0 %vm13393_vm1, %v13392_v2  ;;  %v12186_v4 = vpack.c.bf16 %v1068_v0, %v1061_v62  ;;  %v12195_v62 = vpack.c.bf16 %v1110_v60, %v1103_v59  ;;  %v12207_v59 = vpack.c.bf16 %v13590_v50, %v13576_v46 }
  0x40   : > { %12161 = vmatprep.subr.bf16.mxu0 %v13394_v19  ;;  %v1089_v47 = vand.u32 4294901760, %v1088_v21  ;;  %v12234_v60 = vpack.c.bf16 %v1038_v40, %v1031_v39  ;;  %v1570_v40 = vand.u32 4294901760, %v9484_v36 }
  0x41   : > { %12187 = vmatpush3.bf16.msra.mxu1 %v12186_v4 }
  0x42   : > { %12188 = vmatprep.subr.bf16.mxu1 %v13394_v19  ;;  %v13809_v50 = vsub.f32 %v9484_v36, %v1570_v40 }
  0x45   : > { %12190 = vmatpush3.bf16.msra.mxu1 %v12189_v7 }
  0x46   : > { %10437 = vmatmul.mubr.f32.vlgmr.msra.gmra.mrb[0].mxu0 %v519_v9  ;;  %12191 = vmatprep.subr.bf16.mxu1 %v13394_v19  ;;  %v929_v9 = vld [vmem:[%s15810_s3 + $0x48] sm:$0xff] }
  0x47   : > { %10463 = vmatprep.mubr.msk.f32.mxu0 %vm13393_vm1, %v13392_v2  ;;  %12163 = vmatpush3.bf16.msra.mxu0 %v13549_v34  ;;  %v969_v11 = vand.u32 4294901760, %v929_v9 }
  0x48   : > { %12164 = vmatprep.subr.bf16.mxu0 %v13394_v19 }
  0x49   : > { %v13625_v13 = vsub.f32 %v929_v9, %v969_v11  ;;  %v13678_v30 = vpack.c.bf16 %v969_v11, %v966_v10 }
  0x4b   : > { %12166 = vmatpush3.bf16.msra.mxu0 %v13603_v61  ;;  %v1094_v17 = vand.u32 4294901760, %v13625_v13  ;;  %v12210_v5 = vpack.c.bf16 %v13625_v13, %v13623_v12 }
  0x4c   : > { %12167 = vmatprep.subr.bf16.mxu0 %v13394_v19 }
  0x4d   : > { %v1095_v22 = vsub.f32 %v13625_v13, %v1094_v17 }
  0x4f   : > { %v1096_v48 = vand.u32 4294901760, %v1095_v22  ;;  %12169 = vmatpush3.bf16.msra.mxu0 %v13657_v56 }
  0x50   : > { %12170 = vmatprep.subr.bf16.mxu0 %v13394_v19 }
  0x51   : > { %v12192_v52 = vpack.c.bf16 %v1096_v48, %v1089_v47  ;;  %v12201_v47 = vpack.c.bf16 %v13551_v35, %v13547_v33  ;;  %v12246_v33 = vpack.c.bf16 %v1094_v17, %v1087_v16  ;;  %v12249_v35 = vpack.c.bf16 %v1108_v51, %v1101_v49  ;;  %v9487_v16 = vld [vmem:[%s15810_s3 + $0x80] sm:$0xff]  ;;  %v9488_v17 = vld [vmem:[%s15810_s3 + $0x88] sm:$0xff]  ;;  %v9489_v51 = vld [vmem:[%s15810_s3 + $0x90] sm:$0xff] }
  0x52   : > { %v1579_v23 = vand.u32 4294901760, %v9487_v16  ;;  %v1582_v26 = vand.u32 4294901760, %v9488_v17 }
  0x53   : > { %12193 = vmatpush3.bf16.msra.mxu1 %v12192_v52  ;;  %12172 = vmatpush3.bf16.msra.mxu0 %v13666_v24 }
  0x54   : > { %12194 = vmatprep.subr.bf16.mxu1 %v13394_v19  ;;  %12173 = vmatprep.subr.bf16.mxu0 %v13394_v19  ;;  %v13827_v49 = vpack.c.bf16 %v1582_v26, %v1579_v23 }
  0x57   : > { %12196 = vmatpush3.bf16.msra.mxu1 %v12195_v62  ;;  %12175 = vmatpush3.bf16.msra.mxu0 %v13678_v30  ;;  %v12237_v62 = vpack.c.bf16 %v1052_v43, %v1045_v41  ;;  %v9486_v41 = vld [vmem:[%s15810_s3 + $0x78] sm:$0xff]  ;;  %v1573_v43 = vand.u32 4294901760, %v9485_v37 }
  0x58   : > { %12197 = vmatprep.subr.bf16.mxu1 %v13394_v19  ;;  %12176 = vmatprep.subr.bf16.mxu0 %v13394_v19  ;;  %v1576_v44 = vand.u32 4294901760, %v9486_v41 }
  0x59   : > { %v13811_v54 = vsub.f32 %v9485_v37, %v1573_v43 }
  0x5a   : > { %v13813_v58 = vsub.f32 %v9486_v41, %v1576_v44 }
  0x5b   : > { %12178 = vmatpush3.bf16.msra.mxu0 %v13686_v1 }
  0x5c   : > { %12269 = vmatprep.subr.bf16.mxu0 %v13394_v19 }
 0x119   : > { %v895_v28 = vpop.f32.mrb[0].mxu0 }
 0x11a   : > { %v13241_v38 = vadd.f32 %v9481_v27, %v895_v28  ;;  %v10438_v42 = vpop.f32.mrb[1].mxu0  ;;  %v13838_v27 = vsub.f32 %v9488_v17, %v1582_v26  ;;  %v1585_v28 = vand.u32 4294901760, %v9489_v51 }
 0x11b   : > { %v9492_v42 = vld [vmem:[%s15810_s3 + $0xa8] sm:$0xff] }
 0x11c   : > { %v899_v63 = vmax.f32 %v13241_v38, 0.0  ;;  %v9491_v38 = vld [vmem:[%s15810_s3 + $0xa0] sm:$0xff] }
 0x11e   : > { %909 = vrot.lane.b32.xlu0 %v899_v63, %s13395_s22  ;;  %v904_v3 = vrot.slane %v899_v63, 1  ;;  %v900_v7 = vrot.slane %v899_v63, 7  ;;  %v9482_v63 = vld [vmem:[%s15811_s4] ss:$0 sm:$0xff] }
 0x120   : > { %v907_v4 = vsel %vm13682_vm3, 0.0, %v904_v3  ;;  %v903_v10 = vsel %vm13698_vm4, 0.0, %v900_v7  ;;  %v1594_v3 = vand.u32 4294901760, %v9492_v42  ;;  %v9494_v7 = vld [vmem:[%s15810_s3 + $0xb8] sm:$0xff] }
 0x122   : > { %913 = vrot.lane.b32.xlu0 %v907_v4, %s13396_s25 }
 0x190   : > { %v910_v9 = vpop.permute.xlu0 %909 }
 0x191   : > { %v917_v11 = vsel %vm916_vm5, %v903_v10, %v910_v9 }
 0x194   : > { %v914_v14 = vpop.permute.xlu0 %913 }
 0x195   : > { %v919_v15 = vsel %vm918_vm6, %v917_v11, %v914_v14  ;;  %v1600_v11 = vand.u32 4294901760, %v9494_v7 }
 0x196   : > { %v939_v18 = vsel %vm937_vm7, %v919_v15, 0  ;;  %v1663_v15 = vand.u32 4294901760, %v13809_v50 }
 0x197   : > { %v13709_v21 = vand.u32 4294901760, %v939_v18 }
 0x199   : > { %v1019_v22 = vsub.f32 %v939_v18, %v13709_v21  ;;  %10491 = vmatmul.mubr.f32.vlgmr.msra.gmra.mrb[0].mxu1 %v13709_v21 }
 0x19a   : > { %12199 = vmatpush3.bf16.msra.mxu1 %v12198_v20  ;;  %10517 = vmatprep.mubr.msk.f32.mxu1 %vm13393_vm1, %v13392_v2 }
 0x19b   : > { %v1020_v48 = vand.u32 4294901760, %v1019_v22  ;;  %12200 = vmatprep.subr.bf16.mxu1 %v13394_v19 }
 0x19d   : > { %v1021_v52 = vsub.f32 %v1019_v22, %v1020_v48 }
 0x19e   : > { %12202 = vmatpush3.bf16.msra.mxu1 %v12201_v47 }
 0x19f   : > { %12203 = vmatprep.subr.bf16.mxu1 %v13394_v19  ;;  %v1022_v55 = vand.u32 4294901760, %v1021_v52 }
 0x1a1   : > { %10464 = vmatmul.mubr.f32.vlgmr.msra.gmra.mrb[2].mxu0 %v1022_v55 }
 0x1a2   : > { %12205 = vmatpush3.bf16.msra.mxu1 %v12204_v53  ;;  %10625 = vmatprep.mubr.msk.f32.mxu0 %vm13393_vm1, %v13392_v2 }
 0x1a3   : > { %12206 = vmatprep.subr.bf16.mxu1 %v13394_v19 }
 0x1a6   : > { %12208 = vmatpush3.bf16.msra.mxu1 %v12207_v59  ;;  %v13881_v59 = vsub.f32 %v9494_v7, %v1600_v11 }
 0x1a7   : > { %12209 = vmatprep.subr.bf16.mxu1 %v13394_v19 }
 0x1aa   : > { %12211 = vmatpush3.bf16.msra.mxu1 %v12210_v5 }
 0x1ab   : > { %12212 = vmatprep.subr.bf16.mxu1 %v13394_v19 }
 0x1ae   : > { %12214 = vmatpush3.bf16.msra.mxu1 %v12213_v6  ;;  %v9493_v6 = vld [vmem:[%s15810_s3 + $0xb0] sm:$0xff] }
 0x1af   : > { %12215 = vmatprep.subr.bf16.mxu1 %v13394_v19  ;;  %v1597_v10 = vand.u32 4294901760, %v9493_v6 }
 0x1b1   : > { %10518 = vmatmul.mubr.f32.vlgmr.msra.gmra.mrb[0].mxu1 %v1019_v22  ;;  %v13877_v53 = vpack.c.bf16 %v1600_v11, %v1597_v10  ;;  %v13879_v55 = vsub.f32 %v9493_v6, %v1597_v10 }
 0x1b2   : > { %12217 = vmatpush3.bf16.msra.mxu1 %v13549_v34  ;;  %10544 = vmatprep.mubr.msk.f32.mxu1 %vm13393_vm1, %v13392_v2 }
 0x1b3   : > { %12218 = vmatprep.subr.bf16.mxu1 %v13394_v19  ;;  %v1726_v11 = vand.u32 4294901760, %v13879_v55 }
 0x1b6   : > { %12220 = vmatpush3.bf16.msra.mxu1 %v13603_v61 }
 0x1b7   : > { %12221 = vmatprep.subr.bf16.mxu1 %v13394_v19 }
 0x1ba   : > { %12223 = vmatpush3.bf16.msra.mxu1 %v13657_v56 }
 0x1bb   : > { %12224 = vmatprep.subr.bf16.mxu1 %v13394_v19 }
 0x1be   : > { %12226 = vmatpush3.bf16.msra.mxu1 %v13666_v24 }
 0x1bf   : > { %12227 = vmatprep.subr.bf16.mxu1 %v13394_v19 }
 0x1c2   : > { %12229 = vmatpush3.bf16.msra.mxu1 %v13678_v30 }
 0x1c3   : > { %12230 = vmatprep.subr.bf16.mxu1 %v13394_v19 }
 0x1c6   : > { %12232 = vmatpush3.bf16.msra.mxu1 %v13686_v1 }
 0x1c7   : > { %12233 = vmatprep.subr.bf16.mxu1 %v13394_v19 }
 0x1c9   : > { %10545 = vmatmul.mubr.f32.vlgmr.msra.gmra.mrb[0].mxu1 %v1020_v48  ;;  %v13874_v48 = vsub.f32 %v9492_v42, %v1594_v3 }
 0x1ca   : > { %12235 = vmatpush3.bf16.msra.mxu1 %v12234_v60  ;;  %10571 = vmatprep.mubr.msk.f32.mxu1 %vm13393_vm1, %v13392_v2 }
 0x1cb   : > { %12236 = vmatprep.subr.bf16.mxu1 %v13394_v19 }
 0x1ce   : > { %12238 = vmatpush3.bf16.msra.mxu1 %v12237_v62  ;;  %v1664_v62 = vsub.f32 %v13809_v50, %v1663_v15 }
 0x1cf   : > { %12239 = vmatprep.subr.bf16.mxu1 %v13394_v19 }
 0x1d2   : > { %12241 = vmatpush3.bf16.msra.mxu1 %v12240_v31 }
 0x1d3   : > { %12242 = vmatprep.subr.bf16.mxu1 %v13394_v19 }
 0x1d6   : > { %12244 = vmatpush3.bf16.msra.mxu1 %v12243_v32  ;;  %v1670_v32 = vand.u32 4294901760, %v13811_v54 }
 0x1d7   : > { %12245 = vmatprep.subr.bf16.mxu1 %v13394_v19 }
 0x1d8   : > { %v1671_v37 = vsub.f32 %v13811_v54, %v1670_v32 }
 0x1da   : > { %12247 = vmatpush3.bf16.msra.mxu1 %v12246_v33  ;;  %v1677_v33 = vand.u32 4294901760, %v13813_v58  ;;  %v1672_v41 = vand.u32 4294901760, %v1671_v37 }
 0x1db   : > { %12248 = vmatprep.subr.bf16.mxu1 %v13394_v19 }
 0x1de   : > { %12250 = vmatpush3.bf16.msra.mxu1 %v12249_v35 }
 0x1df   : > { %12251 = vmatprep.subr.bf16.mxu1 %v13394_v19 }
 0x1e1   : > { %10572 = vmatmul.mubr.f32.vlgmr.msra.gmra.mrb[0].mxu1 %v13709_v21 }
 0x1e2   : > { %12253 = vmatpush3.bf16.msra.mxu1 %v13549_v34  ;;  %10598 = vmatprep.mubr.msk.f32.mxu1 %vm13393_vm1, %v13392_v2  ;;  %v9483_v34 = vld [vmem:[%s15810_s3 + $0x60] sm:$0xff] }
 0x1e3   : > { %12254 = vmatprep.subr.bf16.mxu1 %v13394_v19  ;;  %v1567_v39 = vand.u32 4294901760, %v9483_v34 }
 0x1e5   : > { %v13805_v45 = vpack.c.bf16 %v1570_v40, %v1567_v39  ;;  %v13807_v46 = vsub.f32 %v9483_v34, %v1567_v39  ;;  %v1665_v34 = vand.u32 4294901760, %v1664_v62  ;;  %v1678_v39 = vsub.f32 %v13813_v58, %v1677_v33 }
 0x1e6   : > { %12256 = vmatpush3.bf16.msra.mxu1 %v13603_v61  ;;  %v13816_v61 = vpack.c.bf16 %v1576_v44, %v1573_v43  ;;  %v1727_v62 = vsub.f32 %v13879_v55, %v1726_v11 }
 0x1e7   : > { %12257 = vmatprep.subr.bf16.mxu1 %v13394_v19  ;;  %12271 = vmatpush3.bf16.msra.mxu0 %v13805_v45  ;;  %v1656_v14 = vand.u32 4294901760, %v13807_v46  ;;  %v1679_v43 = vand.u32 4294901760, %v1678_v39  ;;  %v12306_v37 = vpack.c.bf16 %v13809_v50, %v13807_v46  ;;  %v12309_v39 = vpack.c.bf16 %v13813_v58, %v13811_v54 }
 0x1e8   : > { %12272 = vmatprep.subr.bf16.mxu0 %v13394_v19 }
 0x1e9   : > { %v1657_v60 = vsub.f32 %v13807_v46, %v1656_v14 }
 0x1ea   : > { %12259 = vmatpush3.bf16.msra.mxu1 %v13657_v56  ;;  %v9490_v56 = vld [vmem:[%s15810_s3 + $0x98] sm:$0xff] }
 0x1eb   : > { %12260 = vmatprep.subr.bf16.mxu1 %v13394_v19  ;;  %12274 = vmatpush3.bf16.msra.mxu0 %v13816_v61  ;;  %v1588_v29 = vand.u32 4294901760, %v9490_v56  ;;  %v1658_v35 = vand.u32 4294901760, %v1657_v60 }
 0x1ec   : > { %12275 = vmatprep.subr.bf16.mxu0 %v13394_v19 }
 0x1ed   : > { %v13870_v22 = vsub.f32 %v9490_v56, %v1588_v29  ;;  %v12288_v40 = vpack.c.bf16 %v1665_v34, %v1658_v35  ;;  %v1728_v35 = vand.u32 4294901760, %v1727_v62 }
 0x1ee   : > { %12262 = vmatpush3.bf16.msra.mxu1 %v13666_v24  ;;  %v13836_v24 = vsub.f32 %v9487_v16, %v1579_v23 }
 0x1ef   : > { %12263 = vmatprep.subr.bf16.mxu1 %v13394_v19  ;;  %12277 = vmatpush3.bf16.msra.mxu0 %v13827_v49  ;;  %v1705_v56 = vand.u32 4294901760, %v13870_v22 }
 0x1f0   : > { %12278 = vmatprep.subr.bf16.mxu0 %v13394_v19  ;;  %v1684_v44 = vand.u32 4294901760, %v13836_v24 }
 0x1f2   : > { %12265 = vmatpush3.bf16.msra.mxu1 %v13678_v30  ;;  %v13841_v30 = vpack.c.bf16 %v1588_v29, %v1585_v28  ;;  %v1685_v16 = vsub.f32 %v13836_v24, %v1684_v44 }
 0x1f3   : > { %12266 = vmatprep.subr.bf16.mxu1 %v13394_v19 }
 0x1f4   : > { %12280 = vmatpush3.bf16.msra.mxu0 %v13841_v30  ;;  %v1686_v23 = vand.u32 4294901760, %v1685_v16 }
 0x1f5   : > { %12281 = vmatprep.subr.bf16.mxu0 %v13394_v19 }
 0x1f6   : > { %12268 = vmatpush3.bf16.msra.mxu1 %v13686_v1  ;;  %v1591_v1 = vand.u32 4294901760, %v9491_v38 }
 0x1f7   : > { %12377 = vmatprep.subr.bf16.mxu1 %v13394_v19 }
 0x1f8   : > { %v13854_v4 = vpack.c.bf16 %v1594_v3, %v1591_v1  ;;  %v13872_v47 = vsub.f32 %v9491_v38, %v1591_v1  ;;  %v1706_v38 = vsub.f32 %v13870_v22, %v1705_v56  ;;  %v1719_v3 = vand.u32 4294901760, %v13874_v48 }
 0x1f9   : > { %10599 = vmatmul.mubr.f32.vlgmr.msra.gmra.mrb[0].mxu1 %v13709_v21  ;;  %v13868_v21 = vsub.f32 %v9489_v51, %v1585_v28 }
 0x1fa   : > { %10771 = vmatprep.mubr.msk.f32.mxu1 %vm13393_vm1, %v13392_v2  ;;  %12283 = vmatpush3.bf16.msra.mxu0 %v13854_v4  ;;  %v1712_v1 = vand.u32 4294901760, %v13872_v47  ;;  %v1720_v7 = vsub.f32 %v13874_v48, %v1719_v3  ;;  %v12318_v16 = vpack.c.bf16 %v13874_v48, %v13872_v47 }
 0x1fb   : > { %12284 = vmatprep.subr.bf16.mxu0 %v13394_v19  ;;  %v1698_v51 = vand.u32 4294901760, %v13868_v21 }
 0x1fc   : > { %v1713_v6 = vsub.f32 %v13872_v47, %v1712_v1  ;;  %v1721_v10 = vand.u32 4294901760, %v1720_v7  ;;  %v12354_v54 = vpack.c.bf16 %v1719_v3, %v1712_v1 }
 0x1fd   : > { %v1699_v29 = vsub.f32 %v13868_v21, %v1698_v51  ;;  %v12351_v50 = vpack.c.bf16 %v1705_v56, %v1698_v51 }
 0x1fe   : > { %12286 = vmatpush3.bf16.msra.mxu0 %v13877_v53 }
 0x1ff   : > { %12287 = vmatprep.subr.bf16.mxu0 %v13394_v19  ;;  %v1700_v42 = vand.u32 4294901760, %v1699_v29 }
 0x274   : > { %v1024_v12 = vpop.f32.mrb[2].mxu0 }
 0x275   : > { %v10465_v13 = vpop.f32.mrb[3].mxu0  ;;  %v1025_v5 = vadd.f32 %v9482_v63, %v1024_v12  ;;  %v1691_v12 = vand.u32 4294901760, %v13838_v27  ;;  %v1707_v63 = vand.u32 4294901760, %v1706_v38 }
 0x276   : > { %v12291_v13 = vpack.c.bf16 %v1679_v43, %v1672_v41  ;;  %v12312_v41 = vpack.c.bf16 %v13838_v27, %v13836_v24  ;;  %v12315_v43 = vpack.c.bf16 %v13870_v22, %v13868_v21 }
 0x277   : > { %v1692_v17 = vsub.f32 %v13838_v27, %v1691_v12  ;;  %v12348_v46 = vpack.c.bf16 %v1691_v12, %v1684_v44 }
 0x279   : > { %v1693_v26 = vand.u32 4294901760, %v1692_v17  ;;  %v12321_v17 = vpack.c.bf16 %v13881_v59, %v13879_v55 }
 0x27b   : > { %v12294_v28 = vpack.c.bf16 %v1693_v26, %v1686_v23 }
 0x2cc   : > { %v1526_v9 = vpop.f32.mrb[0].mxu1 }
 0x2cd   : > { %v13865_v18 = vadd.f32 %v1526_v9, %v1025_v5  ;;  %v10600_v20 = vpop.f32.mrb[1].mxu1  ;;  %v12297_v5 = vpack.c.bf16 %v1707_v63, %v1700_v42  ;;  %v1714_v9 = vand.u32 4294901760, %v1713_v6 }
 0x2ce   : > { %v1733_v20 = vand.u32 4294901760, %v13881_v59 }
 0x2cf   : > { %v1530_v52 = vmax.f32 %v13865_v18, 0.0  ;;  %v12300_v60 = vpack.c.bf16 %v1721_v10, %v1714_v9 }
 0x2d0   : > { %v12357_v58 = vpack.c.bf16 %v1733_v20, %v1726_v11 }
 0x2d1   : > { %1536 = vrot.lane.b32.xlu1 %v1530_v52, %s13395_s22  ;;  %v1533_v31 = vrot.slane %v1530_v52, 1  ;;  %v1531_v23 = vrot.slane %v1530_v52, 7  ;;  %v12342_v52 = vpack.c.bf16 %v1663_v15, %v1656_v14 }
 0x2d3   : > { %v1534_v36 = vsel %vm13682_vm3, 0.0, %v1533_v31  ;;  %v1734_v31 = vsub.f32 %v13881_v59, %v1733_v20  ;;  %v1532_v29 = vsel %vm13698_vm4, 0.0, %v1531_v23 }
 0x2d5   : > { %1540 = vrot.lane.b32.xlu1 %v1534_v36, %s13396_s25  ;;  %v1735_v34 = vand.u32 4294901760, %v1734_v31 }
 0x2d7   : > { %v12303_v36 = vpack.c.bf16 %v1735_v34, %v1728_v35 }
 0x343   : > { %v1537_v26 = vpop.permute.xlu1 %1536 }
 0x344   : > { %v1543_v38 = vsel %vm916_vm5, %v1532_v29, %v1537_v26 }
 0x347   : > { %v1541_v42 = vpop.permute.xlu1 %1540 }
 0x348   : > { %v1544_v63 = vsel %vm918_vm6, %v1543_v38, %v1541_v42  ;;  %v9497_v42 = vld [vmem:[%s15810_s3 + $0xc0] sm:$0xff] }
 0x349   : > { %v1564_v6 = vsel %vm937_vm7, %v1544_v63, 0  ;;  %v9498_v63 = vld [vmem:[%s15810_s3 + $0xc8] sm:$0xff] }
 0x34a   : > { %v13952_v7 = vand.u32 4294901760, %v1564_v6 }
 0x34c   : > { %v1644_v9 = vsub.f32 %v1564_v6, %v13952_v7  ;;  %v9499_v6 = vld [vmem:[%s15810_s3 + $0xd0] sm:$0xff] }
 0x34e   : > { %v1645_v10 = vand.u32 4294901760, %v1644_v9 }
 0x350   : > { %v1646_v62 = vsub.f32 %v1644_v9, %v1645_v10 }
 0x352   : > { %v1647_v31 = vand.u32 4294901760, %v1646_v62  ;;  %v2698_v62 = vand.u32 4294901760, %v9499_v6 }
 0x354   : > { %10626 = vmatmul.mubr.f32.vlgmr.msra.gmra.mrb[4].mxu0 %v1647_v31  ;;  %v9501_v31 = vld [vmem:[%s15810_s3 + $0xe0] sm:$0xff] }
 0x355   : > { %12289 = vmatpush3.bf16.msra.mxu0 %v12288_v40  ;;  %10652 = vmatprep.mubr.msk.f32.mxu0 %vm13393_vm1, %v13392_v2  ;;  %v12345_v40 = vpack.c.bf16 %v1677_v33, %v1670_v32 }
 0x356   : > { %12290 = vmatprep.subr.bf16.mxu0 %v13394_v19 }
 0x359   : > { %12292 = vmatpush3.bf16.msra.mxu0 %v12291_v13 }
 0x35a   : > { %12293 = vmatprep.subr.bf16.mxu0 %v13394_v19 }
 0x35d   : > { %12295 = vmatpush3.bf16.msra.mxu0 %v12294_v28 }
 0x35e   : > { %12296 = vmatprep.subr.bf16.mxu0 %v13394_v19 }
 0x361   : > { %12298 = vmatpush3.bf16.msra.mxu0 %v12297_v5 }
 0x362   : > { %12299 = vmatprep.subr.bf16.mxu0 %v13394_v19 }
 0x365   : > { %12301 = vmatpush3.bf16.msra.mxu0 %v12300_v60 }
 0x366   : > { %12302 = vmatprep.subr.bf16.mxu0 %v13394_v19 }
 0x369   : > { %12304 = vmatpush3.bf16.msra.mxu0 %v12303_v36  ;;  %v9495_v36 = vld [vmem:[%s15811_s4 + $0x1] ss:$0 sm:$0xff] }
 0x36a   : > { %12305 = vmatprep.subr.bf16.mxu0 %v13394_v19 }
 0x36c   : > { %10653 = vmatmul.mubr.f32.vlgmr.msra.gmra.mrb[4].mxu0 %v13952_v7 }
 0x36d   : > { %12307 = vmatpush3.bf16.msra.mxu0 %v12306_v37  ;;  %10679 = vmatprep.mubr.msk.f32.mxu0 %vm13393_vm1, %v13392_v2 }
 0x36e   : > { %12308 = vmatprep.subr.bf16.mxu0 %v13394_v19 }
 0x371   : > { %12310 = vmatpush3.bf16.msra.mxu0 %v12309_v39 }
 0x372   : > { %12311 = vmatprep.subr.bf16.mxu0 %v13394_v19 }
 0x375   : > { %12313 = vmatpush3.bf16.msra.mxu0 %v12312_v41 }
 0x376   : > { %12314 = vmatprep.subr.bf16.mxu0 %v13394_v19 }
 0x379   : > { %12316 = vmatpush3.bf16.msra.mxu0 %v12315_v43 }
 0x37a   : > { %12317 = vmatprep.subr.bf16.mxu0 %v13394_v19 }
 0x37d   : > { %12319 = vmatpush3.bf16.msra.mxu0 %v12318_v16 }
 0x37e   : > { %12320 = vmatprep.subr.bf16.mxu0 %v13394_v19 }
 0x381   : > { %12322 = vmatpush3.bf16.msra.mxu0 %v12321_v17 }
 0x382   : > { %12323 = vmatprep.subr.bf16.mxu0 %v13394_v19 }
 0x384   : > { %10680 = vmatmul.mubr.f32.vlgmr.msra.gmra.mrb[4].mxu0 %v1644_v9  ;;  %v2695_v9 = vand.u32 4294901760, %v9498_v63 }
 0x385   : > { %12325 = vmatpush3.bf16.msra.mxu0 %v13805_v45  ;;  %10706 = vmatprep.mubr.msk.f32.mxu0 %vm13393_vm1, %v13392_v2 }
 0x386   : > { %12326 = vmatprep.subr.bf16.mxu0 %v13394_v19 }
 0x389   : > { %12328 = vmatpush3.bf16.msra.mxu0 %v13816_v61 }
 0x38a   : > { %12329 = vmatprep.subr.bf16.mxu0 %v13394_v19 }
 0x38d   : > { %12331 = vmatpush3.bf16.msra.mxu0 %v13827_v49 }
 0x38e   : > { %12332 = vmatprep.subr.bf16.mxu0 %v13394_v19 }
 0x391   : > { %12334 = vmatpush3.bf16.msra.mxu0 %v13841_v30 }
 0x392   : > { %12335 = vmatprep.subr.bf16.mxu0 %v13394_v19 }
 0x395   : > { %12337 = vmatpush3.bf16.msra.mxu0 %v13854_v4 }
 0x396   : > { %12338 = vmatprep.subr.bf16.mxu0 %v13394_v19 }
 0x399   : > { %12340 = vmatpush3.bf16.msra.mxu0 %v13877_v53 }
 0x39a   : > { %12341 = vmatprep.subr.bf16.mxu0 %v13394_v19 }
 0x39c   : > { %10707 = vmatmul.mubr.f32.vlgmr.msra.gmra.mrb[4].mxu0 %v1645_v10  ;;  %v9500_v10 = vld [vmem:[%s15810_s3 + $0xd8] sm:$0xff] }
 0x39d   : > { %12343 = vmatpush3.bf16.msra.mxu0 %v12342_v52  ;;  %10733 = vmatprep.mubr.msk.f32.mxu0 %vm13393_vm1, %v13392_v2  ;;  %v9502_v52 = vld [vmem:[%s15810_s3 + $0xe8] sm:$0xff] }
 0x39e   : > { %12344 = vmatprep.subr.bf16.mxu0 %v13394_v19 }
 0x3a1   : > { %12346 = vmatpush3.bf16.msra.mxu0 %v12345_v40  ;;  %v2701_v40 = vand.u32 4294901760, %v9500_v10 }
 0x3a2   : > { %12347 = vmatprep.subr.bf16.mxu0 %v13394_v19 }
 0x3a5   : > { %12349 = vmatpush3.bf16.msra.mxu0 %v12348_v46  ;;  %v2704_v46 = vand.u32 4294901760, %v9501_v31 }
 0x3a6   : > { %12350 = vmatprep.subr.bf16.mxu0 %v13394_v19 }
 0x3a9   : > { %12352 = vmatpush3.bf16.msra.mxu0 %v12351_v50  ;;  %v2707_v50 = vand.u32 4294901760, %v9502_v52 }
 0x3aa   : > { %12353 = vmatprep.subr.bf16.mxu0 %v13394_v19 }
 0x3ad   : > { %12355 = vmatpush3.bf16.msra.mxu0 %v12354_v54 }
 0x3ae   : > { %12356 = vmatprep.subr.bf16.mxu0 %v13394_v19 }
 0x3b1   : > { %12358 = vmatpush3.bf16.msra.mxu0 %v12357_v58 }
 0x3b2   : > { %12359 = vmatprep.subr.bf16.mxu0 %v13394_v19 }
 0x3b4   : > { %10734 = vmatmul.mubr.f32.vlgmr.msra.gmra.mrb[4].mxu0 %v13952_v7 }
 0x3b5   : > { %12361 = vmatpush3.bf16.msra.mxu0 %v13805_v45  ;;  %10760 = vmatprep.mubr.msk.f32.mxu0 %vm13393_vm1, %v13392_v2  ;;  %v2156_v45 = vld [vmem:[%s15812_s5] sm:$0xff] }
 0x3b6   : > { %12362 = vmatprep.subr.bf16.mxu0 %v13394_v19 }
 0x3b9   : > { %12364 = vmatpush3.bf16.msra.mxu0 %v13816_v61  ;;  %v2157_v61 = vld [vmem:[%s15812_s5 + $0x8] sm:$0xff] }
 0x3ba   : > { %12365 = vmatprep.subr.bf16.mxu0 %v13394_v19  ;;  %v2167_v24 = vand.u32 4294901760, %v2157_v61 }
 0x3bc   : > { %v2251_v22 = vsub.f32 %v2157_v61, %v2167_v24  ;;  %v14100_v61 = vsub.f32 %v9499_v6, %v2698_v62 }
 0x3bd   : > { %12367 = vmatpush3.bf16.msra.mxu0 %v13827_v49  ;;  %v2164_v49 = vand.u32 4294901760, %v2156_v45 }
 0x3be   : > { %12368 = vmatprep.subr.bf16.mxu0 %v13394_v19  ;;  %v2252_v59 = vand.u32 4294901760, %v2251_v22 }
 0x3bf   : > { %v12378_v27 = vpack.c.bf16 %v2167_v24, %v2164_v49  ;;  %v2244_v21 = vsub.f32 %v2156_v45, %v2164_v49  ;;  %v14098_v45 = vsub.f32 %v9498_v63, %v2695_v9  ;;  %v14102_v49 = vsub.f32 %v9500_v10, %v2701_v40 }
 0x3c0   : > { %v2253_v33 = vsub.f32 %v2251_v22, %v2252_v59  ;;  %v14104_v24 = vsub.f32 %v9501_v31, %v2704_v46 }
 0x3c1   : > { %12370 = vmatpush3.bf16.msra.mxu0 %v13841_v30  ;;  %v2158_v30 = vld [vmem:[%s15812_s5 + $0x10] sm:$0xff]  ;;  %12379 = vmatpush3.bf16.msra.mxu1 %v12378_v27  ;;  %v2245_v55 = vand.u32 4294901760, %v2244_v21  ;;  %v12390_v20 = vpack.c.bf16 %v2251_v22, %v2244_v21 }
 0x3c2   : > { %12371 = vmatprep.subr.bf16.mxu0 %v13394_v19  ;;  %v2170_v14 = vand.u32 4294901760, %v2158_v30  ;;  %12380 = vmatprep.subr.bf16.mxu1 %v13394_v19  ;;  %v2254_v12 = vand.u32 4294901760, %v2253_v33 }
 0x3c3   : > { %v2246_v32 = vsub.f32 %v2244_v21, %v2245_v55  ;;  %v12402_v35 = vpack.c.bf16 %v2252_v59, %v2245_v55 }
 0x3c4   : > { %v2258_v48 = vsub.f32 %v2158_v30, %v2170_v14  ;;  %v14109_v30 = vsub.f32 %v9502_v52, %v2707_v50 }
 0x3c5   : > { %12373 = vmatpush3.bf16.msra.mxu0 %v13854_v4  ;;  %v2159_v4 = vld [vmem:[%s15812_s5 + $0x18] sm:$0xff]  ;;  %v2247_v44 = vand.u32 4294901760, %v2246_v32 }
 0x3c6   : > { %12374 = vmatprep.subr.bf16.mxu0 %v13394_v19  ;;  %v2173_v15 = vand.u32 4294901760, %v2159_v4  ;;  %v2259_v13 = vand.u32 4294901760, %v2258_v48 }
 0x3c7   : > { %v12384_v56 = vpack.c.bf16 %v2254_v12, %v2247_v44 }
 0x3c8   : > { %v12381_v47 = vpack.c.bf16 %v2173_v15, %v2170_v14  ;;  %v2260_v28 = vsub.f32 %v2258_v48, %v2259_v13 }
 0x3c9   : > { %12376 = vmatpush3.bf16.msra.mxu0 %v13877_v53  ;;  %v2265_v53 = vsub.f32 %v2159_v4, %v2173_v15  ;;  %v14113_v4 = vpack.c.bf16 %v2707_v50, %v2704_v46  ;;  %v2802_v46 = vand.u32 4294901760, %v14102_v49 }
 0x3ca   : > { %12395 = vmatprep.subr.bf16.mxu0 %v13394_v19  ;;  %12382 = vmatpush3.bf16.msra.mxu1 %v12381_v47  ;;  %v2261_v3 = vand.u32 4294901760, %v2260_v28 }
 0x3cb   : > { %12383 = vmatprep.subr.bf16.mxu1 %v13394_v19  ;;  %v2266_v51 = vand.u32 4294901760, %v2265_v53  ;;  %v12393_v60 = vpack.c.bf16 %v2265_v53, %v2258_v48 }
 0x3cc   : > { %10761 = vmatmul.mubr.f32.vlgmr.msra.gmra.mrb[4].mxu0 %v13952_v7  ;;  %v2692_v7 = vand.u32 4294901760, %v9497_v42 }
 0x3cd   : > { %10804 = vmatprep.mubr.msk.f32.mxu0 %vm13393_vm1, %v13392_v2  ;;  %12397 = vmatpush3.bf16.msra.mxu0 %v12378_v27  ;;  %v2267_v1 = vsub.f32 %v2265_v53, %v2266_v51  ;;  %v12405_v34 = vpack.c.bf16 %v2266_v51, %v2259_v13  ;;  %v9503_v13 = vld [vmem:[%s15810_s3 + $0xf0] sm:$0xff]  ;;  %v9504_v51 = vld [vmem:[%s15810_s3 + $0xf8] sm:$0xff] }
 0x3ce   : > { %12398 = vmatprep.subr.bf16.mxu0 %v13394_v19  ;;  %v14094_v54 = vpack.c.bf16 %v2695_v9, %v2692_v7  ;;  %v14096_v58 = vsub.f32 %v9497_v42, %v2692_v7  ;;  %v2713_v28 = vand.u32 4294901760, %v9504_v51 }
 0x3cf   : > { %v2268_v5 = vand.u32 4294901760, %v2267_v1 }
 0x3d0   : > { %v14154_v63 = vsub.f32 %v9504_v51, %v2713_v28 }
 0x3d1   : > { %12400 = vmatpush3.bf16.msra.mxu0 %v12381_v47  ;;  %v12387_v11 = vpack.c.bf16 %v2268_v5, %v2261_v3  ;;  %v9505_v5 = vld [vmem:[%s15810_s3 + $0x100] sm:$0xff] }
 0x3d2   : > { %12407 = vmatprep.subr.bf16.mxu0 %v13394_v19 }
 0x49f   : > { %v2151_v37 = vpop.f32.mrb[4].mxu0 }
 0x4a0   : > { %v13244_v39 = vadd.f32 %v9495_v36, %v2151_v37  ;;  %v10762_v41 = vpop.f32.mrb[5].mxu0 }
 0x4a1   : > { %v9507_v41 = vld [vmem:[%s15810_s3 + $0x110] sm:$0xff] }
 0x4a2   : > { %v2155_v43 = vmax.f32 %v13244_v39, 0.0  ;;  %v9496_v39 = vld [vmem:[%s15813_s6] ss:$0 sm:$0xff] }
 0x4a4   : > { %v2161_v16 = vsel %vm916_vm5, %v2155_v43, 0  ;;  %v9508_v43 = vld [vmem:[%s15810_s3 + $0x118] sm:$0xff] }
 0x4a5   : > { %v2232_v17 = vand.u32 4294901760, %v2161_v16 }
 0x4a7   : > { %v2233_v23 = vsub.f32 %v2161_v16, %v2232_v17 }
 0x4a9   : > { %v2234_v26 = vand.u32 4294901760, %v2233_v23 }
 0x4ab   : > { %10805 = vmatmul.mubr.f32.vlgmr.msra.gmra.mrb[6].mxu0 %v2234_v26  ;;  %v2235_v29 = vsub.f32 %v2233_v23, %v2234_v26  ;;  %v2781_v26 = vand.u32 4294901760, %v14096_v58 }
 0x4ac   : > { %12409 = vmatpush3.bf16.msra.mxu0 %v12378_v27  ;;  %10826 = vmatprep.mubr.msk.f32.mxu0 %vm13393_vm1, %v13392_v2  ;;  %v14107_v27 = vpack.c.bf16 %v2701_v40, %v2698_v62  ;;  %v2795_v40 = vand.u32 4294901760, %v14100_v61 }
 0x4ad   : > { %12410 = vmatprep.subr.bf16.mxu0 %v13394_v19  ;;  %v2236_v38 = vand.u32 4294901760, %v2235_v29  ;;  %v2788_v29 = vand.u32 4294901760, %v14098_v45  ;;  %v2782_v31 = vsub.f32 %v14096_v58, %v2781_v26 }
 0x4af   : > { %10772 = vmatmul.mubr.f32.vlgmr.msra.gmra.mrb[2].mxu1 %v2236_v38  ;;  %v2789_v52 = vsub.f32 %v14098_v45, %v2788_v29 }
 0x4b0   : > { %12385 = vmatpush3.bf16.msra.mxu1 %v12384_v56  ;;  %12412 = vmatpush3.bf16.msra.mxu0 %v12381_v47  ;;  %v2710_v56 = vand.u32 4294901760, %v9503_v13 }
 0x4b1   : > { %12386 = vmatprep.subr.bf16.mxu1 %v13394_v19  ;;  %10782 = vmatprep.mubr.msk.f32.mxu1 %vm13393_vm1, %v13392_v2 }
 0x4b2   : > { %12521 = vmatprep.subr.bf16.mxu0 %v13394_v19  ;;  %v14124_v1 = vpack.c.bf16 %v2713_v28, %v2710_v56  ;;  %v14152_v42 = vsub.f32 %v9503_v13, %v2710_v56  ;;  %v2830_v28 = vand.u32 4294901760, %v14154_v63 }
 0x4b3   : > { %10827 = vmatmul.mubr.f32.vlgmr.msra.gmra.mrb[8].mxu0 %v2232_v17 }
 0x4b4   : > { %12388 = vmatpush3.bf16.msra.mxu1 %v12387_v11  ;;  %10999 = vmatprep.mubr.msk.f32.mxu0 %vm13393_vm1, %v13392_v2  ;;  %v9506_v11 = vld [vmem:[%s15810_s3 + $0x108] sm:$0xff]  ;;  %v2823_v56 = vand.u32 4294901760, %v14152_v42 }
 0x4b5   : > { %12389 = vmatprep.subr.bf16.mxu1 %v13394_v19 }
 0x4b7   : > { %10783 = vmatmul.mubr.f32.vlgmr.msra.gmra.mrb[4].mxu1 %v2232_v17 }
 0x4b8   : > { %12391 = vmatpush3.bf16.msra.mxu1 %v12390_v20  ;;  %10793 = vmatprep.mubr.msk.f32.mxu1 %vm13393_vm1, %v13392_v2 }
 0x4b9   : > { %12392 = vmatprep.subr.bf16.mxu1 %v13394_v19 }
 0x4bc   : > { %12394 = vmatpush3.bf16.msra.mxu1 %v12393_v60 }
 0x4bd   : > { %12401 = vmatprep.subr.bf16.mxu1 %v13394_v19 }
 0x4bf   : > { %10794 = vmatmul.mubr.f32.vlgmr.msra.gmra.mrb[6].mxu1 %v2233_v23  ;;  %v2725_v23 = vand.u32 4294901760, %v9508_v43 }
 0x4c0   : > { %12403 = vmatpush3.bf16.msra.mxu1 %v12402_v35  ;;  %10815 = vmatprep.mubr.msk.f32.mxu1 %vm13393_vm1, %v13392_v2  ;;  %v2716_v35 = vand.u32 4294901760, %v9505_v5 }
 0x4c1   : > { %12404 = vmatprep.subr.bf16.mxu1 %v13394_v19  ;;  %v14164_v10 = vsub.f32 %v9508_v43, %v2725_v23 }
 0x4c2   : > { %v14156_v6 = vsub.f32 %v9505_v5, %v2716_v35  ;;  %v2824_v5 = vsub.f32 %v14152_v42, %v2823_v56 }
 0x4c4   : > { %12406 = vmatpush3.bf16.msra.mxu1 %v12405_v34  ;;  %v2719_v34 = vand.u32 4294901760, %v9506_v11 }
 0x4c5   : > { %12413 = vmatprep.subr.bf16.mxu1 %v13394_v19 }
 0x4c6   : > { %v14134_v37 = vpack.c.bf16 %v2719_v34, %v2716_v35  ;;  %v14158_v7 = vsub.f32 %v9506_v11, %v2719_v34  ;;  %v2831_v11 = vsub.f32 %v14154_v63, %v2830_v28  ;;  %v2837_v35 = vand.u32 4294901760, %v14156_v6 }
 0x4c7   : > { %10816 = vmatmul.mubr.f32.vlgmr.msra.gmra.mrb[8].mxu1 %v2232_v17  ;;  %v2722_v17 = vand.u32 4294901760, %v9507_v41 }
 0x4c8   : > { %10853 = vmatprep.mubr.msk.f32.mxu1 %vm13393_vm1, %v13392_v2  ;;  %12415 = vmatpush3.bf16.msra.mxu1 %v14094_v54  ;;  %v2844_v34 = vand.u32 4294901760, %v14158_v7 }
 0x4c9   : > { %12416 = vmatprep.subr.bf16.mxu1 %v13394_v19  ;;  %v14162_v9 = vsub.f32 %v9507_v41, %v2722_v17 }
 0x4ca   : > { %v2845_v41 = vsub.f32 %v14158_v7, %v2844_v34 }
 0x4cc   : > { %12418 = vmatpush3.bf16.msra.mxu1 %v14107_v27 }
 0x4cd   : > { %12419 = vmatprep.subr.bf16.mxu1 %v13394_v19 }
 0x4d0   : > { %12421 = vmatpush3.bf16.msra.mxu1 %v14113_v4 }
 0x4d1   : > { %12422 = vmatprep.subr.bf16.mxu1 %v13394_v19 }
 0x4d4   : > { %12424 = vmatpush3.bf16.msra.mxu1 %v14124_v1 }
 0x4d5   : > { %12425 = vmatprep.subr.bf16.mxu1 %v13394_v19 }
 0x4d8   : > { %12427 = vmatpush3.bf16.msra.mxu1 %v14134_v37 }
 0x4d9   : > { %12428 = vmatprep.subr.bf16.mxu1 %v13394_v19 }
 0x57e   : > { %v2486_v14 = vpop.f32.mrb[6].mxu0 }
 0x57f   : > { %v10806_v15 = vpop.f32.mrb[7].mxu0 }
 0x580   : > { %v2790_v15 = vand.u32 4294901760, %v2789_v52 }
 0x582   : > { %v2238_v21 = vpop.f32.mrb[2].mxu1 }
 0x583   : > { %v10773_v22 = vpop.f32.mrb[3].mxu1 }
 0x584   : > { %v2803_v22 = vsub.f32 %v14102_v49, %v2802_v46 }
 0x586   : > { %v2644_v47 = vpop.f32.mrb[8].mxu0 }
 0x587   : > { %v10828_v48 = vpop.f32.mrb[9].mxu0 }
 0x58a   : > { %v2329_v53 = vpop.f32.mrb[4].mxu1 }
 0x58b   : > { %v2330_v55 = vadd.f32 %v2329_v53, %v2238_v21  ;;  %v10784_v59 = vpop.f32.mrb[5].mxu1  ;;  %v2796_v21 = vsub.f32 %v14100_v61, %v2795_v40 }
 0x58c   : > { %v2809_v59 = vand.u32 4294901760, %v14104_v24 }
 0x58d   : > { %v2797_v53 = vand.u32 4294901760, %v2796_v21 }
 0x592   : > { %v2409_v32 = vpop.f32.mrb[6].mxu1 }
 0x593   : > { %v2410_v33 = vadd.f32 %v2409_v32, %v2330_v55  ;;  %v10795_v44 = vpop.f32.mrb[7].mxu1  ;;  %v2804_v55 = vand.u32 4294901760, %v2803_v22  ;;  %v2816_v32 = vand.u32 4294901760, %v14109_v30  ;;  %v12450_v22 = vpack.c.bf16 %v14098_v45, %v14096_v58 }
 0x594   : > { %v2810_v44 = vsub.f32 %v14104_v24, %v2809_v59  ;;  %v12495_v45 = vpack.c.bf16 %v2830_v28, %v2823_v56 }
 0x595   : > { %v2487_v12 = vadd.f32 %v2486_v14, %v2410_v33  ;;  %v2783_v14 = vand.u32 4294901760, %v2782_v31  ;;  %v12435_v33 = vpack.c.bf16 %v2804_v55, %v2797_v53  ;;  %v12456_v53 = vpack.c.bf16 %v14109_v30, %v14104_v24  ;;  %v9511_v24 = vld [vmem:[%s15812_s5 + $0x28] sm:$0xff] }
 0x596   : > { %v2811_v13 = vand.u32 4294901760, %v2810_v44  ;;  %v12459_v55 = vpack.c.bf16 %v14154_v63, %v14152_v42  ;;  %v12462_v44 = vpack.c.bf16 %v14158_v7, %v14156_v6  ;;  %v12492_v58 = vpack.c.bf16 %v2816_v32, %v2809_v59 }
 0x597   : > { %v12432_v48 = vpack.c.bf16 %v2790_v15, %v2783_v14 }
 0x59a   : > { %v2569_v3 = vpop.f32.mrb[8].mxu1 }
 0x59b   : > { %v2570_v20 = vadd.f32 %v2569_v3, %v2487_v12  ;;  %v10817_v60 = vpop.f32.mrb[9].mxu1  ;;  %v2817_v12 = vsub.f32 %v14109_v30, %v2816_v32  ;;  %v3293_v30 = vand.u32 4294901760, %v9511_v24 }
 0x59c   : > { %v2832_v60 = vand.u32 4294901760, %v2831_v11 }
 0x59d   : > { %v2645_v36 = vadd.f32 %v2644_v47, %v2570_v20  ;;  %v2818_v51 = vand.u32 4294901760, %v2817_v12  ;;  %v2825_v20 = vand.u32 4294901760, %v2824_v5  ;;  %v12465_v12 = vpack.c.bf16 %v14164_v10, %v14162_v9 }
 0x59f   : > { %v2648_v16 = vadd.f32 %v13865_v18, %v2645_v36  ;;  %v14160_v18 = vpack.c.bf16 %v2725_v23, %v2722_v17  ;;  %v12438_v3 = vpack.c.bf16 %v2818_v51, %v2811_v13  ;;  %v12441_v36 = vpack.c.bf16 %v2832_v60, %v2825_v20 }
 0x5a0   : > { %v2851_v17 = vand.u32 4294901760, %v14162_v9  ;;  %v2858_v23 = vand.u32 4294901760, %v14164_v10 }
 0x5a1   : > { %v14150_v38 = vadd.f32 %v9496_v39, %v2648_v16  ;;  %12430 = vmatpush3.bf16.msra.mxu1 %v14160_v18  ;;  %v2838_v39 = vsub.f32 %v14156_v6, %v2837_v35  ;;  %v2846_v16 = vand.u32 4294901760, %v2845_v41 }
 0x5a2   : > { %12431 = vmatprep.subr.bf16.mxu1 %v13394_v19  ;;  %v2852_v52 = vsub.f32 %v14162_v9, %v2851_v17 }
 0x5a3   : > { %v2655_v62 = vmax.f32 %v14150_v38, 0.0  ;;  %v2839_v43 = vand.u32 4294901760, %v2838_v39 }
 0x5a4   : > { %v2853_v14 = vand.u32 4294901760, %v2852_v52 }
 0x5a5   : > { %2661 = vrot.lane.b32.xlu0 %v2655_v62, %s13395_s22  ;;  %v2658_v50 = vrot.slane %v2655_v62, 1  ;;  %v12444_v31 = vpack.c.bf16 %v2846_v16, %v2839_v43  ;;  %v2656_v13 = vrot.slane %v2655_v62, 7  ;;  %v12486_v62 = vpack.c.bf16 %v2788_v29, %v2781_v26  ;;  %v9512_v26 = vld [vmem:[%s15812_s5 + $0x30] sm:$0xff]  ;;  %v9513_v29 = vld [vmem:[%s15812_s5 + $0x38] sm:$0xff] }
 0x5a6   : > { %v3296_v42 = vand.u32 4294901760, %v9512_v26  ;;  %v3299_v63 = vand.u32 4294901760, %v9513_v29 }
 0x5a7   : > { %v2659_v47 = vsel %vm13682_vm3, 0.0, %v2658_v50  ;;  %v2859_v50 = vsub.f32 %v14164_v10, %v2858_v23  ;;  %v2657_v5 = vsel %vm13698_vm4, 0.0, %v2656_v13 }
 0x5a8   : > { %2665 = vrot.lane.b32.xlu1 %v2659_v47, %s13396_s25  ;;  %v12453_v47 = vpack.c.bf16 %v14102_v49, %v14100_v61  ;;  %v12498_v61 = vpack.c.bf16 %v2844_v34, %v2837_v35  ;;  %v12501_v49 = vpack.c.bf16 %v2858_v23, %v2851_v17  ;;  %v3384_v9 = vsub.f32 %v9512_v26, %v3296_v42 }
 0x5a9   : > { %v2860_v15 = vand.u32 4294901760, %v2859_v50  ;;  %v3391_v10 = vsub.f32 %v9513_v29, %v3299_v63 }
 0x5ab   : > { %v12447_v21 = vpack.c.bf16 %v2860_v15, %v2853_v14  ;;  %v3392_v56 = vand.u32 4294901760, %v3391_v10 }
 0x5ad   : > { %v3393_v35 = vsub.f32 %v3391_v10, %v3392_v56 }
 0x617   : > { %v2662_v51 = vpop.permute.xlu0 %2661 }
 0x618   : > { %v2668_v11 = vsel %vm916_vm5, %v2657_v5, %v2662_v51 }
 0x61a   : > { %v2666_v20 = vpop.permute.xlu1 %2665 }
 0x61b   : > { %v2669_v60 = vsel %vm918_vm6, %v2668_v11, %v2666_v20  ;;  %v14368_v20 = vld [vmem:[%s15814_s7] sm:$0xff] }
 0x61c   : > { %v2689_v39 = vsel %vm937_vm7, %v2669_v60, 0  ;;  %v14373_v60 = vld [vmem:[%s15814_s7 + $0x8] sm:$0xff] }
 0x61d   : > { %v14236_v41 = vand.u32 4294901760, %v2689_v39 }
 0x61f   : > { %v2769_v43 = vsub.f32 %v2689_v39, %v14236_v41  ;;  %v3793_v39 = vsel %vm916_vm5, %v14368_v20, 0 }
 0x621   : > { %v2770_v16 = vand.u32 4294901760, %v2769_v43 }
 0x623   : > { %v2771_v52 = vsub.f32 %v2769_v43, %v2770_v16 }
 0x625   : > { %v2772_v50 = vand.u32 4294901760, %v2771_v52 }
 0x627   : > { %10854 = vmatmul.mubr.f32.vlgmr.msra.gmra.mrb[10].mxu1 %v2772_v50 }
 0x628   : > { %12433 = vmatpush3.bf16.msra.mxu1 %v12432_v48  ;;  %10880 = vmatprep.mubr.msk.f32.mxu1 %vm13393_vm1, %v13392_v2  ;;  %v12489_v48 = vpack.c.bf16 %v2802_v46, %v2795_v40 }
 0x629   : > { %12434 = vmatprep.subr.bf16.mxu1 %v13394_v19 }
 0x62c   : > { %12436 = vmatpush3.bf16.msra.mxu1 %v12435_v33  ;;  %v3385_v33 = vand.u32 4294901760, %v3384_v9 }
 0x62d   : > { %12437 = vmatprep.subr.bf16.mxu1 %v13394_v19 }
 0x62e   : > { %v12549_v15 = vpack.c.bf16 %v3392_v56, %v3385_v33 }
 0x630   : > { %12439 = vmatpush3.bf16.msra.mxu1 %v12438_v3  ;;  %v3386_v3 = vsub.f32 %v3384_v9, %v3385_v33 }
 0x631   : > { %12440 = vmatprep.subr.bf16.mxu1 %v13394_v19 }
 0x632   : > { %v3387_v34 = vand.u32 4294901760, %v3386_v3 }
 0x634   : > { %12442 = vmatpush3.bf16.msra.mxu1 %v12441_v36  ;;  %v3394_v36 = vand.u32 4294901760, %v3393_v35 }
 0x635   : > { %12443 = vmatprep.subr.bf16.mxu1 %v13394_v19 }
 0x636   : > { %v12531_v17 = vpack.c.bf16 %v3394_v36, %v3387_v34 }
 0x638   : > { %12445 = vmatpush3.bf16.msra.mxu1 %v12444_v31  ;;  %v12537_v31 = vpack.c.bf16 %v3391_v10, %v3384_v9 }
 0x639   : > { %12446 = vmatprep.subr.bf16.mxu1 %v13394_v19 }
 0x63c   : > { %12448 = vmatpush3.bf16.msra.mxu1 %v12447_v21  ;;  %v9509_v21 = vld [vmem:[%s15811_s4 + $0x2] ss:$0 sm:$0xff] }
 0x63d   : > { %12449 = vmatprep.subr.bf16.mxu1 %v13394_v19 }
 0x63f   : > { %10881 = vmatmul.mubr.f32.vlgmr.msra.gmra.mrb[10].mxu1 %v14236_v41 }
 0x640   : > { %12451 = vmatpush3.bf16.msra.mxu1 %v12450_v22  ;;  %10907 = vmatprep.mubr.msk.f32.mxu1 %vm13393_vm1, %v13392_v2 }
 0x641   : > { %12452 = vmatprep.subr.bf16.mxu1 %v13394_v19 }
 0x644   : > { %12454 = vmatpush3.bf16.msra.mxu1 %v12453_v47 }
 0x645   : > { %12455 = vmatprep.subr.bf16.mxu1 %v13394_v19 }
 0x648   : > { %12457 = vmatpush3.bf16.msra.mxu1 %v12456_v53 }
 0x649   : > { %12458 = vmatprep.subr.bf16.mxu1 %v13394_v19 }
 0x64c   : > { %12460 = vmatpush3.bf16.msra.mxu1 %v12459_v55 }
 0x64d   : > { %12461 = vmatprep.subr.bf16.mxu1 %v13394_v19 }
 0x650   : > { %12463 = vmatpush3.bf16.msra.mxu1 %v12462_v44 }
 0x651   : > { %12464 = vmatprep.subr.bf16.mxu1 %v13394_v19 }
 0x654   : > { %12466 = vmatpush3.bf16.msra.mxu1 %v12465_v12 }
 0x655   : > { %12467 = vmatprep.subr.bf16.mxu1 %v13394_v19 }
 0x657   : > { %10908 = vmatmul.mubr.f32.vlgmr.msra.gmra.mrb[10].mxu1 %v2769_v43  ;;  %v3817_v43 = vand.u32 4294901760, %v3793_v39 }
 0x658   : > { %12469 = vmatpush3.bf16.msra.mxu1 %v14094_v54  ;;  %10934 = vmatprep.mubr.msk.f32.mxu1 %vm13393_vm1, %v13392_v2 }
 0x659   : > { %12470 = vmatprep.subr.bf16.mxu1 %v13394_v19  ;;  %v14381_v50 = vsub.f32 %v3793_v39, %v3817_v43 }
 0x65c   : > { %12472 = vmatpush3.bf16.msra.mxu1 %v14107_v27 }
 0x65d   : > { %12473 = vmatprep.subr.bf16.mxu1 %v13394_v19 }
 0x660   : > { %12475 = vmatpush3.bf16.msra.mxu1 %v14113_v4 }
 0x661   : > { %12476 = vmatprep.subr.bf16.mxu1 %v13394_v19 }
 0x664   : > { %12478 = vmatpush3.bf16.msra.mxu1 %v14124_v1 }
 0x665   : > { %12479 = vmatprep.subr.bf16.mxu1 %v13394_v19 }
 0x668   : > { %12481 = vmatpush3.bf16.msra.mxu1 %v14134_v37 }
 0x669   : > { %12482 = vmatprep.subr.bf16.mxu1 %v13394_v19 }
 0x66c   : > { %12484 = vmatpush3.bf16.msra.mxu1 %v14160_v18 }
 0x66d   : > { %12485 = vmatprep.subr.bf16.mxu1 %v13394_v19 }
 0x66f   : > { %10935 = vmatmul.mubr.f32.vlgmr.msra.gmra.mrb[10].mxu1 %v2770_v16 }
 0x670   : > { %12487 = vmatpush3.bf16.msra.mxu1 %v12486_v62  ;;  %10961 = vmatprep.mubr.msk.f32.mxu1 %vm13393_vm1, %v13392_v2 }
 0x671   : > { %12488 = vmatprep.subr.bf16.mxu1 %v13394_v19 }
 0x674   : > { %12490 = vmatpush3.bf16.msra.mxu1 %v12489_v48  ;;  %v14390_v48 = vld [vmem:[%s15814_s7 + $0x10] sm:$0xff] }
 0x675   : > { %12491 = vmatprep.subr.bf16.mxu1 %v13394_v19 }
 0x678   : > { %12493 = vmatpush3.bf16.msra.mxu1 %v12492_v58  ;;  %v14395_v58 = vld [vmem:[%s15814_s7 + $0x18] sm:$0xff] }
 0x679   : > { %12494 = vmatprep.subr.bf16.mxu1 %v13394_v19 }
 0x67c   : > { %12496 = vmatpush3.bf16.msra.mxu1 %v12495_v45  ;;  %v3799_v45 = vsel %vm916_vm5, %v14390_v48, 0 }
 0x67d   : > { %12497 = vmatprep.subr.bf16.mxu1 %v13394_v19 }
 0x680   : > { %12499 = vmatpush3.bf16.msra.mxu1 %v12498_v61  ;;  %v3802_v61 = vsel %vm916_vm5, %v14395_v58, 0 }
 0x681   : > { %12500 = vmatprep.subr.bf16.mxu1 %v13394_v19 }
 0x684   : > { %12502 = vmatpush3.bf16.msra.mxu1 %v12501_v49  ;;  %v3823_v49 = vand.u32 4294901760, %v3799_v45 }
 0x685   : > { %12503 = vmatprep.subr.bf16.mxu1 %v13394_v19 }
 0x687   : > { %10962 = vmatmul.mubr.f32.vlgmr.msra.gmra.mrb[10].mxu1 %v14236_v41 }
 0x688   : > { %12505 = vmatpush3.bf16.msra.mxu1 %v14094_v54  ;;  %10988 = vmatprep.mubr.msk.f32.mxu1 %vm13393_vm1, %v13392_v2  ;;  %v9510_v54 = vld [vmem:[%s15812_s5 + $0x20] sm:$0xff] }
 0x689   : > { %12506 = vmatprep.subr.bf16.mxu1 %v13394_v19 }
 0x68c   : > { %12508 = vmatpush3.bf16.msra.mxu1 %v14107_v27  ;;  %v3290_v27 = vand.u32 4294901760, %v9510_v54 }
 0x68d   : > { %12509 = vmatprep.subr.bf16.mxu1 %v13394_v19 }
 0x690   : > { %12511 = vmatpush3.bf16.msra.mxu1 %v14113_v4  ;;  %v14326_v4 = vpack.c.bf16 %v3293_v30, %v3290_v27 }
 0x691   : > { %12512 = vmatprep.subr.bf16.mxu1 %v13394_v19 }
 0x692   : > { %12523 = vmatpush3.bf16.msra.mxu0 %v14326_v4 }
 0x693   : > { %12524 = vmatprep.subr.bf16.mxu0 %v13394_v19 }
 0x694   : > { %12514 = vmatpush3.bf16.msra.mxu1 %v14124_v1  ;;  %v3370_v1 = vsub.f32 %v9510_v54, %v3290_v27  ;;  %v3826_v54 = vand.u32 4294901760, %v3802_v61  ;;  %v14403_v27 = vsub.f32 %v3799_v45, %v3823_v49 }
 0x695   : > { %12515 = vmatprep.subr.bf16.mxu1 %v13394_v19 }
 0x696   : > { %v3371_v6 = vand.u32 4294901760, %v3370_v1 }
 0x698   : > { %12517 = vmatpush3.bf16.msra.mxu1 %v14134_v37  ;;  %v3377_v37 = vsub.f32 %v9511_v24, %v3293_v30  ;;  %v3372_v40 = vsub.f32 %v3370_v1, %v3371_v6  ;;  %v14401_v24 = vpack.c.bf16 %v3826_v54, %v3823_v49  ;;  %v14405_v30 = vsub.f32 %v3802_v61, %v3826_v54 }
 0x699   : > { %12518 = vmatprep.subr.bf16.mxu1 %v13394_v19 }
 0x69a   : > { %v3378_v7 = vand.u32 4294901760, %v3377_v37  ;;  %v3373_v59 = vand.u32 4294901760, %v3372_v40  ;;  %v12534_v23 = vpack.c.bf16 %v3377_v37, %v3370_v1  ;;  %v14417_v1 = vld [vmem:[%s15814_s7 + $0x28] sm:$0xff] }
 0x69b   : > { %v3808_v26 = vsel %vm916_vm5, %v14417_v1, 0 }
 0x69c   : > { %12520 = vmatpush3.bf16.msra.mxu1 %v14160_v18  ;;  %v12525_v18 = vpack.c.bf16 %v3299_v63, %v3296_v42  ;;  %v3379_v46 = vsub.f32 %v3377_v37, %v3378_v7  ;;  %v12546_v14 = vpack.c.bf16 %v3378_v7, %v3371_v6  ;;  %v3832_v42 = vand.u32 4294901760, %v3808_v26  ;;  %v14430_v6 = vld [vmem:[%s15814_s7 + $0x30] sm:$0xff]  ;;  %v14435_v7 = vld [vmem:[%s15814_s7 + $0x38] sm:$0xff] }
 0x69d   : > { %12629 = vmatprep.subr.bf16.mxu1 %v13394_v19  ;;  %v3814_v9 = vsel %vm916_vm5, %v14435_v7, 0 }
 0x69e   : > { %12526 = vmatpush3.bf16.msra.mxu0 %v12525_v18  ;;  %v3380_v32 = vand.u32 4294901760, %v3379_v46  ;;  %v3838_v40 = vand.u32 4294901760, %v3814_v9 }
 0x69f   : > { %10989 = vmatmul.mubr.f32.vlgmr.msra.gmra.mrb[10].mxu1 %v14236_v41  ;;  %12527 = vmatprep.subr.bf16.mxu0 %v13394_v19  ;;  %v3796_v41 = vsel %vm916_vm5, %v14373_v60, 0 }
 0x6a0   : > { %11187 = vmatprep.mubr.msk.f32.mxu1 %vm13393_vm1, %v13392_v2  ;;  %v12528_v28 = vpack.c.bf16 %v3380_v32, %v3373_v59  ;;  %v3820_v16 = vand.u32 4294901760, %v3796_v41  ;;  %v14445_v32 = vsub.f32 %v3808_v26, %v3832_v42  ;;  %v14450_v56 = vsub.f32 %v3814_v9, %v3838_v40 }
 0x6a2   : > { %v14379_v52 = vpack.c.bf16 %v3820_v16, %v3817_v43  ;;  %v14383_v62 = vsub.f32 %v3796_v41, %v3820_v16  ;;  %v3951_v41 = vand.u32 4294901760, %v14450_v56 }
 0x6a4   : > { %v3909_v3 = vand.u32 4294901760, %v14383_v62  ;;  %v3952_v16 = vsub.f32 %v14450_v56, %v3951_v41  ;;  %v12582_v54 = vpack.c.bf16 %v14383_v62, %v14381_v50 }
 0x6a6   : > { %v3910_v34 = vsub.f32 %v14383_v62, %v3909_v3  ;;  %v3953_v61 = vand.u32 4294901760, %v3952_v16 }
 0x772   : > { %v3276_v22 = vpop.f32.mrb[10].mxu1 }
 0x773   : > { %v13245_v47 = vadd.f32 %v9509_v21, %v3276_v22  ;;  %v10990_v53 = vpop.f32.mrb[11].mxu1 }
 0x775   : > { %v3280_v55 = vmax.f32 %v13245_v47, 0.0 }
 0x777   : > { %v3287_v44 = vsel %vm916_vm5, %v3280_v55, 0 }
 0x778   : > { %v3358_v12 = vand.u32 4294901760, %v3287_v44 }
 0x77a   : > { %v3359_v13 = vsub.f32 %v3287_v44, %v3358_v12  ;;  %v3937_v44 = vand.u32 4294901760, %v14445_v32 }
 0x77c   : > { %v3360_v51 = vand.u32 4294901760, %v3359_v13 }
 0x77e   : > { %v3361_v5 = vsub.f32 %v3359_v13, %v3360_v51 }
 0x780   : > { %v3362_v11 = vand.u32 4294901760, %v3361_v5 }
 0x782   : > { %11000 = vmatmul.mubr.f32.vlgmr.msra.gmra.mrb[10].mxu0 %v3362_v11 }
 0x783   : > { %12529 = vmatpush3.bf16.msra.mxu0 %v12528_v28  ;;  %11010 = vmatprep.mubr.msk.f32.mxu0 %vm13393_vm1, %v13392_v2  ;;  %v3902_v28 = vand.u32 4294901760, %v14381_v50 }
 0x784   : > { %12530 = vmatprep.subr.bf16.mxu0 %v13394_v19 }
 0x785   : > { %v3903_v35 = vsub.f32 %v14381_v50, %v3902_v28 }
 0x787   : > { %12532 = vmatpush3.bf16.msra.mxu0 %v12531_v17  ;;  %v3904_v36 = vand.u32 4294901760, %v3903_v35  ;;  %v3911_v17 = vand.u32 4294901760, %v3910_v34 }
 0x788   : > { %12533 = vmatprep.subr.bf16.mxu0 %v13394_v19 }
 0x78a   : > { %11011 = vmatmul.mubr.f32.vlgmr.msra.gmra.mrb[12].mxu0 %v3358_v12 }
 0x78b   : > { %12535 = vmatpush3.bf16.msra.mxu0 %v12534_v23  ;;  %11021 = vmatprep.mubr.msk.f32.mxu0 %vm13393_vm1, %v13392_v2  ;;  %v12570_v23 = vpack.c.bf16 %v3911_v17, %v3904_v36 }
 0x78c   : > { %12536 = vmatprep.subr.bf16.mxu0 %v13394_v19 }
 0x78f   : > { %12538 = vmatpush3.bf16.msra.mxu0 %v12537_v31  ;;  %v3916_v31 = vand.u32 4294901760, %v14403_v27 }
 0x790   : > { %12539 = vmatprep.subr.bf16.mxu0 %v13394_v19 }
 0x792   : > { %11022 = vmatmul.mubr.f32.vlgmr.msra.gmra.mrb[14].mxu0 %v3359_v13  ;;  %v3938_v13 = vsub.f32 %v14445_v32, %v3937_v44 }
 0x793   : > { %12541 = vmatpush3.bf16.msra.mxu0 %v14326_v4  ;;  %11032 = vmatprep.mubr.msk.f32.mxu0 %vm13393_vm1, %v13392_v2 }
 0x794   : > { %12542 = vmatprep.subr.bf16.mxu0 %v13394_v19  ;;  %v3939_v5 = vand.u32 4294901760, %v3938_v13 }
 0x797   : > { %12544 = vmatpush3.bf16.msra.mxu0 %v12525_v18 }
 0x798   : > { %12545 = vmatprep.subr.bf16.mxu0 %v13394_v19 }
 0x79a   : > { %11033 = vmatmul.mubr.f32.vlgmr.msra.gmra.mrb[16].mxu0 %v3360_v51 }
 0x79b   : > { %12547 = vmatpush3.bf16.msra.mxu0 %v12546_v14  ;;  %11043 = vmatprep.mubr.msk.f32.mxu0 %vm13393_vm1, %v13392_v2  ;;  %v3923_v14 = vand.u32 4294901760, %v14405_v30 }
 0x79c   : > { %12548 = vmatprep.subr.bf16.mxu0 %v13394_v19 }
 0x79d   : > { %v3924_v21 = vsub.f32 %v14405_v30, %v3923_v14 }
 0x79f   : > { %12550 = vmatpush3.bf16.msra.mxu0 %v12549_v15  ;;  %v3917_v15 = vsub.f32 %v14403_v27, %v3916_v31  ;;  %v3925_v47 = vand.u32 4294901760, %v3924_v21 }
 0x7a0   : > { %12551 = vmatprep.subr.bf16.mxu0 %v13394_v19 }
 0x7a1   : > { %v3918_v22 = vand.u32 4294901760, %v3917_v15 }
 0x7a2   : > { %11044 = vmatmul.mubr.f32.vlgmr.msra.gmra.mrb[18].mxu0 %v3358_v12 }
 0x7a3   : > { %12553 = vmatpush3.bf16.msra.mxu0 %v14326_v4  ;;  %11054 = vmatprep.mubr.msk.f32.mxu0 %vm13393_vm1, %v13392_v2  ;;  %v14412_v4 = vld [vmem:[%s15814_s7 + $0x20] sm:$0xff]  ;;  %v12573_v53 = vpack.c.bf16 %v3925_v47, %v3918_v22 }
 0x7a4   : > { %12554 = vmatprep.subr.bf16.mxu0 %v13394_v19  ;;  %v3805_v37 = vsel %vm916_vm5, %v14412_v4, 0 }
 0x7a5   : > { %v3829_v29 = vand.u32 4294901760, %v3805_v37 }
 0x7a7   : > { %12556 = vmatpush3.bf16.msra.mxu0 %v12525_v18  ;;  %v14423_v63 = vpack.c.bf16 %v3832_v42, %v3829_v29  ;;  %v3811_v18 = vsel %vm916_vm5, %v14430_v6, 0  ;;  %v14443_v59 = vsub.f32 %v3805_v37, %v3829_v29  ;;  %v12585_v37 = vpack.c.bf16 %v14405_v30, %v14403_v27  ;;  %v9515_v27 = vld [vmem:[%s15815_s8] ss:$0 sm:$0xff] }
 0x7a8   : > { %12557 = vmatprep.subr.bf16.mxu0 %v13394_v19  ;;  %v3835_v10 = vand.u32 4294901760, %v3811_v18 }
 0x7a9   : > { %v3930_v55 = vand.u32 4294901760, %v14443_v59  ;;  %v12588_v26 = vpack.c.bf16 %v14445_v32, %v14443_v59  ;;  %v14562_v32 = vand.u32 127, %v420_v57 }
 0x7aa   : > { %11055 = vmatmul.mubr.f32.vlgmr.msra.gmra.mrb[20].mxu0 %v3358_v12  ;;  %v14441_v46 = vpack.c.bf16 %v3838_v40, %v3835_v10  ;;  %v14448_v33 = vsub.f32 %v3811_v18, %v3835_v10 }
 0x7ab   : > { %11073 = vmatprep.mubr.msk.f32.mxu0 %vm13393_vm1, %v13392_v2  ;;  %v3931_v12 = vsub.f32 %v14443_v59, %v3930_v55  ;;  %v12612_v50 = vpack.c.bf16 %v3937_v44, %v3930_v55 }
 0x7ac   : > { %v3944_v39 = vand.u32 4294901760, %v14448_v33  ;;  %v12591_v29 = vpack.c.bf16 %v14450_v56, %v14448_v33 }
 0x7ad   : > { %v3932_v51 = vand.u32 4294901760, %v3931_v12 }
 0x7ae   : > { %v3945_v43 = vsub.f32 %v14448_v33, %v3944_v39  ;;  %v12615_v62 = vpack.c.bf16 %v3951_v41, %v3944_v39  ;;  %v4397_v39 = vand.u32 4294901760, %v14390_v48  ;;  %v4400_v41 = vand.u32 4294901760, %v14395_v58 }
 0x7af   : > { %v12576_v11 = vpack.c.bf16 %v3939_v5, %v3932_v51 }
 0x7b0   : > { %12559 = vmatpush3.bf16.xpose.msra.mxu0 %v14379_v52  ;;  %v3946_v45 = vand.u32 4294901760, %v3945_v43  ;;  %v9514_v43 = vld [vmem:[%s15813_s6 + $0x1] ss:$0 sm:$0xff] }
 0x7b1   : > { %12560 = vmatprep.subr.bf16.mxu0 %v13394_v19 }
 0x7b2   : > { %v12579_v49 = vpack.c.bf16 %v3953_v61, %v3946_v45 }
 0x7b8   : > { %12562 = vmatpush3.bf16.xpose.msra.mxu0 %v14401_v24 }
 0x7b9   : > { %12563 = vmatprep.subr.bf16.mxu0 %v13394_v19 }
 0x7c0   : > { %12565 = vmatpush3.bf16.xpose.msra.mxu0 %v14423_v63 }
 0x7c1   : > { %12566 = vmatprep.subr.bf16.mxu0 %v13394_v19 }
 0x7c8   : > { %12568 = vmatpush3.bf16.xpose.msra.mxu0 %v14441_v46 }
 0x7c9   : > { %12569 = vmatprep.subr.bf16.mxu0 %v13394_v19 }
 0x855   : > { %v3364_v42 = vpop.f32.mrb[10].mxu0 }
 0x856   : > { %v11001_v18 = vpop.f32.mrb[11].mxu0 }
 0x85d   : > { %v3455_v9 = vpop.f32.mrb[12].mxu0 }
 0x85e   : > { %v3456_v10 = vadd.f32 %v3455_v9, %v3364_v42  ;;  %v11012_v40 = vpop.f32.mrb[13].mxu0 }
 0x865   : > { %v3535_v35 = vpop.f32.mrb[14].mxu0 }
 0x866   : > { %v3536_v34 = vadd.f32 %v3535_v35, %v3456_v10  ;;  %v11023_v36 = vpop.f32.mrb[15].mxu0 }
 0x867   : > { %v14595_v36 = vsub.f32 %v14395_v58, %v4400_v41 }
 0x86d   : > { %v3612_v17 = vpop.f32.mrb[16].mxu0 }
 0x86e   : > { %v3613_v15 = vadd.f32 %v3612_v17, %v3536_v34  ;;  %v11034_v21 = vpop.f32.mrb[17].mxu0  ;;  %v14592_v34 = vsub.f32 %v14390_v48, %v4397_v39  ;;  %v4412_v17 = vand.u32 4294901760, %v14435_v7 }
 0x875   : > { %v3695_v22 = vpop.f32.mrb[18].mxu0 }
 0x876   : > { %v3696_v47 = vadd.f32 %v3695_v22, %v3613_v15  ;;  %v11045_v12 = vpop.f32.mrb[19].mxu0 }
 0x87d   : > { %v3770_v13 = vpop.f32.mrb[20].mxu0 }
 0x87e   : > { %v3771_v51 = vadd.f32 %v3770_v13, %v3696_v47  ;;  %v11056_v5 = vpop.f32.mrb[21].mxu0  ;;  %v4490_v13 = vand.u32 4294901760, %v14592_v34 }
 0x880   : > { %v3774_v16 = vadd.f32 %v3771_v51, %v14150_v38  ;;  %v12606_v38 = vpack.c.bf16 %v3909_v3, %v3902_v28  ;;  %v4497_v51 = vand.u32 4294901760, %v14595_v36 }
 0x882   : > { %v14497_v45 = vadd.f32 %v9514_v43, %v3774_v16  ;;  %v4491_v43 = vsub.f32 %v14592_v34, %v4490_v13 }
 0x884   : > { %v3790_v61 = vsel %vm916_vm5, %v14497_v45, 0 }
 0x885   : > { %v3889_v42 = vand.u32 4294901760, %v3790_v61 }
 0x887   : > { %v3890_v18 = vsub.f32 %v3790_v61, %v3889_v42  ;;  %v4524_v61 = vsub.f32 %v14435_v7, %v4412_v17 }
 0x889   : > { %v3891_v9 = vand.u32 4294901760, %v3890_v18 }
 0x88b   : > { %v3892_v10 = vsub.f32 %v3890_v18, %v3891_v9 }
 0x88d   : > { %v3893_v40 = vand.u32 4294901760, %v3892_v10 }
 0x88f   : > { %11074 = vmatmul.mubr.f32.vlgmr.msra.gmra.mrb[22].mxu0 %v3893_v40 }
 0x890   : > { %12571 = vmatpush3.bf16.xpose.msra.mxu0 %v12570_v23  ;;  %11092 = vmatprep.mubr.msk.f32.mxu0 %vm13393_vm1, %v13392_v2  ;;  %v12609_v23 = vpack.c.bf16 %v3923_v14, %v3916_v31  ;;  %v4391_v31 = vand.u32 4294901760, %v14368_v20  ;;  %v4394_v14 = vand.u32 4294901760, %v14373_v60 }
 0x891   : > { %12572 = vmatprep.subr.bf16.mxu0 %v13394_v19 }
 0x898   : > { %12574 = vmatpush3.bf16.xpose.msra.mxu0 %v12573_v53  ;;  %v14568_v53 = vpack.c.bf16 %v4394_v14, %v4391_v31 }
 0x899   : > { %12575 = vmatprep.subr.bf16.mxu0 %v13394_v19 }
 0x89a   : > { %12631 = vmatpush3.bf16.msra.mxu1 %v14568_v53 }
 0x89b   : > { %12632 = vmatprep.subr.bf16.mxu1 %v13394_v19 }
 0x8a0   : > { %12577 = vmatpush3.bf16.xpose.msra.mxu0 %v12576_v11 }
 0x8a1   : > { %12578 = vmatprep.subr.bf16.mxu0 %v13394_v19 }
 0x8a8   : > { %12580 = vmatpush3.bf16.xpose.msra.mxu0 %v12579_v49  ;;  %v14577_v49 = vpack.c.bf16 %v4400_v41, %v4397_v39 }
 0x8a9   : > { %12581 = vmatprep.subr.bf16.mxu0 %v13394_v19 }
 0x8aa   : > { %12634 = vmatpush3.bf16.msra.mxu1 %v14577_v49 }
 0x8ab   : > { %12635 = vmatprep.subr.bf16.mxu1 %v13394_v19 }
 0x8af   : > { %11093 = vmatmul.mubr.f32.vlgmr.msra.gmra.mrb[22].mxu0 %v3889_v42 }
 0x8b0   : > { %12583 = vmatpush3.bf16.xpose.msra.mxu0 %v12582_v54  ;;  %11111 = vmatprep.mubr.msk.f32.mxu0 %vm13393_vm1, %v13392_v2  ;;  %v4403_v54 = vand.u32 4294901760, %v14412_v4 }
 0x8b1   : > { %12584 = vmatprep.subr.bf16.mxu0 %v13394_v19 }
 0x8b2   : > { %v14607_v22 = vsub.f32 %v14412_v4, %v4403_v54  ;;  %v4498_v4 = vsub.f32 %v14595_v36, %v4497_v51 }
 0x8b8   : > { %12586 = vmatpush3.bf16.xpose.msra.mxu0 %v12585_v37  ;;  %v4406_v37 = vand.u32 4294901760, %v14417_v1 }
 0x8b9   : > { %12587 = vmatprep.subr.bf16.mxu0 %v13394_v19 }
 0x8ba   : > { %v14589_v35 = vpack.c.bf16 %v4406_v37, %v4403_v54  ;;  %v14611_v47 = vsub.f32 %v14417_v1, %v4406_v37 }
 0x8bc   : > { %12637 = vmatpush3.bf16.msra.mxu1 %v14589_v35  ;;  %v4511_v10 = vand.u32 4294901760, %v14611_v47 }
 0x8bd   : > { %12638 = vmatprep.subr.bf16.mxu1 %v13394_v19 }
 0x8c0   : > { %12589 = vmatpush3.bf16.xpose.msra.mxu0 %v12588_v26  ;;  %v14583_v26 = vsub.f32 %v14368_v20, %v4391_v31  ;;  %v4409_v20 = vand.u32 4294901760, %v14430_v6  ;;  %v12681_v31 = vpack.c.bf16 %v4497_v51, %v4490_v13 }
 0x8c1   : > { %12590 = vmatprep.subr.bf16.mxu0 %v13394_v19 }
 0x8c2   : > { %v14603_v21 = vpack.c.bf16 %v4412_v17, %v4409_v20  ;;  %v4517_v16 = vsub.f32 %v14430_v6, %v4409_v20 }
 0x8c4   : > { %12640 = vmatpush3.bf16.msra.mxu1 %v14603_v21 }
 0x8c5   : > { %12641 = vmatprep.subr.bf16.mxu1 %v13394_v19 }
 0x8c8   : > { %12592 = vmatpush3.bf16.xpose.msra.mxu0 %v12591_v29  ;;  %v14586_v29 = vsub.f32 %v14373_v60, %v4394_v14  ;;  %v4476_v60 = vand.u32 4294901760, %v14583_v26 }
 0x8c9   : > { %12593 = vmatprep.subr.bf16.mxu0 %v13394_v19 }
 0x8ca   : > { %v4483_v15 = vand.u32 4294901760, %v14586_v29  ;;  %v4477_v48 = vsub.f32 %v14583_v26, %v4476_v60 }
 0x8cc   : > { %v4484_v58 = vsub.f32 %v14586_v29, %v4483_v15  ;;  %v4478_v12 = vand.u32 4294901760, %v4477_v48  ;;  %v9527_v48 = vld [vmem:[%s15812_s5 + $0x58] sm:$0xff] }
 0x8ce   : > { %v4485_v5 = vand.u32 4294901760, %v4484_v58  ;;  %v5414_v58 = vand.u32 4294901760, %v9527_v48 }
 0x8cf   : > { %11112 = vmatmul.mubr.f32.vlgmr.msra.gmra.mrb[22].mxu0 %v3890_v18  ;;  %v4499_v18 = vand.u32 4294901760, %v4498_v4 }
 0x8d0   : > { %12595 = vmatpush3.bf16.xpose.msra.mxu0 %v14379_v52  ;;  %11130 = vmatprep.mubr.msk.f32.mxu0 %vm13393_vm1, %v13392_v2  ;;  %v12642_v1 = vpack.c.bf16 %v4485_v5, %v4478_v12  ;;  %v5506_v5 = vsub.f32 %v9527_v48, %v5414_v58 }
 0x8d1   : > { %12596 = vmatprep.subr.bf16.mxu0 %v13394_v19 }
 0x8d8   : > { %12598 = vmatpush3.bf16.xpose.msra.mxu0 %v14401_v24 }
 0x8d9   : > { %12599 = vmatprep.subr.bf16.mxu0 %v13394_v19 }
 0x8e0   : > { %12601 = vmatpush3.bf16.xpose.msra.mxu0 %v14423_v63 }
 0x8e1   : > { %12602 = vmatprep.subr.bf16.mxu0 %v13394_v19 }
 0x8e8   : > { %12604 = vmatpush3.bf16.xpose.msra.mxu0 %v14441_v46 }
 0x8e9   : > { %12605 = vmatprep.subr.bf16.mxu0 %v13394_v19 }
 0x8ef   : > { %11131 = vmatmul.mubr.f32.vlgmr.msra.gmra.mrb[22].mxu0 %v3891_v9  ;;  %v4504_v9 = vand.u32 4294901760, %v14607_v22 }
 0x8f0   : > { %12607 = vmatpush3.bf16.xpose.msra.mxu0 %v12606_v38  ;;  %11149 = vmatprep.mubr.msk.f32.mxu0 %vm13393_vm1, %v13392_v2 }
 0x8f1   : > { %12608 = vmatprep.subr.bf16.mxu0 %v13394_v19  ;;  %v4505_v38 = vsub.f32 %v14607_v22, %v4504_v9  ;;  %v12684_v14 = vpack.c.bf16 %v4511_v10, %v4504_v9 }
 0x8f8   : > { %12610 = vmatpush3.bf16.xpose.msra.mxu0 %v12609_v23  ;;  %v4512_v23 = vsub.f32 %v14611_v47, %v4511_v10 }
 0x8f9   : > { %12611 = vmatprep.subr.bf16.mxu0 %v13394_v19 }
 0x900   : > { %12613 = vmatpush3.bf16.xpose.msra.mxu0 %v12612_v50  ;;  %v4506_v50 = vand.u32 4294901760, %v4505_v38 }
 0x901   : > { %12614 = vmatprep.subr.bf16.mxu0 %v13394_v19 }
 0x908   : > { %12616 = vmatpush3.bf16.xpose.msra.mxu0 %v12615_v62  ;;  %v4513_v62 = vand.u32 4294901760, %v4512_v23 }
 0x909   : > { %12617 = vmatprep.subr.bf16.mxu0 %v13394_v19 }
 0x90f   : > { %11150 = vmatmul.mubr.f32.vlgmr.msra.gmra.mrb[22].mxu0 %v3889_v42 }
 0x910   : > { %12619 = vmatpush3.bf16.xpose.msra.mxu0 %v14379_v52  ;;  %11168 = vmatprep.mubr.msk.f32.mxu0 %vm13393_vm1, %v13392_v2 }
 0x911   : > { %12620 = vmatprep.subr.bf16.mxu0 %v13394_v19 }
 0x918   : > { %12622 = vmatpush3.bf16.xpose.msra.mxu0 %v14401_v24 }
 0x919   : > { %12623 = vmatprep.subr.bf16.mxu0 %v13394_v19 }
 0x920   : > { %12625 = vmatpush3.bf16.xpose.msra.mxu0 %v14423_v63 }
 0x921   : > { %12626 = vmatprep.subr.bf16.mxu0 %v13394_v19 }
 0x928   : > { %12628 = vmatpush3.bf16.xpose.msra.mxu0 %v14441_v46 }
 0x929   : > { %12701 = vmatprep.subr.bf16.mxu0 %v13394_v19 }
 0x92f   : > { %11169 = vmatmul.mubr.f32.vlgmr.msra.gmra.mrb[22].mxu0 %v3889_v42  ;;  %v4492_v42 = vand.u32 4294901760, %v4491_v43 }
 0x930   : > { %11323 = vmatprep.mubr.msk.f32.mxu0 %vm13393_vm1, %v13392_v2 }
 0x931   : > { %v12645_v40 = vpack.c.bf16 %v4499_v18, %v4492_v42 }
 0xa02   : > { %v4349_v52 = vpop.f32.mrb[22].mxu0 }
 0xa03   : > { %v4354_v24 = vmul.f32 2.0, %v4349_v52  ;;  %v11170_v30 = vpop.f32.mrb[23].mxu0  ;;  %v4518_v52 = vand.u32 4294901760, %v4517_v16 }
 0xa05   : > { %v4361_v59 = vsub.f32 %v9515_v27, %v4354_v24  ;;  %v4525_v27 = vand.u32 4294901760, %v4524_v61  ;;  %v12648_v24 = vpack.c.bf16 %v4513_v62, %v4506_v50  ;;  %v4519_v6 = vsub.f32 %v4517_v16, %v4518_v52 }
 0xa07   : > { %v4364_v63 = vsel %vm918_vm6, %v4361_v59, inf  ;;  %v4526_v30 = vsub.f32 %v4524_v61, %v4525_v27  ;;  %v4520_v7 = vand.u32 4294901760, %v4519_v6 }
 0xa08   : > { %4365 = vmin.xlane.f32.xlu0 %v4364_v63 }
 0xa95   : > { %v4366_v46 = vpop.xlane.xlu0 %4365 }
 0xa96   : > { %vm4367_vm8 = vcmp.le.f32.partialorder %v4361_v59, %v4366_v46  ;;  %v4527_v59 = vand.u32 4294901760, %v4526_v30  ;;  %v12654_v46 = vpack.c.bf16 %v14586_v29, %v14583_v26 }
 0xa97   : > { %v4368_v33 = vsel %vm4367_vm8, %v14562_v32, 64 }
 0xa98   : > { %v4369_v56 = vsel %vm918_vm6, %v4368_v33, 2147483647  ;;  %v12651_v63 = vpack.c.bf16 %v4527_v59, %v4520_v7  ;;  %v12657_v33 = vpack.c.bf16 %v14595_v36, %v14592_v34 }
 0xa99   : > { %v4371_v28 = vshra.s32 %v4369_v56, 16  ;;  %v4370_v57 = vand.u32 65535, %v4369_v56  ;;  %v12660_v56 = vpack.c.bf16 %v14611_v47, %v14607_v22 }
 0xa9b   : > { %v4373_v3 = vcvt.s32.f32 %v4371_v28  ;;  %v4372_v44 = vcvt.s32.f32 %v4370_v57  ;;  %v12663_v28 = vpack.c.bf16 %v4524_v61, %v4517_v16  ;;  %v12687_v57 = vpack.c.bf16 %v4525_v27, %v4518_v52 }
 0xa9d   : > { %4374 = vmin.xlane.f32.xlu1 %v4373_v3 }
 0xb2a   : > { %v14572_v55 = vpop.xlane.xlu1 %4374 }
 0xb2b   : > { %vm4376_vm9 = vcmp.eq.f32.partialorder %v4373_v3, %v14572_v55  ;;  %v12678_v3 = vpack.c.bf16 %v4483_v15, %v4476_v60 }
 0xb2c   : > { %v4377_v11 = vsel %vm4376_vm9, %v4372_v44, inf  ;;  %v4381_v44 = vcvt.f32.s32 %v14572_v55  ;;  %v9525_v55 = vld [vmem:[%s15812_s5 + $0x48] sm:$0xff] }
 0xb2d   : > { %4378 = vmin.xlane.f32.xlu0 %v4377_v11 }
 0xb2e   : > { %v4382_v39 = vshll.u32 %v4381_v44, 16 }
 0xbba   : > { %v4379_v11 = vpop.xlane.xlu0 %4378 }
 0xbbb   : > { %v4380_v41 = vcvt.f32.s32 %v4379_v11 }
 0xbbd   : > { %v4383_v54 = vadd.s32 %v4382_v39, %v4380_v41  ;;  %v9529_v39 = vld [vmem:[%s15810_s3 + $0x120] sm:$0xff] }
 0xbbe   : > { %v5925_v41 = vand.u32 4294901760, %v9529_v39 }
 0xbbf   : > { %vm4384_vm10 = vcmp.eq.s32.totalorder %v14562_v32, %v4383_v54 }
 0xbc0   : > { %v9516_v37 = vsel %vm4384_vm10, 1.0, %v13392_v2 }
 0xbc1   : > { %v4388_v26 = vsel %vm918_vm6, %v9516_v37, 0 }
 0xbc2   : > { %v4464_v29 = vsub.f32 %v4388_v26, %v4388_v26 }
 0xbc4   : > { %v4465_v34 = vand.u32 4294901760, %v4464_v29 }
 0xbc6   : > { %v4466_v36 = vsub.f32 %v4464_v29, %v4465_v34 }
 0xbc8   : > { %v4467_v20 = vand.u32 4294901760, %v4466_v36 }
 0xbca   : > { %11188 = vmatmul.mubr.f32.vlgmr.msra.gmra.mrb[12].mxu1 %v4467_v20 }
 0xbcb   : > { %12643 = vmatpush3.bf16.msra.mxu1 %v12642_v1  ;;  %11206 = vmatprep.mubr.msk.f32.mxu1 %vm13393_vm1, %v13392_v2  ;;  %v5507_v1 = vand.u32 4294901760, %v5506_v5 }
 0xbcc   : > { %12644 = vmatprep.subr.bf16.mxu1 %v13394_v19 }
 0xbcd   : > { %v5508_v9 = vsub.f32 %v5506_v5, %v5507_v1 }
 0xbcf   : > { %12646 = vmatpush3.bf16.msra.mxu1 %v12645_v40  ;;  %v5509_v38 = vand.u32 4294901760, %v5508_v9  ;;  %v9537_v9 = vld [vmem:[%s15810_s3 + $0x160] sm:$0xff] }
 0xbd0   : > { %12647 = vmatprep.subr.bf16.mxu1 %v13394_v19 }
 0xbd3   : > { %12649 = vmatpush3.bf16.msra.mxu1 %v12648_v24 }
 0xbd4   : > { %12650 = vmatprep.subr.bf16.mxu1 %v13394_v19 }
 0xbd7   : > { %12652 = vmatpush3.bf16.msra.mxu1 %v12651_v63 }
 0xbd8   : > { %12653 = vmatprep.subr.bf16.mxu1 %v13394_v19 }
 0xbda   : > { %11207 = vmatmul.mubr.msk.f32.vlgmr.msra.gmra.mrb[12].mxu1 %vm918_vm6, %v9516_v37 }
 0xbdb   : > { %12655 = vmatpush3.bf16.msra.mxu1 %v12654_v46  ;;  %11225 = vmatprep.mubr.msk.f32.mxu1 %vm13393_vm1, %v13392_v2 }
 0xbdc   : > { %12656 = vmatprep.subr.bf16.mxu1 %v13394_v19 }
 0xbdf   : > { %12658 = vmatpush3.bf16.msra.mxu1 %v12657_v33 }
 0xbe0   : > { %12659 = vmatprep.subr.bf16.mxu1 %v13394_v19 }
 0xbe3   : > { %12661 = vmatpush3.bf16.msra.mxu1 %v12660_v56 }
 0xbe4   : > { %12662 = vmatprep.subr.bf16.mxu1 %v13394_v19 }
 0xbe7   : > { %12664 = vmatpush3.bf16.msra.mxu1 %v12663_v28 }
 0xbe8   : > { %12665 = vmatprep.subr.bf16.mxu1 %v13394_v19 }
 0xbea   : > { %11226 = vmatmul.mubr.f32.vlgmr.msra.gmra.mrb[12].mxu1 %v4464_v29  ;;  %v9533_v29 = vld [vmem:[%s15810_s3 + $0x140] sm:$0xff] }
 0xbeb   : > { %12667 = vmatpush3.bf16.msra.mxu1 %v14568_v53  ;;  %11244 = vmatprep.mubr.msk.f32.mxu1 %vm13393_vm1, %v13392_v2 }
 0xbec   : > { %12668 = vmatprep.subr.bf16.mxu1 %v13394_v19 }
 0xbef   : > { %12670 = vmatpush3.bf16.msra.mxu1 %v14577_v49 }
 0xbf0   : > { %12671 = vmatprep.subr.bf16.mxu1 %v13394_v19 }
 0xbf3   : > { %12673 = vmatpush3.bf16.msra.mxu1 %v14589_v35 }
 0xbf4   : > { %12674 = vmatprep.subr.bf16.mxu1 %v13394_v19 }
 0xbf7   : > { %12676 = vmatpush3.bf16.msra.mxu1 %v14603_v21 }
 0xbf8   : > { %12677 = vmatprep.subr.bf16.mxu1 %v13394_v19 }
 0xbfa   : > { %11245 = vmatmul.mubr.f32.vlgmr.msra.gmra.mrb[12].mxu1 %v4465_v34  ;;  %v9534_v34 = vld [vmem:[%s15810_s3 + $0x148] sm:$0xff] }
 0xbfb   : > { %12679 = vmatpush3.bf16.msra.mxu1 %v12678_v3  ;;  %11263 = vmatprep.mubr.msk.f32.mxu1 %vm13393_vm1, %v13392_v2 }
 0xbfc   : > { %12680 = vmatprep.subr.bf16.mxu1 %v13394_v19 }
 0xbff   : > { %12682 = vmatpush3.bf16.msra.mxu1 %v12681_v31 }
 0xc00   : > { %12683 = vmatprep.subr.bf16.mxu1 %v13394_v19 }
 0xc03   : > { %12685 = vmatpush3.bf16.msra.mxu1 %v12684_v14 }
 0xc04   : > { %12686 = vmatprep.subr.bf16.mxu1 %v13394_v19 }
 0xc07   : > { %12688 = vmatpush3.bf16.msra.mxu1 %v12687_v57 }
 0xc08   : > { %12689 = vmatprep.subr.bf16.mxu1 %v13394_v19 }
 0xc0a   : > { %11264 = vmatmul.mubr.msk.f32.vlgmr.msra.gmra.mrb[12].mxu1 %vm918_vm6, %v9516_v37 }
 0xc0b   : > { %12691 = vmatpush3.bf16.msra.mxu1 %v14568_v53  ;;  %11282 = vmatprep.mubr.msk.f32.mxu1 %vm13393_vm1, %v13392_v2  ;;  %v9524_v53 = vld [vmem:[%s15812_s5 + $0x40] sm:$0xff] }
 0xc0c   : > { %12692 = vmatprep.subr.bf16.mxu1 %v13394_v19 }
 0xc0f   : > { %12694 = vmatpush3.bf16.msra.mxu1 %v14577_v49  ;;  %v5405_v49 = vand.u32 4294901760, %v9524_v53 }
 0xc10   : > { %12695 = vmatprep.subr.bf16.mxu1 %v13394_v19 }
 0xc11   : > { %v5485_v60 = vsub.f32 %v9524_v53, %v5405_v49  ;;  %v5937_v53 = vand.u32 4294901760, %v9533_v29 }
 0xc13   : > { %12697 = vmatpush3.bf16.msra.mxu1 %v14589_v35  ;;  %v5408_v35 = vand.u32 4294901760, %v9525_v55  ;;  %v5486_v47 = vand.u32 4294901760, %v5485_v60 }
 0xc14   : > { %12698 = vmatprep.subr.bf16.mxu1 %v13394_v19 }
 0xc15   : > { %v14684_v17 = vpack.c.bf16 %v5408_v35, %v5405_v49  ;;  %v5492_v15 = vsub.f32 %v9525_v55, %v5408_v35  ;;  %v5487_v43 = vsub.f32 %v5485_v60, %v5486_v47  ;;  %v14745_v55 = vsub.f32 %v9529_v39, %v5925_v41 }
 0xc17   : > { %12700 = vmatpush3.bf16.msra.mxu1 %v14603_v21  ;;  %v9526_v21 = vld [vmem:[%s15812_s5 + $0x50] sm:$0xff]  ;;  %12703 = vmatpush3.bf16.msra.mxu0 %v14684_v17  ;;  %v5493_v12 = vand.u32 4294901760, %v5492_v15  ;;  %v5488_v16 = vand.u32 4294901760, %v5487_v43  ;;  %v12714_v50 = vpack.c.bf16 %v5492_v15, %v5485_v60 }
 0xc18   : > { %11285 = vmatprep.subr.mxu1 %v13392_v2  ;;  %v5411_v22 = vand.u32 4294901760, %v9526_v21  ;;  %12704 = vmatprep.subr.bf16.mxu0 %v13394_v19 }
 0xc19   : > { %v5494_v4 = vsub.f32 %v5492_v15, %v5493_v12  ;;  %v12726_v52 = vpack.c.bf16 %v5493_v12, %v5486_v47  ;;  %v14753_v15 = vsub.f32 %v9533_v29, %v5937_v53 }
 0xc1a   : > { %11283 = vmatmul.mubr.msk.f32.vlgmr.msra.gmra.mrb[12].mxu1 %vm918_vm6, %v9516_v37  ;;  %v12705_v13 = vpack.c.bf16 %v5414_v58, %v5411_v22  ;;  %v5499_v51 = vsub.f32 %v9526_v21, %v5411_v22  ;;  %v9532_v37 = vld [vmem:[%s15810_s3 + $0x138] sm:$0xff] }
 0xc1b   : > { %11287 = vmatprep.mubr.msk.f32.mxu1 %vm13393_vm1, %v13392_v2  ;;  %v5495_v42 = vand.u32 4294901760, %v5494_v4  ;;  %v5934_v20 = vand.u32 4294901760, %v9532_v37 }
 0xc1c   : > { %12706 = vmatpush3.bf16.msra.mxu0 %v12705_v13  ;;  %v5500_v61 = vand.u32 4294901760, %v5499_v51  ;;  %v12717_v62 = vpack.c.bf16 %v5506_v5, %v5499_v51 }
 0xc1d   : > { %12707 = vmatprep.subr.bf16.mxu0 %v13394_v19  ;;  %v12708_v10 = vpack.c.bf16 %v5495_v42, %v5488_v16  ;;  %v14751_v60 = vsub.f32 %v9532_v37, %v5934_v20  ;;  %v9535_v16 = vld [vmem:[%s15810_s3 + $0x150] sm:$0xff] }
 0xc1e   : > { %v5501_v18 = vsub.f32 %v5499_v51, %v5500_v61  ;;  %v12729_v27 = vpack.c.bf16 %v5507_v1, %v5500_v61  ;;  %v9536_v61 = vld [vmem:[%s15810_s3 + $0x158] sm:$0xff]  ;;  %v5943_v1 = vand.u32 4294901760, %v9535_v16 }
 0xc1f   : > { %v5946_v42 = vand.u32 4294901760, %v9536_v61  ;;  %v6035_v39 = vand.u32 4294901760, %v14751_v60 }
 0xc20   : > { %v5502_v40 = vand.u32 4294901760, %v5501_v18 }
 0xc21   : > { %v14796_v18 = vpack.c.bf16 %v5946_v42, %v5943_v1 }
 0xc22   : > { %v12711_v23 = vpack.c.bf16 %v5509_v38, %v5502_v40  ;;  %v5949_v40 = vand.u32 4294901760, %v9537_v9 }
 0xced   : > { %v4923_v24 = vpop.f32.mrb[12].mxu1 }
 0xcee   : > { %v4927_v6 = vsub.f32 %v4923_v24, %v14497_v45  ;;  %v5402_v30 = vsel %vm916_vm5, %v4923_v24, 0  ;;  %v11284_v7 = vpop.f32.mrb[13].mxu1  ;;  %v4932_v45 = vmul.u32 8, %v13669_v25  ;;  %v9530_v25 = vld [vmem:[%s15810_s3 + $0x128] sm:$0xff] }
 0xcef   : > { %v5473_v59 = vand.u32 4294901760, %v5402_v30  ;;  %v5928_v54 = vand.u32 4294901760, %v9530_v25  ;;  %v14820_v7 = vsub.f32 %v9535_v16, %v5943_v1 }
 0xcf0   : > { %v4928_v63 = vmul.f32 %v4927_v6, %v4927_v6  ;;  %v4934_v31 = vadd.s32 8, %v4932_v45  ;;  %vm4933_vm11 = vcmp.ge.s32.totalorder %v14562_v32, %v4932_v45  ;;  %v6014_v6 = vand.u32 4294901760, %v14745_v55 }
 0xcf1   : > { %v5474_v46 = vsub.f32 %v5402_v30, %v5473_v59  ;;  %v14747_v49 = vsub.f32 %v9530_v25, %v5928_v54  ;;  %v14775_v5 = vpack.c.bf16 %v5928_v54, %v5925_v41  ;;  %v6036_v54 = vsub.f32 %v14751_v60, %v6035_v39 }
 0xcf2   : > { %v4929_v33 = vsel %vm916_vm5, %v4928_v63, 0.0  ;;  %vm4935_vm12 = vcmp.lt.s32.totalorder %v14562_v32, %v4934_v31  ;;  %v9531_v32 = vld [vmem:[%s15810_s3 + $0x130] sm:$0xff]  ;;  %v14824_v63 = vsub.f32 %v9537_v9, %v5949_v40  ;;  %v6015_v45 = vsub.f32 %v14745_v55, %v6014_v6 }
 0xcf3   : > { %v5475_v56 = vand.u32 4294901760, %v5474_v46  ;;  %4930 = vadd.xlane.f32.xlu0 %v4929_v33  ;;  %vm4936_vm13 = vmand %vm4933_vm11, %vm4935_vm12  ;;  %v5931_v26 = vand.u32 4294901760, %v9531_v32  ;;  %v6021_v30 = vand.u32 4294901760, %v14747_v49 }
 0xcf4   : > { %v9520_v14 = vsel %vm4936_vm13, 1.0, %v13392_v2 }
 0xcf5   : > { %v5476_v28 = vsub.f32 %v5474_v46, %v5475_v56  ;;  %v4941_v57 = vsel %vm4939_vm14, %v9520_v14, 0  ;;  %v14749_v35 = vsub.f32 %v9531_v32, %v5931_v26  ;;  %v14779_v43 = vpack.c.bf16 %v5934_v20, %v5931_v26 }
 0xcf6   : > { %v5010_v44 = vsub.f32 %v4941_v57, %v4941_v57  ;;  %v6022_v57 = vsub.f32 %v14747_v49, %v6021_v30 }
 0xcf7   : > { %v5477_v3 = vand.u32 4294901760, %v5476_v28 }
 0xcf8   : > { %v5011_v11 = vand.u32 4294901760, %v5010_v44  ;;  %v6023_v32 = vand.u32 4294901760, %v6022_v57 }
 0xcf9   : > { %11324 = vmatmul.mubr.f32.vlgmr.msra.gmra.mrb[24].mxu0 %v5477_v3 }
 0xcfa   : > { %12709 = vmatpush3.bf16.msra.mxu0 %v12708_v10  ;;  %11334 = vmatprep.mubr.msk.f32.mxu0 %vm13393_vm1, %v13392_v2  ;;  %v5012_v36 = vsub.f32 %v5010_v44, %v5011_v11  ;;  %v9538_v10 = vld [vmem:[%s15810_s3 + $0x168] sm:$0xff] }
 0xcfb   : > { %12710 = vmatprep.subr.bf16.mxu0 %v13394_v19  ;;  %v5952_v38 = vand.u32 4294901760, %v9538_v10 }
 0xcfc   : > { %v5013_v22 = vand.u32 4294901760, %v5012_v36  ;;  %v6042_v36 = vand.u32 4294901760, %v14753_v15 }
 0xcfe   : > { %12712 = vmatpush3.bf16.msra.mxu0 %v12711_v23  ;;  %v14806_v23 = vpack.c.bf16 %v5952_v38, %v5949_v40 }
 0xcff   : > { %12713 = vmatprep.subr.bf16.mxu0 %v13394_v19 }
 0xd01   : > { %11335 = vmatmul.mubr.f32.vlgmr.msra.gmra.mrb[24].mxu0 %v5473_v59 }
 0xd02   : > { %12715 = vmatpush3.bf16.msra.mxu0 %v12714_v50  ;;  %11345 = vmatprep.mubr.msk.f32.mxu0 %vm13393_vm1, %v13392_v2  ;;  %v9539_v50 = vld [vmem:[%s15810_s3 + $0x170] sm:$0xff] }
 0xd03   : > { %12716 = vmatprep.subr.bf16.mxu0 %v13394_v19 }
 0xd06   : > { %12718 = vmatpush3.bf16.msra.mxu0 %v12717_v62  ;;  %v9540_v62 = vld [vmem:[%s15810_s3 + $0x178] sm:$0xff] }
 0xd07   : > { %12719 = vmatprep.subr.bf16.mxu0 %v13394_v19  ;;  %v5958_v24 = vand.u32 4294901760, %v9540_v62 }
 0xd09   : > { %11346 = vmatmul.mubr.f32.vlgmr.msra.gmra.mrb[24].mxu0 %v5474_v46  ;;  %v14826_v46 = vsub.f32 %v9538_v10, %v5952_v38  ;;  %v14833_v3 = vsub.f32 %v9540_v62, %v5958_v24 }
 0xd0a   : > { %12721 = vmatpush3.bf16.msra.mxu0 %v14684_v17  ;;  %11356 = vmatprep.mubr.msk.f32.mxu0 %vm13393_vm1, %v13392_v2 }
 0xd0b   : > { %12722 = vmatprep.subr.bf16.mxu0 %v13394_v19  ;;  %v6077_v9 = vand.u32 4294901760, %v14826_v46 }
 0xd0d   : > { %v6078_v38 = vsub.f32 %v14826_v46, %v6077_v9 }
 0xd0e   : > { %12724 = vmatpush3.bf16.msra.mxu0 %v12705_v13 }
 0xd0f   : > { %12725 = vmatprep.subr.bf16.mxu0 %v13394_v19  ;;  %v6079_v62 = vand.u32 4294901760, %v6078_v38 }
 0xd11   : > { %11357 = vmatmul.mubr.f32.vlgmr.msra.gmra.mrb[24].mxu0 %v5475_v56 }
 0xd12   : > { %12727 = vmatpush3.bf16.msra.mxu0 %v12726_v52  ;;  %11367 = vmatprep.mubr.msk.f32.mxu0 %vm13393_vm1, %v13392_v2  ;;  %v9528_v52 = vld [vmem:[%s15813_s6 + $0x2] ss:$0 sm:$0xff] }
 0xd13   : > { %12728 = vmatprep.subr.bf16.mxu0 %v13394_v19 }
 0xd16   : > { %12730 = vmatpush3.bf16.msra.mxu0 %v12729_v27  ;;  %v5955_v27 = vand.u32 4294901760, %v9539_v50 }
 0xd17   : > { %12731 = vmatprep.subr.bf16.mxu0 %v13394_v19 }
 0xd18   : > { %v14829_v56 = vpack.c.bf16 %v5958_v24, %v5955_v27  ;;  %v14831_v28 = vsub.f32 %v9539_v50, %v5955_v27  ;;  %v6091_v27 = vand.u32 4294901760, %v14833_v3 }
 0xd19   : > { %11368 = vmatmul.mubr.f32.vlgmr.msra.gmra.mrb[24].mxu0 %v5473_v59 }
 0xd1a   : > { %12733 = vmatpush3.bf16.msra.mxu0 %v14684_v17  ;;  %11378 = vmatprep.mubr.msk.f32.mxu0 %vm13393_vm1, %v13392_v2  ;;  %v5940_v17 = vand.u32 4294901760, %v9534_v34 }
 0xd1b   : > { %12734 = vmatprep.subr.bf16.mxu0 %v13394_v19 }
 0xd1c   : > { %v14755_v21 = vsub.f32 %v9534_v34, %v5940_v17  ;;  %v14785_v4 = vpack.c.bf16 %v5940_v17, %v5937_v53  ;;  %v6037_v34 = vand.u32 4294901760, %v6036_v54  ;;  %v6043_v17 = vsub.f32 %v14753_v15, %v6042_v36 }
 0xd1e   : > { %12736 = vmatpush3.bf16.msra.mxu0 %v12705_v13  ;;  %v6049_v20 = vand.u32 4294901760, %v14755_v21 }
 0xd1f   : > { %12845 = vmatprep.subr.bf16.mxu0 %v13394_v19 }
 0xd21   : > { %11379 = vmatmul.mubr.f32.vlgmr.msra.gmra.mrb[24].mxu0 %v5473_v59  ;;  %v14822_v59 = vsub.f32 %v9536_v61, %v5946_v42  ;;  %v6070_v42 = vand.u32 4294901760, %v14824_v63 }
 0xd22   : > { %11567 = vmatprep.mubr.msk.f32.mxu0 %vm13393_vm1, %v13392_v2 }
 0xd23   : > { %v6071_v40 = vsub.f32 %v14824_v63, %v6070_v42  ;;  %v12783_v54 = vpack.c.bf16 %v14822_v59, %v14820_v7 }
 0xd25   : > { %v6072_v50 = vand.u32 4294901760, %v6071_v40 }
 0xd27   : > { %v12768_v24 = vpack.c.bf16 %v6079_v62, %v6072_v50 }
 0xd80   : > { %v4931_v48 = vpop.xlane.xlu0 %4930 }
 0xd81   : > { %v4944_v58 = vand.u32 4294901760, %v4931_v48 }
 0xd83   : > { %v5021_v47 = vsub.f32 %v4931_v48, %v4944_v58  ;;  %11286 = vmatpush3.msra.mxu1 %v4944_v58  ;;  %v6050_v48 = vsub.f32 %v14755_v21, %v6049_v20 }
 0xd84   : > { %11288 = vmatmul.mubr.f32.vlgmr.msra.gmra.mrb[14].mxu1 %v5013_v22  ;;  %11290 = vmatprep.subr.mxu1 %v13392_v2  ;;  %v6044_v22 = vand.u32 4294901760, %v6043_v17 }
 0xd85   : > { %v5022_v12 = vand.u32 4294901760, %v5021_v47  ;;  %11292 = vmatprep.mubr.msk.f32.mxu1 %vm13393_vm1, %v13392_v2 }
 0xd87   : > { %v5023_v13 = vsub.f32 %v5021_v47, %v5022_v12 }
 0xd89   : > { %v5024_v51 = vand.u32 4294901760, %v5023_v13 }
 0xd8b   : > { %11291 = vmatpush3.msra.mxu1 %v5024_v51 }
 0xd8c   : > { %11293 = vmatmul.mubr.msk.f32.vlgmr.msra.gmra.mrb[14].mxu1 %vm4939_vm14, %v9520_v14  ;;  %11295 = vmatprep.subr.mxu1 %v13392_v2 }
 0xd8d   : > { %11296 = vmatpush3.msra.mxu1 %v5021_v47  ;;  %11297 = vmatprep.mubr.msk.f32.mxu1 %vm13393_vm1, %v13392_v2  ;;  %v6056_v47 = vand.u32 4294901760, %v14820_v7 }
 0xd8e   : > { %11300 = vmatprep.subr.mxu1 %v13392_v2 }
 0xd8f   : > { %v6057_v51 = vsub.f32 %v14820_v7, %v6056_v47 }
 0xd91   : > { %v6058_v61 = vand.u32 4294901760, %v6057_v51 }
 0xd94   : > { %11298 = vmatmul.mubr.f32.vlgmr.msra.gmra.mrb[14].mxu1 %v5010_v44  ;;  %v6016_v44 = vand.u32 4294901760, %v6015_v45  ;;  %v6092_v45 = vsub.f32 %v14833_v3, %v6091_v27 }
 0xd95   : > { %11301 = vmatpush3.msra.mxu1 %v4944_v58  ;;  %11302 = vmatprep.mubr.msk.f32.mxu1 %vm13393_vm1, %v13392_v2 }
 0xd96   : > { %11305 = vmatprep.subr.mxu1 %v13392_v2  ;;  %v12756_v26 = vpack.c.bf16 %v6023_v32, %v6016_v44  ;;  %v6093_v57 = vand.u32 4294901760, %v6092_v45  ;;  %v12777_v32 = vpack.c.bf16 %v14751_v60, %v14749_v35  ;;  %v9541_v45 = vld [vmem:[%s15811_s4 + $0x3] ss:$0 sm:$0xff] }
 0xd9c   : > { %11303 = vmatmul.mubr.f32.vlgmr.msra.gmra.mrb[14].mxu1 %v5011_v11  ;;  %v6028_v11 = vand.u32 4294901760, %v14749_v35 }
 0xd9d   : > { %11306 = vmatpush3.msra.mxu1 %v5022_v12  ;;  %11307 = vmatprep.mubr.msk.f32.mxu1 %vm13393_vm1, %v13392_v2  ;;  %v6063_v12 = vand.u32 4294901760, %v14822_v59 }
 0xd9e   : > { %11310 = vmatprep.subr.mxu1 %v13392_v2  ;;  %v6029_v41 = vsub.f32 %v14749_v35, %v6028_v11  ;;  %v12822_v35 = vpack.c.bf16 %v6077_v9, %v6070_v42 }
 0xd9f   : > { %v6064_v16 = vsub.f32 %v14822_v59, %v6063_v12 }
 0xda0   : > { %v6030_v29 = vand.u32 4294901760, %v6029_v41  ;;  %v12780_v41 = vpack.c.bf16 %v14755_v21, %v14753_v15  ;;  %v9542_v15 = vld [vmem:[%s15810_s3 + $0x180] sm:$0xff]  ;;  %v9543_v21 = vld [vmem:[%s15810_s3 + $0x188] sm:$0xff] }
 0xda1   : > { %v6065_v1 = vand.u32 4294901760, %v6064_v16 }
 0xda2   : > { %v12759_v53 = vpack.c.bf16 %v6037_v34, %v6030_v29  ;;  %v12789_v29 = vpack.c.bf16 %v14833_v3, %v14831_v28  ;;  %v9547_v3 = vld [vmem:[%s15810_s3 + $0x1a8] sm:$0xff] }
 0xda3   : > { %v12765_v10 = vpack.c.bf16 %v6065_v1, %v6058_v61 }
 0xda4   : > { %11308 = vmatmul.mubr.msk.f32.vlgmr.msra.gmra.mrb[14].mxu1 %vm4939_vm14, %v9520_v14 }
 0xda5   : > { %11311 = vmatpush3.msra.mxu1 %v4944_v58  ;;  %11312 = vmatprep.mubr.msk.f32.mxu1 %vm13393_vm1, %v13392_v2  ;;  %v6051_v58 = vand.u32 4294901760, %v6050_v48 }
 0xda6   : > { %12737 = vmatprep.subr.bf16.mxu1 %v13394_v19 }
 0xda7   : > { %v12762_v13 = vpack.c.bf16 %v6051_v58, %v6044_v22 }
 0xdac   : > { %11313 = vmatmul.mubr.msk.f32.vlgmr.msra.gmra.mrb[14].mxu1 %vm4939_vm14, %v9520_v14 }
 0xdad   : > { %12739 = vmatpush3.bf16.msra.mxu1 %v14775_v5  ;;  %11405 = vmatprep.mubr.msk.f32.mxu1 %vm13393_vm1, %v13392_v2 }
 0xdae   : > { %12740 = vmatprep.subr.bf16.mxu1 %v13394_v19 }
 0xdb1   : > { %12742 = vmatpush3.bf16.msra.mxu1 %v14779_v43 }
 0xdb2   : > { %12743 = vmatprep.subr.bf16.mxu1 %v13394_v19 }
 0xdb5   : > { %12745 = vmatpush3.bf16.msra.mxu1 %v14785_v4 }
 0xdb6   : > { %12746 = vmatprep.subr.bf16.mxu1 %v13394_v19 }
 0xdb9   : > { %12748 = vmatpush3.bf16.msra.mxu1 %v14796_v18 }
 0xdba   : > { %12749 = vmatprep.subr.bf16.mxu1 %v13394_v19 }
 0xdbd   : > { %12751 = vmatpush3.bf16.msra.mxu1 %v14806_v23 }
 0xdbe   : > { %12752 = vmatprep.subr.bf16.mxu1 %v13394_v19 }
 0xdc1   : > { %12754 = vmatpush3.bf16.msra.mxu1 %v14829_v56 }
 0xdc2   : > { %12755 = vmatprep.subr.bf16.mxu1 %v13394_v19 }
 0xdf4   : > { %v5885_v33 = vpop.f32.mrb[24].mxu0 }
 0xdf5   : > { %v13246_v31 = vadd.f32 %v9528_v52, %v5885_v33  ;;  %v11380_v14 = vpop.f32.mrb[25].mxu0  ;;  %v6084_v52 = vand.u32 4294901760, %v14831_v28 }
 0xdf7   : > { %5894 = vrot.lane.b32.xlu1 %v13246_v31, %s13395_s22  ;;  %v5891_v25 = vrot.slane %v13246_v31, 1  ;;  %v6085_v33 = vsub.f32 %v14831_v28, %v6084_v52  ;;  %v5889_v34 = vrot.slane %v13246_v31, 7  ;;  %v12825_v60 = vpack.c.bf16 %v6091_v27, %v6084_v52  ;;  %v9546_v28 = vld [vmem:[%s15810_s3 + $0x1a0] sm:$0xff]  ;;  %v9551_v27 = vld [vmem:[%s15810_s3 + $0x1c8] sm:$0xff] }
 0xdf8   : > { %v9550_v52 = vld [vmem:[%s15810_s3 + $0x1c0] sm:$0xff] }
 0xdf9   : > { %v5892_v37 = vsel %vm13682_vm3, 0.0, %v5891_v25  ;;  %v6086_v14 = vand.u32 4294901760, %v6085_v33  ;;  %v12774_v25 = vpack.c.bf16 %v14747_v49, %v14745_v55  ;;  %v5890_v48 = vsel %vm13698_vm4, 0.0, %v5889_v34 }
 0xdfa   : > { %5898 = vrot.lane.b32.xlu0 %v5892_v37, %s13396_s25  ;;  %v12786_v37 = vpack.c.bf16 %v14826_v46, %v14824_v63  ;;  %v12816_v55 = vpack.c.bf16 %v6049_v20, %v6042_v36  ;;  %v12819_v49 = vpack.c.bf16 %v6063_v12, %v6056_v47  ;;  %v9548_v20 = vld [vmem:[%s15810_s3 + $0x1b0] sm:$0xff]  ;;  %v9549_v47 = vld [vmem:[%s15810_s3 + $0x1b8] sm:$0xff]  ;;  %v6577_v33 = vand.u32 4294901760, %v9551_v27 }
 0xdfb   : > { %v12771_v44 = vpack.c.bf16 %v6093_v57, %v6086_v14  ;;  %v6568_v42 = vand.u32 4294901760, %v9548_v20  ;;  %v6571_v9 = vand.u32 4294901760, %v9549_v47  ;;  %v9552_v57 = vld [vmem:[%s15810_s3 + $0x1d0] sm:$0xff] }
 0xe69   : > { %v5895_v17 = vpop.permute.xlu1 %5894 }
 0xe6a   : > { %v5901_v22 = vsel %vm916_vm5, %v5890_v48, %v5895_v17  ;;  %v15067_v17 = vsub.f32 %v9548_v20, %v6568_v42  ;;  %v15069_v48 = vsub.f32 %v9549_v47, %v6571_v9 }
 0xe6c   : > { %v5899_v58 = vpop.permute.xlu0 %5898 }
 0xe6d   : > { %v5902_v51 = vsel %vm918_vm6, %v5901_v22, %v5899_v58  ;;  %v15073_v58 = vsub.f32 %v9551_v27, %v6577_v33 }
 0xe6e   : > { %v5922_v16 = vsel %vm937_vm7, %v5902_v51, 0 }
 0xe6f   : > { %v14904_v61 = vand.u32 4294901760, %v5922_v16  ;;  %v6702_v27 = vand.u32 4294901760, %v15073_v58 }
 0xe71   : > { %v6002_v1 = vsub.f32 %v5922_v16, %v14904_v61 }
 0xe73   : > { %v6003_v40 = vand.u32 4294901760, %v6002_v1 }
 0xe75   : > { %v6004_v38 = vsub.f32 %v6002_v1, %v6003_v40 }
 0xe77   : > { %v6005_v50 = vand.u32 4294901760, %v6004_v38 }
 0xe79   : > { %11406 = vmatmul.mubr.f32.vlgmr.msra.gmra.mrb[16].mxu1 %v6005_v50 }
 0xe7a   : > { %12757 = vmatpush3.bf16.msra.mxu1 %v12756_v26  ;;  %11432 = vmatprep.mubr.msk.f32.mxu1 %vm13393_vm1, %v13392_v2  ;;  %v12810_v26 = vpack.c.bf16 %v6021_v30, %v6014_v6 }
 0xe7b   : > { %12758 = vmatprep.subr.bf16.mxu1 %v13394_v19 }
 0xe7e   : > { %12760 = vmatpush3.bf16.msra.mxu1 %v12759_v53  ;;  %v12813_v53 = vpack.c.bf16 %v6035_v39, %v6028_v11  ;;  %v6562_v11 = vand.u32 4294901760, %v9546_v28  ;;  %v6565_v39 = vand.u32 4294901760, %v9547_v3 }
 0xe7f   : > { %12761 = vmatprep.subr.bf16.mxu1 %v13394_v19  ;;  %v5385_v31 = vpop.f32.mrb[14].mxu1 }
 0xe80   : > { %5390 = vst.msk [vmem:[%s419_s28] sm:$0x1] %vm5389_vm15, %v5385_v31  ;;  %v11314_v62 = vpop.f32.mrb[15].mxu1  ;;  %v15026_v36 = vpack.c.bf16 %v6565_v39, %v6562_v11  ;;  %v15035_v12 = vsub.f32 %v9546_v28, %v6562_v11  ;;  %v6688_v11 = vand.u32 4294901760, %v15069_v48 }
 0xe82   : > { %12763 = vmatpush3.bf16.msra.mxu1 %v12762_v13  ;;  %v15037_v13 = vsub.f32 %v9547_v3, %v6565_v39  ;;  %v6681_v3 = vand.u32 4294901760, %v15067_v17  ;;  %v6689_v47 = vsub.f32 %v15069_v48, %v6688_v11 }
 0xe83   : > { %12764 = vmatprep.subr.bf16.mxu1 %v13394_v19 }
 0xe84   : > { %v6682_v20 = vsub.f32 %v15067_v17, %v6681_v3 }
 0xe86   : > { %12766 = vmatpush3.bf16.msra.mxu1 %v12765_v10  ;;  %v15040_v10 = vpack.c.bf16 %v6571_v9, %v6568_v42  ;;  %v6683_v42 = vand.u32 4294901760, %v6682_v20  ;;  %v6690_v9 = vand.u32 4294901760, %v6689_v47 }
 0xe87   : > { %12767 = vmatprep.subr.bf16.mxu1 %v13394_v19 }
 0xe8a   : > { %12769 = vmatpush3.bf16.msra.mxu1 %v12768_v24  ;;  %v6574_v24 = vand.u32 4294901760, %v9550_v52 }
 0xe8b   : > { %12770 = vmatprep.subr.bf16.mxu1 %v13394_v19 }
 0xe8c   : > { %v15053_v14 = vpack.c.bf16 %v6577_v33, %v6574_v24  ;;  %v15071_v22 = vsub.f32 %v9550_v52, %v6574_v24  ;;  %v12873_v24 = vpack.c.bf16 %v6690_v9, %v6683_v42 }
 0xe8e   : > { %12772 = vmatpush3.bf16.msra.mxu1 %v12771_v44  ;;  %v9553_v44 = vld [vmem:[%s15810_s3 + $0x1d8] sm:$0xff]  ;;  %v6695_v52 = vand.u32 4294901760, %v15071_v22 }
 0xe8f   : > { %12773 = vmatprep.subr.bf16.mxu1 %v13394_v19 }
 0xe90   : > { %v6696_v33 = vsub.f32 %v15071_v22, %v6695_v52 }
 0xe91   : > { %11433 = vmatmul.mubr.f32.vlgmr.msra.gmra.mrb[16].mxu1 %v14904_v61 }
 0xe92   : > { %12775 = vmatpush3.bf16.msra.mxu1 %v12774_v25  ;;  %11459 = vmatprep.mubr.msk.f32.mxu1 %vm13393_vm1, %v13392_v2 }
 0xe93   : > { %12776 = vmatprep.subr.bf16.mxu1 %v13394_v19 }
 0xe96   : > { %12778 = vmatpush3.bf16.msra.mxu1 %v12777_v32  ;;  %v6580_v32 = vand.u32 4294901760, %v9552_v57 }
 0xe97   : > { %12779 = vmatprep.subr.bf16.mxu1 %v13394_v19 }
 0xe9a   : > { %12781 = vmatpush3.bf16.msra.mxu1 %v12780_v41  ;;  %v6583_v41 = vand.u32 4294901760, %v9553_v44 }
 0xe9b   : > { %12782 = vmatprep.subr.bf16.mxu1 %v13394_v19 }
 0xe9c   : > { %v15076_v16 = vpack.c.bf16 %v6583_v41, %v6580_v32 }
 0xe9e   : > { %12784 = vmatpush3.bf16.msra.mxu1 %v12783_v54 }
 0xe9f   : > { %12785 = vmatprep.subr.bf16.mxu1 %v13394_v19 }
 0xea2   : > { %12787 = vmatpush3.bf16.msra.mxu1 %v12786_v37 }
 0xea3   : > { %12788 = vmatprep.subr.bf16.mxu1 %v13394_v19 }
 0xea6   : > { %12790 = vmatpush3.bf16.msra.mxu1 %v12789_v29 }
 0xea7   : > { %12791 = vmatprep.subr.bf16.mxu1 %v13394_v19 }
 0xea9   : > { %11460 = vmatmul.mubr.f32.vlgmr.msra.gmra.mrb[16].mxu1 %v6002_v1  ;;  %v15080_v1 = vsub.f32 %v9553_v44, %v6583_v41 }
 0xeaa   : > { %12793 = vmatpush3.bf16.msra.mxu1 %v14775_v5  ;;  %11486 = vmatprep.mubr.msk.f32.mxu1 %vm13393_vm1, %v13392_v2 }
 0xeab   : > { %12794 = vmatprep.subr.bf16.mxu1 %v13394_v19 }
 0xeae   : > { %12796 = vmatpush3.bf16.msra.mxu1 %v14779_v43 }
 0xeaf   : > { %12797 = vmatprep.subr.bf16.mxu1 %v13394_v19 }
 0xeb2   : > { %12799 = vmatpush3.bf16.msra.mxu1 %v14785_v4 }
 0xeb3   : > { %12800 = vmatprep.subr.bf16.mxu1 %v13394_v19 }
 0xeb6   : > { %12802 = vmatpush3.bf16.msra.mxu1 %v14796_v18 }
 0xeb7   : > { %12803 = vmatprep.subr.bf16.mxu1 %v13394_v19 }
 0xeba   : > { %12805 = vmatpush3.bf16.msra.mxu1 %v14806_v23 }
 0xebb   : > { %12806 = vmatprep.subr.bf16.mxu1 %v13394_v19 }
 0xebe   : > { %12808 = vmatpush3.bf16.msra.mxu1 %v14829_v56 }
 0xebf   : > { %12809 = vmatprep.subr.bf16.mxu1 %v13394_v19 }
 0xec1   : > { %11487 = vmatmul.mubr.f32.vlgmr.msra.gmra.mrb[16].mxu1 %v6003_v40 }
 0xec2   : > { %12811 = vmatpush3.bf16.msra.mxu1 %v12810_v26  ;;  %11513 = vmatprep.mubr.msk.f32.mxu1 %vm13393_vm1, %v13392_v2 }
 0xec3   : > { %12812 = vmatprep.subr.bf16.mxu1 %v13394_v19 }
 0xec6   : > { %12814 = vmatpush3.bf16.msra.mxu1 %v12813_v53 }
 0xec7   : > { %12815 = vmatprep.subr.bf16.mxu1 %v13394_v19 }
 0xeca   : > { %12817 = vmatpush3.bf16.msra.mxu1 %v12816_v55 }
 0xecb   : > { %12818 = vmatprep.subr.bf16.mxu1 %v13394_v19 }
 0xece   : > { %12820 = vmatpush3.bf16.msra.mxu1 %v12819_v49 }
 0xecf   : > { %12821 = vmatprep.subr.bf16.mxu1 %v13394_v19 }
 0xed2   : > { %12823 = vmatpush3.bf16.msra.mxu1 %v12822_v35 }
 0xed3   : > { %12824 = vmatprep.subr.bf16.mxu1 %v13394_v19 }
 0xed6   : > { %12826 = vmatpush3.bf16.msra.mxu1 %v12825_v60 }
 0xed7   : > { %12827 = vmatprep.subr.bf16.mxu1 %v13394_v19 }
 0xed9   : > { %11514 = vmatmul.mubr.f32.vlgmr.msra.gmra.mrb[16].mxu1 %v14904_v61 }
 0xeda   : > { %12829 = vmatpush3.bf16.msra.mxu1 %v14775_v5  ;;  %11540 = vmatprep.mubr.msk.f32.mxu1 %vm13393_vm1, %v13392_v2  ;;  %v9544_v5 = vld [vmem:[%s15810_s3 + $0x190] sm:$0xff] }
 0xedb   : > { %12830 = vmatprep.subr.bf16.mxu1 %v13394_v19 }
 0xede   : > { %12832 = vmatpush3.bf16.msra.mxu1 %v14779_v43  ;;  %v6550_v43 = vand.u32 4294901760, %v9542_v15 }
 0xedf   : > { %12833 = vmatprep.subr.bf16.mxu1 %v13394_v19 }
 0xee0   : > { %v15006_v7 = vsub.f32 %v9542_v15, %v6550_v43 }
 0xee2   : > { %12835 = vmatpush3.bf16.msra.mxu1 %v14785_v4  ;;  %v6553_v4 = vand.u32 4294901760, %v9543_v21  ;;  %v6639_v54 = vand.u32 4294901760, %v15006_v7 }
 0xee3   : > { %12836 = vmatprep.subr.bf16.mxu1 %v13394_v19 }
 0xee4   : > { %v15004_v30 = vpack.c.bf16 %v6553_v4, %v6550_v43  ;;  %v15008_v59 = vsub.f32 %v9543_v21, %v6553_v4  ;;  %v6640_v40 = vsub.f32 %v15006_v7, %v6639_v54  ;;  %v6674_v43 = vand.u32 4294901760, %v15037_v13 }
 0xee6   : > { %12838 = vmatpush3.bf16.msra.mxu1 %v14796_v18  ;;  %v9545_v18 = vld [vmem:[%s15810_s3 + $0x198] sm:$0xff]  ;;  %12847 = vmatpush3.bf16.msra.mxu0 %v15004_v30  ;;  %v6646_v37 = vand.u32 4294901760, %v15008_v59  ;;  %v6641_v26 = vand.u32 4294901760, %v6640_v40 }
 0xee7   : > { %12839 = vmatprep.subr.bf16.mxu1 %v13394_v19  ;;  %v6559_v6 = vand.u32 4294901760, %v9545_v18  ;;  %12848 = vmatprep.subr.bf16.mxu0 %v13394_v19 }
 0xee8   : > { %v6647_v38 = vsub.f32 %v15008_v59, %v6646_v37 }
 0xee9   : > { %v15012_v46 = vsub.f32 %v9545_v18, %v6559_v6 }
 0xeea   : > { %12841 = vmatpush3.bf16.msra.mxu1 %v14806_v23  ;;  %v6556_v23 = vand.u32 4294901760, %v9544_v5  ;;  %v6648_v53 = vand.u32 4294901760, %v6647_v38 }
 0xeeb   : > { %12842 = vmatprep.subr.bf16.mxu1 %v13394_v19  ;;  %v6660_v62 = vand.u32 4294901760, %v15012_v46 }
 0xeec   : > { %v15010_v63 = vsub.f32 %v9544_v5, %v6556_v23  ;;  %v12864_v60 = vpack.c.bf16 %v6648_v53, %v6641_v26  ;;  %v6667_v5 = vand.u32 4294901760, %v15035_v12  ;;  %v12882_v53 = vpack.c.bf16 %v15008_v59, %v15006_v7 }
 0xeed   : > { %v6661_v35 = vsub.f32 %v15012_v46, %v6660_v62  ;;  %v12927_v59 = vpack.c.bf16 %v6688_v11, %v6681_v3 }
 0xeee   : > { %12844 = vmatpush3.bf16.msra.mxu1 %v14829_v56  ;;  %v15015_v56 = vpack.c.bf16 %v6559_v6, %v6556_v23  ;;  %v6653_v31 = vand.u32 4294901760, %v15010_v63  ;;  %v6668_v18 = vsub.f32 %v15035_v12, %v6667_v5  ;;  %v6675_v23 = vsub.f32 %v15037_v13, %v6674_v43 }
 0xeef   : > { %12953 = vmatprep.subr.bf16.mxu1 %v13394_v19  ;;  %v6662_v21 = vand.u32 4294901760, %v6661_v35  ;;  %v12891_v35 = vpack.c.bf16 %v15069_v48, %v15067_v17  ;;  %v12924_v7 = vpack.c.bf16 %v6674_v43, %v6667_v5 }
 0xef0   : > { %12850 = vmatpush3.bf16.msra.mxu0 %v15015_v56  ;;  %v6654_v49 = vsub.f32 %v15010_v63, %v6653_v31  ;;  %v6669_v6 = vand.u32 4294901760, %v6668_v18  ;;  %v6676_v28 = vand.u32 4294901760, %v6675_v23 }
 0xef1   : > { %11541 = vmatmul.mubr.f32.vlgmr.msra.gmra.mrb[16].mxu1 %v14904_v61  ;;  %12851 = vmatprep.subr.bf16.mxu0 %v13394_v19  ;;  %v15078_v61 = vsub.f32 %v9552_v57, %v6580_v32  ;;  %v6697_v57 = vand.u32 4294901760, %v6696_v33  ;;  %v6716_v32 = vand.u32 4294901760, %v15080_v1 }
 0xef2   : > { %11713 = vmatprep.mubr.msk.f32.mxu1 %vm13393_vm1, %v13392_v2  ;;  %v6655_v15 = vand.u32 4294901760, %v6654_v49  ;;  %v12870_v39 = vpack.c.bf16 %v6676_v28, %v6669_v6  ;;  %v12888_v49 = vpack.c.bf16 %v15037_v13, %v15035_v12 }
 0xef3   : > { %v6717_v40 = vsub.f32 %v15080_v1, %v6716_v32 }
 0xef4   : > { %12853 = vmatpush3.bf16.msra.mxu0 %v15026_v36  ;;  %v12867_v4 = vpack.c.bf16 %v6662_v21, %v6655_v15  ;;  %v12894_v15 = vpack.c.bf16 %v15073_v58, %v15071_v22  ;;  %v12897_v21 = vpack.c.bf16 %v15080_v1, %v15078_v61 }
 0xef5   : > { %12854 = vmatprep.subr.bf16.mxu0 %v13394_v19 }
 0xef8   : > { %12856 = vmatpush3.bf16.msra.mxu0 %v15040_v10 }
 0xef9   : > { %12857 = vmatprep.subr.bf16.mxu0 %v13394_v19 }
 0xefc   : > { %12859 = vmatpush3.bf16.msra.mxu0 %v15053_v14 }
 0xefd   : > { %12860 = vmatprep.subr.bf16.mxu0 %v13394_v19 }
 0xf00   : > { %12862 = vmatpush3.bf16.msra.mxu0 %v15076_v16 }
 0xf01   : > { %12863 = vmatprep.subr.bf16.mxu0 %v13394_v19 }
 0xfc4   : > { %v6509_v25 = vpop.f32.mrb[16].mxu1 }
 0xfc5   : > { %v15064_v29 = vadd.f32 %v9541_v45, %v6509_v25  ;;  %v11542_v34 = vpop.f32.mrb[17].mxu1  ;;  %v6703_v45 = vsub.f32 %v15073_v58, %v6702_v27  ;;  %v6709_v25 = vand.u32 4294901760, %v15078_v61 }
 0xfc7   : > { %v6513_v51 = vmax.f32 %v15064_v29, 0.0  ;;  %v6704_v44 = vand.u32 4294901760, %v6703_v45  ;;  %v6710_v34 = vsub.f32 %v15078_v61, %v6709_v25 }
 0xfc9   : > { %6519 = vrot.lane.b32.xlu1 %v6513_v51, %s13395_s22  ;;  %v6516_v50 = vrot.slane %v6513_v51, 1  ;;  %v12876_v41 = vpack.c.bf16 %v6704_v44, %v6697_v57  ;;  %v6711_v38 = vand.u32 4294901760, %v6710_v34  ;;  %v6514_v18 = vrot.slane %v6513_v51, 7 }
 0xfca   : > { %v12918_v51 = vpack.c.bf16 %v6646_v37, %v6639_v54  ;;  %v9558_v54 = vld [vmem:[%s15812_s5 + $0x78] sm:$0xff] }
 0xfcb   : > { %v6517_v55 = vsel %vm13682_vm3, 0.0, %v6516_v50  ;;  %v6718_v50 = vand.u32 4294901760, %v6717_v40  ;;  %v6515_v6 = vsel %vm13698_vm4, 0.0, %v6514_v18  ;;  %v7157_v22 = vand.u32 4294901760, %v9558_v54 }
 0xfcd   : > { %6523 = vrot.lane.b32.xlu1 %v6517_v55, %s13396_s25  ;;  %v12879_v26 = vpack.c.bf16 %v6718_v50, %v6711_v38  ;;  %v12885_v55 = vpack.c.bf16 %v15012_v46, %v15010_v63  ;;  %v12930_v63 = vpack.c.bf16 %v6702_v27, %v6695_v52  ;;  %v12933_v46 = vpack.c.bf16 %v6716_v32, %v6709_v25  ;;  %v9554_v38 = vld [vmem:[%s15811_s4 + $0x4] ss:$0 sm:$0xff] }
 0xfce   : > { %v7249_v61 = vsub.f32 %v9558_v54, %v7157_v22 }
0x103b   : > { %v6520_v23 = vpop.permute.xlu1 %6519 }
0x103c   : > { %v6526_v28 = vsel %vm916_vm5, %v6515_v6, %v6520_v23  ;;  %v9560_v6 = vld [vmem:[%s15810_s3 + $0x1e0] sm:$0xff] }
0x103f   : > { %v6524_v20 = vpop.permute.xlu1 %6523 }
0x1040   : > { %v6527_v47 = vsel %vm918_vm6, %v6526_v28, %v6524_v20  ;;  %v9561_v28 = vld [vmem:[%s15810_s3 + $0x1e8] sm:$0xff]  ;;  %v9562_v20 = vld [vmem:[%s15810_s3 + $0x1f0] sm:$0xff] }
0x1041   : > { %v6547_v42 = vsel %vm937_vm7, %v6527_v47, 0  ;;  %v7676_v47 = vand.u32 4294901760, %v9560_v6 }
0x1042   : > { %v15151_v9 = vand.u32 4294901760, %v6547_v42 }
0x1044   : > { %v6627_v33 = vsub.f32 %v6547_v42, %v15151_v9  ;;  %v7679_v42 = vand.u32 4294901760, %v9561_v28 }
0x1046   : > { %v6628_v45 = vand.u32 4294901760, %v6627_v33 }
0x1048   : > { %v6629_v57 = vsub.f32 %v6627_v33, %v6628_v45 }
0x104a   : > { %v6630_v44 = vand.u32 4294901760, %v6629_v57  ;;  %v9565_v57 = vld [vmem:[%s15810_s3 + $0x208] sm:$0xff] }
0x104c   : > { %11568 = vmatmul.mubr.f32.vlgmr.msra.gmra.mrb[26].mxu0 %v6630_v44 }
0x104d   : > { %12865 = vmatpush3.bf16.msra.mxu0 %v12864_v60  ;;  %11594 = vmatprep.mubr.msk.f32.mxu0 %vm13393_vm1, %v13392_v2  ;;  %v12921_v60 = vpack.c.bf16 %v6660_v62, %v6653_v31  ;;  %v7250_v31 = vand.u32 4294901760, %v7249_v61 }
0x104e   : > { %12866 = vmatprep.subr.bf16.mxu0 %v13394_v19 }
0x1051   : > { %12868 = vmatpush3.bf16.msra.mxu0 %v12867_v4 }
0x1052   : > { %12869 = vmatprep.subr.bf16.mxu0 %v13394_v19 }
0x1055   : > { %12871 = vmatpush3.bf16.msra.mxu0 %v12870_v39 }
0x1056   : > { %12872 = vmatprep.subr.bf16.mxu0 %v13394_v19 }
0x1059   : > { %12874 = vmatpush3.bf16.msra.mxu0 %v12873_v24  ;;  %v7251_v24 = vsub.f32 %v7249_v61, %v7250_v31 }
0x105a   : > { %12875 = vmatprep.subr.bf16.mxu0 %v13394_v19 }
0x105b   : > { %v7252_v32 = vand.u32 4294901760, %v7251_v24 }
0x105d   : > { %12877 = vmatpush3.bf16.msra.mxu0 %v12876_v41 }
0x105e   : > { %12878 = vmatprep.subr.bf16.mxu0 %v13394_v19 }
0x1061   : > { %12880 = vmatpush3.bf16.msra.mxu0 %v12879_v26 }
0x1062   : > { %12881 = vmatprep.subr.bf16.mxu0 %v13394_v19 }
0x1064   : > { %11595 = vmatmul.mubr.f32.vlgmr.msra.gmra.mrb[26].mxu0 %v15151_v9 }
0x1065   : > { %12883 = vmatpush3.bf16.msra.mxu0 %v12882_v53  ;;  %11621 = vmatprep.mubr.msk.f32.mxu0 %vm13393_vm1, %v13392_v2 }
0x1066   : > { %12884 = vmatprep.subr.bf16.mxu0 %v13394_v19 }
0x1069   : > { %12886 = vmatpush3.bf16.msra.mxu0 %v12885_v55 }
0x106a   : > { %12887 = vmatprep.subr.bf16.mxu0 %v13394_v19 }
0x106d   : > { %12889 = vmatpush3.bf16.msra.mxu0 %v12888_v49 }
0x106e   : > { %12890 = vmatprep.subr.bf16.mxu0 %v13394_v19 }
0x1071   : > { %12892 = vmatpush3.bf16.msra.mxu0 %v12891_v35 }
0x1072   : > { %12893 = vmatprep.subr.bf16.mxu0 %v13394_v19 }
0x1075   : > { %12895 = vmatpush3.bf16.msra.mxu0 %v12894_v15 }
0x1076   : > { %12896 = vmatprep.subr.bf16.mxu0 %v13394_v19 }
0x1079   : > { %12898 = vmatpush3.bf16.msra.mxu0 %v12897_v21 }
0x107a   : > { %12899 = vmatprep.subr.bf16.mxu0 %v13394_v19 }
0x107c   : > { %11622 = vmatmul.mubr.f32.vlgmr.msra.gmra.mrb[26].mxu0 %v6627_v33  ;;  %v7682_v33 = vand.u32 4294901760, %v9562_v20 }
0x107d   : > { %12901 = vmatpush3.bf16.msra.mxu0 %v15004_v30  ;;  %11648 = vmatprep.mubr.msk.f32.mxu0 %vm13393_vm1, %v13392_v2 }
0x107e   : > { %12902 = vmatprep.subr.bf16.mxu0 %v13394_v19 }
0x1081   : > { %12904 = vmatpush3.bf16.msra.mxu0 %v15015_v56 }
0x1082   : > { %12905 = vmatprep.subr.bf16.mxu0 %v13394_v19 }
0x1085   : > { %12907 = vmatpush3.bf16.msra.mxu0 %v15026_v36 }
0x1086   : > { %12908 = vmatprep.subr.bf16.mxu0 %v13394_v19 }
0x1089   : > { %12910 = vmatpush3.bf16.msra.mxu0 %v15040_v10 }
0x108a   : > { %12911 = vmatprep.subr.bf16.mxu0 %v13394_v19 }
0x108d   : > { %12913 = vmatpush3.bf16.msra.mxu0 %v15053_v14 }
0x108e   : > { %12914 = vmatprep.subr.bf16.mxu0 %v13394_v19 }
0x1091   : > { %12916 = vmatpush3.bf16.msra.mxu0 %v15076_v16 }
0x1092   : > { %12917 = vmatprep.subr.bf16.mxu0 %v13394_v19 }
0x1094   : > { %11649 = vmatmul.mubr.f32.vlgmr.msra.gmra.mrb[26].mxu0 %v6628_v45  ;;  %v9564_v45 = vld [vmem:[%s15810_s3 + $0x200] sm:$0xff] }
0x1095   : > { %12919 = vmatpush3.bf16.msra.mxu0 %v12918_v51  ;;  %11675 = vmatprep.mubr.msk.f32.mxu0 %vm13393_vm1, %v13392_v2  ;;  %v7688_v51 = vand.u32 4294901760, %v9564_v45 }
0x1096   : > { %12920 = vmatprep.subr.bf16.mxu0 %v13394_v19 }
0x1099   : > { %12922 = vmatpush3.bf16.msra.mxu0 %v12921_v60  ;;  %v7691_v60 = vand.u32 4294901760, %v9565_v57 }
0x109a   : > { %12923 = vmatprep.subr.bf16.mxu0 %v13394_v19 }
0x109d   : > { %12925 = vmatpush3.bf16.msra.mxu0 %v12924_v7  ;;  %v15293_v7 = vpack.c.bf16 %v7679_v42, %v7676_v47 }
0x109e   : > { %12926 = vmatprep.subr.bf16.mxu0 %v13394_v19 }
0x10a1   : > { %12928 = vmatpush3.bf16.msra.mxu0 %v12927_v59  ;;  %v15295_v59 = vsub.f32 %v9560_v6, %v7676_v47 }
0x10a2   : > { %12929 = vmatprep.subr.bf16.mxu0 %v13394_v19 }
0x10a5   : > { %12931 = vmatpush3.bf16.msra.mxu0 %v12930_v63  ;;  %v15297_v63 = vsub.f32 %v9561_v28, %v7679_v42 }
0x10a6   : > { %12932 = vmatprep.subr.bf16.mxu0 %v13394_v19 }
0x10a9   : > { %12934 = vmatpush3.bf16.msra.mxu0 %v12933_v46  ;;  %v15299_v46 = vsub.f32 %v9562_v20, %v7682_v33 }
0x10aa   : > { %12935 = vmatprep.subr.bf16.mxu0 %v13394_v19 }
0x10ac   : > { %11676 = vmatmul.mubr.f32.vlgmr.msra.gmra.mrb[26].mxu0 %v15151_v9 }
0x10ad   : > { %12937 = vmatpush3.bf16.msra.mxu0 %v15004_v30  ;;  %11702 = vmatprep.mubr.msk.f32.mxu0 %vm13393_vm1, %v13392_v2  ;;  %v9555_v30 = vld [vmem:[%s15812_s5 + $0x60] sm:$0xff] }
0x10ae   : > { %12938 = vmatprep.subr.bf16.mxu0 %v13394_v19 }
0x10b1   : > { %12940 = vmatpush3.bf16.msra.mxu0 %v15015_v56  ;;  %v9556_v56 = vld [vmem:[%s15812_s5 + $0x68] sm:$0xff] }
0x10b2   : > { %12941 = vmatprep.subr.bf16.mxu0 %v13394_v19  ;;  %v7151_v12 = vand.u32 4294901760, %v9556_v56 }
0x10b5   : > { %12943 = vmatpush3.bf16.msra.mxu0 %v15026_v36  ;;  %v7148_v36 = vand.u32 4294901760, %v9555_v30 }
0x10b6   : > { %12944 = vmatprep.subr.bf16.mxu0 %v13394_v19 }
0x10b7   : > { %v7228_v13 = vsub.f32 %v9555_v30, %v7148_v36  ;;  %v12954_v5 = vpack.c.bf16 %v7151_v12, %v7148_v36 }
0x10b9   : > { %12946 = vmatpush3.bf16.msra.mxu0 %v15040_v10  ;;  %v7235_v10 = vsub.f32 %v9556_v56, %v7151_v12  ;;  %v7229_v37 = vand.u32 4294901760, %v7228_v13  ;;  %12955 = vmatpush3.bf16.msra.mxu1 %v12954_v5  ;;  %v15303_v56 = vsub.f32 %v9564_v45, %v7688_v51  ;;  %v15308_v12 = vsub.f32 %v9565_v57, %v7691_v60 }
0x10ba   : > { %12947 = vmatprep.subr.bf16.mxu0 %v13394_v19  ;;  %12956 = vmatprep.subr.bf16.mxu1 %v13394_v19  ;;  %v7779_v45 = vand.u32 4294901760, %v15299_v46 }
0x10bb   : > { %v7236_v17 = vand.u32 4294901760, %v7235_v10  ;;  %v7230_v4 = vsub.f32 %v7228_v13, %v7229_v37  ;;  %v12966_v34 = vpack.c.bf16 %v7235_v10, %v7228_v13  ;;  %v15312_v13 = vpack.c.bf16 %v7691_v60, %v7688_v51 }
0x10bd   : > { %12949 = vmatpush3.bf16.msra.mxu0 %v15053_v14  ;;  %v9557_v14 = vld [vmem:[%s15812_s5 + $0x70] sm:$0xff]  ;;  %v12978_v58 = vpack.c.bf16 %v7236_v17, %v7229_v37  ;;  %v7237_v3 = vsub.f32 %v7235_v10, %v7236_v17  ;;  %v7231_v11 = vand.u32 4294901760, %v7230_v4 }
0x10be   : > { %12950 = vmatprep.subr.bf16.mxu0 %v13394_v19  ;;  %v7154_v48 = vand.u32 4294901760, %v9557_v14 }
0x10bf   : > { %v7238_v39 = vand.u32 4294901760, %v7237_v3 }
0x10c0   : > { %v12957_v43 = vpack.c.bf16 %v7157_v22, %v7154_v48 }
0x10c1   : > { %12952 = vmatpush3.bf16.msra.mxu0 %v15076_v16  ;;  %v7242_v16 = vsub.f32 %v9557_v14, %v7154_v48  ;;  %v12960_v52 = vpack.c.bf16 %v7238_v39, %v7231_v11 }
0x10c2   : > { %12977 = vmatprep.subr.bf16.mxu0 %v13394_v19  ;;  %12958 = vmatpush3.bf16.msra.mxu1 %v12957_v43 }
0x10c3   : > { %v7243_v1 = vand.u32 4294901760, %v7242_v16  ;;  %12959 = vmatprep.subr.bf16.mxu1 %v13394_v19  ;;  %v12969_v40 = vpack.c.bf16 %v7249_v61, %v7242_v16 }
0x10c4   : > { %11703 = vmatmul.mubr.f32.vlgmr.msra.gmra.mrb[26].mxu0 %v15151_v9  ;;  %v9563_v9 = vld [vmem:[%s15810_s3 + $0x1f8] sm:$0xff] }
0x10c5   : > { %11757 = vmatprep.mubr.msk.f32.mxu0 %vm13393_vm1, %v13392_v2  ;;  %12979 = vmatpush3.bf16.msra.mxu0 %v12978_v58  ;;  %v12981_v62 = vpack.c.bf16 %v7250_v31, %v7243_v1  ;;  %v7244_v27 = vsub.f32 %v7242_v16, %v7243_v1  ;;  %v7685_v44 = vand.u32 4294901760, %v9563_v9 }
0x10c6   : > { %12980 = vmatprep.subr.bf16.mxu0 %v13394_v19 }
0x10c7   : > { %v7245_v25 = vand.u32 4294901760, %v7244_v27  ;;  %v15301_v30 = vsub.f32 %v9563_v9, %v7685_v44  ;;  %v15306_v36 = vpack.c.bf16 %v7685_v44, %v7682_v33  ;;  %v9569_v27 = vld [vmem:[%s15810_s3 + $0x228] sm:$0xff] }
0x10c9   : > { %12982 = vmatpush3.bf16.msra.mxu0 %v12981_v62  ;;  %v12963_v41 = vpack.c.bf16 %v7252_v32, %v7245_v25  ;;  %v7703_v25 = vand.u32 4294901760, %v9569_v27  ;;  %v7786_v57 = vand.u32 4294901760, %v15301_v30 }
0x10ca   : > { %12989 = vmatprep.subr.bf16.mxu0 %v13394_v19 }
0x10cb   : > { %v15357_v28 = vsub.f32 %v9569_v27, %v7703_v25 }
0x1197   : > { %v7134_v50 = vpop.f32.mrb[26].mxu0 }
0x1198   : > { %v13248_v26 = vadd.f32 %v9554_v38, %v7134_v50  ;;  %v11704_v53 = vpop.f32.mrb[27].mxu0  ;;  %v9559_v38 = vld [vmem:[%s15813_s6 + $0x3] ss:$0 sm:$0xff]  ;;  %v9570_v50 = vld [vmem:[%s15810_s3 + $0x230] sm:$0xff] }
0x119a   : > { %v7138_v55 = vmax.f32 %v13248_v26, 0.0  ;;  %v9571_v26 = vld [vmem:[%s15810_s3 + $0x238] sm:$0xff] }
0x119c   : > { %v7145_v49 = vsel %vm916_vm5, %v7138_v55, 0  ;;  %v7706_v55 = vand.u32 4294901760, %v9570_v50 }
0x119d   : > { %v7216_v35 = vand.u32 4294901760, %v7145_v49 }
0x119e   : > { %v15361_v20 = vsub.f32 %v9570_v50, %v7706_v55 }
0x119f   : > { %v7217_v15 = vsub.f32 %v7145_v49, %v7216_v35  ;;  %11758 = vmatmul.mubr.f32.vlgmr.msra.gmra.mrb[28].mxu0 %v7216_v35  ;;  %v7709_v49 = vand.u32 4294901760, %v9571_v26 }
0x11a0   : > { %11795 = vmatprep.mubr.msk.f32.mxu0 %vm13393_vm1, %v13392_v2  ;;  %12991 = vmatpush3.bf16.msra.mxu0 %v15293_v7 }
0x11a1   : > { %v7218_v21 = vand.u32 4294901760, %v7217_v15  ;;  %12992 = vmatprep.subr.bf16.mxu0 %v13394_v19  ;;  %v15363_v47 = vsub.f32 %v9571_v26, %v7709_v49  ;;  %v7835_v26 = vand.u32 4294901760, %v15361_v20 }
0x11a3   : > { %v7219_v18 = vsub.f32 %v7217_v15, %v7218_v21 }
0x11a4   : > { %12994 = vmatpush3.bf16.msra.mxu0 %v15306_v36 }
0x11a5   : > { %v7220_v23 = vand.u32 4294901760, %v7219_v18  ;;  %12995 = vmatprep.subr.bf16.mxu0 %v13394_v19 }
0x11a7   : > { %11714 = vmatmul.mubr.f32.vlgmr.msra.gmra.mrb[18].mxu1 %v7220_v23 }
0x11a8   : > { %12961 = vmatpush3.bf16.msra.mxu1 %v12960_v52  ;;  %11724 = vmatprep.mubr.msk.f32.mxu1 %vm13393_vm1, %v13392_v2  ;;  %v9568_v52 = vld [vmem:[%s15810_s3 + $0x220] sm:$0xff] }
0x11a9   : > { %12962 = vmatprep.subr.bf16.mxu1 %v13394_v19  ;;  %12997 = vmatpush3.bf16.msra.mxu0 %v15312_v13  ;;  %v7700_v24 = vand.u32 4294901760, %v9568_v52 }
0x11aa   : > { %12998 = vmatprep.subr.bf16.mxu0 %v13394_v19 }
0x11ab   : > { %v15355_v6 = vsub.f32 %v9568_v52, %v7700_v24 }
0x11ac   : > { %12964 = vmatpush3.bf16.msra.mxu1 %v12963_v41 }
0x11ad   : > { %12965 = vmatprep.subr.bf16.mxu1 %v13394_v19 }
0x11af   : > { %11725 = vmatmul.mubr.f32.vlgmr.msra.gmra.mrb[20].mxu1 %v7216_v35 }
0x11b0   : > { %12967 = vmatpush3.bf16.msra.mxu1 %v12966_v34  ;;  %11735 = vmatprep.mubr.msk.f32.mxu1 %vm13393_vm1, %v13392_v2 }
0x11b1   : > { %12968 = vmatprep.subr.bf16.mxu1 %v13394_v19 }
0x11b4   : > { %12970 = vmatpush3.bf16.msra.mxu1 %v12969_v40  ;;  %v15333_v40 = vpack.c.bf16 %v7703_v25, %v7700_v24  ;;  %v7821_v24 = vand.u32 4294901760, %v15355_v6  ;;  %v7828_v25 = vand.u32 4294901760, %v15357_v28 }
0x11b5   : > { %12971 = vmatprep.subr.bf16.mxu1 %v13394_v19 }
0x11b7   : > { %11736 = vmatmul.mubr.f32.vlgmr.msra.gmra.mrb[22].mxu1 %v7217_v15  ;;  %v7772_v15 = vand.u32 4294901760, %v15297_v63 }
0x11b8   : > { %12973 = vmatpush3.bf16.msra.mxu1 %v12954_v5  ;;  %11746 = vmatprep.mubr.msk.f32.mxu1 %vm13393_vm1, %v13392_v2 }
0x11b9   : > { %12974 = vmatprep.subr.bf16.mxu1 %v13394_v19  ;;  %v7773_v33 = vsub.f32 %v15297_v63, %v7772_v15 }
0x11bb   : > { %v7774_v60 = vand.u32 4294901760, %v7773_v33 }
0x11bc   : > { %12976 = vmatpush3.bf16.msra.mxu1 %v12957_v43 }
0x11bd   : > { %12983 = vmatprep.subr.bf16.mxu1 %v13394_v19 }
0x11bf   : > { %11747 = vmatmul.mubr.f32.vlgmr.msra.gmra.mrb[24].mxu1 %v7218_v21 }
0x11c0   : > { %12985 = vmatpush3.bf16.msra.mxu1 %v12954_v5  ;;  %11768 = vmatprep.mubr.msk.f32.mxu1 %vm13393_vm1, %v13392_v2  ;;  %v9566_v5 = vld [vmem:[%s15810_s3 + $0x210] sm:$0xff] }
0x11c1   : > { %12986 = vmatprep.subr.bf16.mxu1 %v13394_v19  ;;  %v7694_v3 = vand.u32 4294901760, %v9566_v5 }
0x11c3   : > { %v15351_v18 = vsub.f32 %v9566_v5, %v7694_v3 }
0x11c4   : > { %12988 = vmatpush3.bf16.msra.mxu1 %v12957_v43  ;;  %v9567_v43 = vld [vmem:[%s15810_s3 + $0x218] sm:$0xff] }
0x11c5   : > { %13097 = vmatprep.subr.bf16.mxu1 %v13394_v19  ;;  %v7697_v11 = vand.u32 4294901760, %v9567_v43  ;;  %v7807_v5 = vand.u32 4294901760, %v15351_v18 }
0x11c7   : > { %11769 = vmatmul.mubr.f32.vlgmr.msra.gmra.mrb[26].mxu1 %v7216_v35  ;;  %v15323_v39 = vpack.c.bf16 %v7697_v11, %v7694_v3  ;;  %v7765_v35 = vand.u32 4294901760, %v15295_v59  ;;  %v15353_v23 = vsub.f32 %v9567_v43, %v7697_v11  ;;  %v7808_v3 = vsub.f32 %v15351_v18, %v7807_v5 }
0x11c8   : > { %11941 = vmatprep.mubr.msk.f32.mxu1 %vm13393_vm1, %v13392_v2 }
0x11c9   : > { %13000 = vmatpush3.bf16.msra.mxu0 %v15323_v39  ;;  %v7766_v9 = vsub.f32 %v15295_v59, %v7765_v35  ;;  %v7814_v43 = vand.u32 4294901760, %v15353_v23  ;;  %v7809_v52 = vand.u32 4294901760, %v7808_v3 }
0x11ca   : > { %13001 = vmatprep.subr.bf16.mxu0 %v13394_v19 }
0x11cb   : > { %v7767_v51 = vand.u32 4294901760, %v7766_v9  ;;  %v7815_v11 = vsub.f32 %v15353_v23, %v7814_v43 }
0x11cd   : > { %13003 = vmatpush3.bf16.msra.mxu0 %v15333_v40  ;;  %v7816_v27 = vand.u32 4294901760, %v7815_v11 }
0x11ce   : > { %13004 = vmatprep.subr.bf16.mxu0 %v13394_v19 }
0x1272   : > { %v7553_v10 = vpop.f32.mrb[28].mxu0 }
0x1273   : > { %v11759_v14 = vpop.f32.mrb[29].mxu0 }
0x1274   : > { %v7787_v14 = vsub.f32 %v15301_v30, %v7786_v57 }
0x127a   : > { %v7222_v54 = vpop.f32.mrb[18].mxu1 }
0x127b   : > { %v11715_v37 = vpop.f32.mrb[19].mxu1 }
0x127c   : > { %v13008_v37 = vpack.c.bf16 %v7774_v60, %v7767_v51  ;;  %v13026_v60 = vpack.c.bf16 %v15297_v63, %v15295_v59  ;;  %v13071_v63 = vpack.c.bf16 %v7814_v43, %v7807_v5 }
0x1282   : > { %v7313_v17 = vpop.f32.mrb[20].mxu1 }
0x1283   : > { %v7314_v48 = vadd.f32 %v7313_v17, %v7222_v54  ;;  %v11726_v22 = vpop.f32.mrb[21].mxu1 }
0x1284   : > { %v7793_v22 = vand.u32 4294901760, %v15303_v56 }
0x128a   : > { %v7393_v58 = vpop.f32.mrb[22].mxu1 }
0x128b   : > { %v7394_v16 = vadd.f32 %v7393_v58, %v7314_v48  ;;  %v11737_v61 = vpop.f32.mrb[23].mxu1  ;;  %v7788_v48 = vand.u32 4294901760, %v7787_v14  ;;  %v7800_v58 = vand.u32 4294901760, %v15308_v12  ;;  %v13032_v14 = vpack.c.bf16 %v15308_v12, %v15303_v56 }
0x128c   : > { %v7794_v61 = vsub.f32 %v15303_v56, %v7793_v22  ;;  %v9574_v56 = vld [vmem:[%s15812_s5 + $0x88] sm:$0xff] }
0x128d   : > { %v13068_v59 = vpack.c.bf16 %v7800_v58, %v7793_v22 }
0x1292   : > { %v7470_v1 = vpop.f32.mrb[24].mxu1 }
0x1293   : > { %v7471_v31 = vadd.f32 %v7470_v1, %v7394_v16  ;;  %v11748_v62 = vpop.f32.mrb[25].mxu1  ;;  %v7801_v1 = vsub.f32 %v15308_v12, %v7800_v58  ;;  %v8277_v12 = vand.u32 4294901760, %v9574_v56 }
0x1295   : > { %v7554_v4 = vadd.f32 %v7553_v10, %v7471_v31  ;;  %v7780_v10 = vsub.f32 %v15299_v46, %v7779_v45  ;;  %v7795_v31 = vand.u32 4294901760, %v7794_v61  ;;  %v7802_v62 = vand.u32 4294901760, %v7801_v1 }
0x1297   : > { %v7781_v17 = vand.u32 4294901760, %v7780_v10  ;;  %v13029_v10 = vpack.c.bf16 %v15301_v30, %v15299_v46  ;;  %v13074_v46 = vpack.c.bf16 %v7828_v25, %v7821_v24 }
0x1299   : > { %v13011_v16 = vpack.c.bf16 %v7788_v48, %v7781_v17  ;;  %v13038_v17 = vpack.c.bf16 %v15357_v28, %v15355_v6  ;;  %v13041_v48 = vpack.c.bf16 %v15363_v47, %v15361_v20 }
0x129a   : > { %v7628_v32 = vpop.f32.mrb[26].mxu1 }
0x129b   : > { %v7629_v41 = vadd.f32 %v7628_v32, %v7554_v4  ;;  %v11770_v34 = vpop.f32.mrb[27].mxu1  ;;  %v13014_v4 = vpack.c.bf16 %v7802_v62, %v7795_v31  ;;  %v13017_v32 = vpack.c.bf16 %v7816_v27, %v7809_v52 }
0x129c   : > { %v7829_v34 = vsub.f32 %v15357_v28, %v7828_v25 }
0x129d   : > { %v7632_v53 = vadd.f32 %v15064_v29, %v7629_v41  ;;  %v15359_v29 = vpack.c.bf16 %v7709_v49, %v7706_v55  ;;  %v7822_v41 = vsub.f32 %v15355_v6, %v7821_v24  ;;  %v7836_v49 = vsub.f32 %v15361_v20, %v7835_v26 }
0x129e   : > { %v7830_v50 = vand.u32 4294901760, %v7829_v34 }
0x129f   : > { %v15349_v21 = vadd.f32 %v9559_v38, %v7632_v53  ;;  %13006 = vmatpush3.bf16.msra.mxu0 %v15359_v29  ;;  %v7823_v38 = vand.u32 4294901760, %v7822_v41  ;;  %v7842_v53 = vand.u32 4294901760, %v15363_v47  ;;  %v7837_v33 = vand.u32 4294901760, %v7836_v49 }
0x12a0   : > { %13007 = vmatprep.subr.bf16.mxu0 %v13394_v19 }
0x12a1   : > { %v7639_v42 = vmax.f32 %v15349_v21, 0.0  ;;  %v13020_v55 = vpack.c.bf16 %v7830_v50, %v7823_v38  ;;  %v7843_v9 = vsub.f32 %v15363_v47, %v7842_v53  ;;  %v13077_v30 = vpack.c.bf16 %v7842_v53, %v7835_v26 }
0x12a3   : > { %7645 = vrot.lane.b32.xlu0 %v7639_v42, %s13395_s22  ;;  %v7642_v44 = vrot.slane %v7639_v42, 1  ;;  %v7640_v61 = vrot.slane %v7639_v42, 7  ;;  %v13062_v42 = vpack.c.bf16 %v7772_v15, %v7765_v35  ;;  %v9575_v35 = vld [vmem:[%s15812_s5 + $0x90] sm:$0xff]  ;;  %v9576_v15 = vld [vmem:[%s15812_s5 + $0x98] sm:$0xff] }
0x12a5   : > { %v7643_v54 = vsel %vm13682_vm3, 0.0, %v7642_v44  ;;  %v7844_v44 = vand.u32 4294901760, %v7843_v9  ;;  %v7641_v31 = vsel %vm13698_vm4, 0.0, %v7640_v61 }
0x12a6   : > { %7649 = vrot.lane.b32.xlu1 %v7643_v54, %s13396_s25  ;;  %v13035_v54 = vpack.c.bf16 %v15353_v23, %v15351_v18  ;;  %v8280_v18 = vand.u32 4294901760, %v9575_v35  ;;  %v8283_v23 = vand.u32 4294901760, %v9576_v15 }
0x12a7   : > { %v13023_v51 = vpack.c.bf16 %v7844_v44, %v7837_v33  ;;  %v9572_v33 = vld [vmem:[%s15811_s4 + $0x5] ss:$0 sm:$0xff] }
0x12a8   : > { %v8368_v20 = vsub.f32 %v9575_v35, %v8280_v18  ;;  %v8375_v47 = vsub.f32 %v9576_v15, %v8283_v23 }
0x12aa   : > { %v8376_v5 = vand.u32 4294901760, %v8375_v47 }
0x12ac   : > { %v8377_v24 = vsub.f32 %v8375_v47, %v8376_v5 }
0x1315   : > { %v7646_v1 = vpop.permute.xlu0 %7645 }
0x1316   : > { %v7652_v62 = vsel %vm916_vm5, %v7641_v31, %v7646_v1  ;;  %v8780_v31 = vld [vmem:[%s15816_s9] sm:$0xff] }
0x1318   : > { %v7650_v3 = vpop.permute.xlu1 %7649 }
0x1319   : > { %v7653_v11 = vsel %vm918_vm6, %v7652_v62, %v7650_v3  ;;  %v8781_v62 = vld [vmem:[%s15816_s9 + $0x8] sm:$0xff]  ;;  %v8782_v3 = vld [vmem:[%s15816_s9 + $0x10] sm:$0xff] }
0x131a   : > { %v7673_v52 = vsel %vm937_vm7, %v7653_v11, 0  ;;  %v8806_v11 = vand.u32 4294901760, %v8780_v31 }
0x131b   : > { %v15435_v27 = vand.u32 4294901760, %v7673_v52 }
0x131d   : > { %v7753_v41 = vsub.f32 %v7673_v52, %v15435_v27  ;;  %v8809_v52 = vand.u32 4294901760, %v8781_v62 }
0x131f   : > { %v7754_v34 = vand.u32 4294901760, %v7753_v41 }
0x1321   : > { %v7755_v38 = vsub.f32 %v7753_v41, %v7754_v34 }
0x1323   : > { %v7756_v50 = vand.u32 4294901760, %v7755_v38  ;;  %v8785_v38 = vld [vmem:[%s15816_s9 + $0x28] sm:$0xff] }
0x1325   : > { %11796 = vmatmul.mubr.f32.vlgmr.msra.gmra.mrb[30].mxu0 %v7756_v50 }
0x1326   : > { %13009 = vmatpush3.bf16.msra.mxu0 %v13008_v37  ;;  %11822 = vmatprep.mubr.msk.f32.mxu0 %vm13393_vm1, %v13392_v2  ;;  %v13065_v37 = vpack.c.bf16 %v7786_v57, %v7779_v45 }
0x1327   : > { %13010 = vmatprep.subr.bf16.mxu0 %v13394_v19 }
0x132a   : > { %13012 = vmatpush3.bf16.msra.mxu0 %v13011_v16  ;;  %v8369_v16 = vand.u32 4294901760, %v8368_v20 }
0x132b   : > { %13013 = vmatprep.subr.bf16.mxu0 %v13394_v19 }
0x132c   : > { %v13125_v9 = vpack.c.bf16 %v8376_v5, %v8369_v16 }
0x132e   : > { %13015 = vmatpush3.bf16.msra.mxu0 %v13014_v4  ;;  %v8370_v4 = vsub.f32 %v8368_v20, %v8369_v16  ;;  %v8787_v16 = vld [vmem:[%s15816_s9 + $0x38] sm:$0xff] }
0x132f   : > { %13016 = vmatprep.subr.bf16.mxu0 %v13394_v19 }
0x1330   : > { %v8371_v25 = vand.u32 4294901760, %v8370_v4 }
0x1332   : > { %13018 = vmatpush3.bf16.msra.mxu0 %v13017_v32  ;;  %v8378_v32 = vand.u32 4294901760, %v8377_v24  ;;  %v8788_v24 = vld [vmem:[%s15816_s9 + $0x40] sm:$0xff] }
0x1333   : > { %13019 = vmatprep.subr.bf16.mxu0 %v13394_v19 }
0x1334   : > { %v13107_v26 = vpack.c.bf16 %v8378_v32, %v8371_v25  ;;  %v8789_v25 = vld [vmem:[%s15816_s9 + $0x48] sm:$0xff]  ;;  %v8830_v32 = vand.u32 4294901760, %v8788_v24 }
0x1336   : > { %13021 = vmatpush3.bf16.msra.mxu0 %v13020_v55  ;;  %v13113_v55 = vpack.c.bf16 %v8375_v47, %v8368_v20 }
0x1337   : > { %13022 = vmatprep.subr.bf16.mxu0 %v13394_v19 }
0x133a   : > { %13024 = vmatpush3.bf16.msra.mxu0 %v13023_v51 }
0x133b   : > { %13025 = vmatprep.subr.bf16.mxu0 %v13394_v19 }
0x133d   : > { %11823 = vmatmul.mubr.f32.vlgmr.msra.gmra.mrb[30].mxu0 %v15435_v27 }
0x133e   : > { %13027 = vmatpush3.bf16.msra.mxu0 %v13026_v60  ;;  %11849 = vmatprep.mubr.msk.f32.mxu0 %vm13393_vm1, %v13392_v2 }
0x133f   : > { %13028 = vmatprep.subr.bf16.mxu0 %v13394_v19 }
0x1342   : > { %13030 = vmatpush3.bf16.msra.mxu0 %v13029_v10 }
0x1343   : > { %13031 = vmatprep.subr.bf16.mxu0 %v13394_v19 }
0x1346   : > { %13033 = vmatpush3.bf16.msra.mxu0 %v13032_v14 }
0x1347   : > { %13034 = vmatprep.subr.bf16.mxu0 %v13394_v19 }
0x134a   : > { %13036 = vmatpush3.bf16.msra.mxu0 %v13035_v54 }
0x134b   : > { %13037 = vmatprep.subr.bf16.mxu0 %v13394_v19 }
0x134e   : > { %13039 = vmatpush3.bf16.msra.mxu0 %v13038_v17 }
0x134f   : > { %13040 = vmatprep.subr.bf16.mxu0 %v13394_v19 }
0x1352   : > { %13042 = vmatpush3.bf16.msra.mxu0 %v13041_v48 }
0x1353   : > { %13043 = vmatprep.subr.bf16.mxu0 %v13394_v19 }
0x1355   : > { %11850 = vmatmul.mubr.f32.vlgmr.msra.gmra.mrb[30].mxu0 %v7753_v41  ;;  %v8812_v41 = vand.u32 4294901760, %v8782_v3 }
0x1356   : > { %13045 = vmatpush3.bf16.msra.mxu0 %v15293_v7  ;;  %11876 = vmatprep.mubr.msk.f32.mxu0 %vm13393_vm1, %v13392_v2 }
0x1357   : > { %13046 = vmatprep.subr.bf16.mxu0 %v13394_v19 }
0x135a   : > { %13048 = vmatpush3.bf16.msra.mxu0 %v15306_v36 }
0x135b   : > { %13049 = vmatprep.subr.bf16.mxu0 %v13394_v19 }
0x135e   : > { %13051 = vmatpush3.bf16.msra.mxu0 %v15312_v13 }
0x135f   : > { %13052 = vmatprep.subr.bf16.mxu0 %v13394_v19 }
0x1362   : > { %13054 = vmatpush3.bf16.msra.mxu0 %v15323_v39 }
0x1363   : > { %13055 = vmatprep.subr.bf16.mxu0 %v13394_v19 }
0x1366   : > { %13057 = vmatpush3.bf16.msra.mxu0 %v15333_v40 }
0x1367   : > { %13058 = vmatprep.subr.bf16.mxu0 %v13394_v19 }
0x136a   : > { %13060 = vmatpush3.bf16.msra.mxu0 %v15359_v29 }
0x136b   : > { %13061 = vmatprep.subr.bf16.mxu0 %v13394_v19 }
0x136d   : > { %11877 = vmatmul.mubr.f32.vlgmr.msra.gmra.mrb[30].mxu0 %v7754_v34  ;;  %v8784_v34 = vld [vmem:[%s15816_s9 + $0x20] sm:$0xff] }
0x136e   : > { %13063 = vmatpush3.bf16.msra.mxu0 %v13062_v42  ;;  %11903 = vmatprep.mubr.msk.f32.mxu0 %vm13393_vm1, %v13392_v2  ;;  %v8818_v42 = vand.u32 4294901760, %v8784_v34 }
0x136f   : > { %13064 = vmatprep.subr.bf16.mxu0 %v13394_v19 }
0x1372   : > { %13066 = vmatpush3.bf16.msra.mxu0 %v13065_v37  ;;  %v8821_v37 = vand.u32 4294901760, %v8785_v38 }
0x1373   : > { %13067 = vmatprep.subr.bf16.mxu0 %v13394_v19 }
0x1376   : > { %13069 = vmatpush3.bf16.msra.mxu0 %v13068_v59  ;;  %v15579_v59 = vpack.c.bf16 %v8809_v52, %v8806_v11 }
0x1377   : > { %13070 = vmatprep.subr.bf16.mxu0 %v13394_v19 }
0x137a   : > { %13072 = vmatpush3.bf16.msra.mxu0 %v13071_v63  ;;  %v15581_v63 = vsub.f32 %v8780_v31, %v8806_v11  ;;  %v15639_v31 = vsub.f32 %v8788_v24, %v8830_v32 }
0x137b   : > { %13073 = vmatprep.subr.bf16.mxu0 %v13394_v19 }
0x137e   : > { %13075 = vmatpush3.bf16.msra.mxu0 %v13074_v46  ;;  %v15583_v46 = vsub.f32 %v8781_v62, %v8809_v52 }
0x137f   : > { %13076 = vmatprep.subr.bf16.mxu0 %v13394_v19 }
0x1382   : > { %13078 = vmatpush3.bf16.msra.mxu0 %v13077_v30  ;;  %v15585_v30 = vsub.f32 %v8782_v3, %v8812_v41 }
0x1383   : > { %13079 = vmatprep.subr.bf16.mxu0 %v13394_v19 }
0x1385   : > { %11904 = vmatmul.mubr.f32.vlgmr.msra.gmra.mrb[30].mxu0 %v15435_v27 }
0x1386   : > { %13081 = vmatpush3.bf16.msra.mxu0 %v15293_v7  ;;  %11930 = vmatprep.mubr.msk.f32.mxu0 %vm13393_vm1, %v13392_v2  ;;  %v9573_v7 = vld [vmem:[%s15812_s5 + $0x80] sm:$0xff] }
0x1387   : > { %13082 = vmatprep.subr.bf16.mxu0 %v13394_v19 }
0x138a   : > { %13084 = vmatpush3.bf16.msra.mxu0 %v15306_v36  ;;  %v8274_v36 = vand.u32 4294901760, %v9573_v7 }
0x138b   : > { %13085 = vmatprep.subr.bf16.mxu0 %v13394_v19 }
0x138e   : > { %13087 = vmatpush3.bf16.msra.mxu0 %v15312_v13  ;;  %v15522_v13 = vpack.c.bf16 %v8277_v12, %v8274_v36 }
0x138f   : > { %13088 = vmatprep.subr.bf16.mxu0 %v13394_v19 }
0x1390   : > { %13099 = vmatpush3.bf16.msra.mxu1 %v15522_v13 }
0x1391   : > { %13100 = vmatprep.subr.bf16.mxu1 %v13394_v19 }
0x1392   : > { %13090 = vmatpush3.bf16.msra.mxu0 %v15323_v39  ;;  %v8354_v39 = vsub.f32 %v9573_v7, %v8274_v36 }
0x1393   : > { %13091 = vmatprep.subr.bf16.mxu0 %v13394_v19 }
0x1394   : > { %v8355_v6 = vand.u32 4294901760, %v8354_v39 }
0x1396   : > { %13093 = vmatpush3.bf16.msra.mxu0 %v15333_v40  ;;  %v8361_v40 = vsub.f32 %v9574_v56, %v8277_v12  ;;  %v8356_v45 = vsub.f32 %v8354_v39, %v8355_v6  ;;  %v15589_v56 = vsub.f32 %v8784_v34, %v8818_v42  ;;  %v15594_v12 = vsub.f32 %v8785_v38, %v8821_v37 }
0x1397   : > { %13094 = vmatprep.subr.bf16.mxu0 %v13394_v19  ;;  %v8909_v34 = vand.u32 4294901760, %v15585_v30 }
0x1398   : > { %v8362_v28 = vand.u32 4294901760, %v8361_v40  ;;  %v8357_v22 = vand.u32 4294901760, %v8356_v45  ;;  %v13110_v53 = vpack.c.bf16 %v8361_v40, %v8354_v39 }
0x139a   : > { %13096 = vmatpush3.bf16.msra.mxu0 %v15359_v29  ;;  %v13101_v29 = vpack.c.bf16 %v8283_v23, %v8280_v18  ;;  %v8363_v57 = vsub.f32 %v8361_v40, %v8362_v28  ;;  %v13122_v49 = vpack.c.bf16 %v8362_v28, %v8355_v6 }
0x139c   : > { %13102 = vmatpush3.bf16.msra.mxu1 %v13101_v29  ;;  %v8364_v58 = vand.u32 4294901760, %v8363_v57 }
0x139d   : > { %11931 = vmatmul.mubr.f32.vlgmr.msra.gmra.mrb[30].mxu0 %v15435_v27  ;;  %13103 = vmatprep.subr.bf16.mxu1 %v13394_v19  ;;  %v8783_v27 = vld [vmem:[%s15816_s9 + $0x18] sm:$0xff] }
0x139e   : > { %v13104_v43 = vpack.c.bf16 %v8364_v58, %v8357_v22  ;;  %v8815_v50 = vand.u32 4294901760, %v8783_v27  ;;  %v8786_v58 = vld [vmem:[%s15816_s9 + $0x30] sm:$0xff] }
0x139f   : > { %v8824_v5 = vand.u32 4294901760, %v8786_v58 }
0x13a0   : > { %v15587_v7 = vsub.f32 %v8783_v27, %v8815_v50  ;;  %v15592_v36 = vpack.c.bf16 %v8815_v50, %v8812_v41 }
0x13a2   : > { %v8916_v38 = vand.u32 4294901760, %v15587_v7 }
0x1470   : > { %v8260_v44 = vpop.f32.mrb[30].mxu0 }
0x1471   : > { %v13249_v51 = vadd.f32 %v9572_v33, %v8260_v44  ;;  %v11932_v60 = vpop.f32.mrb[31].mxu0  ;;  %v9577_v33 = vld [vmem:[%s15813_s6 + $0x4] ss:$0 sm:$0xff]  ;;  %v8790_v44 = vld [vmem:[%s15816_s9 + $0x50] sm:$0xff] }
0x1473   : > { %v8264_v10 = vmax.f32 %v13249_v51, 0.0  ;;  %v8791_v51 = vld [vmem:[%s15816_s9 + $0x58] sm:$0xff] }
0x1475   : > { %v8271_v14 = vsel %vm916_vm5, %v8264_v10, 0  ;;  %v8836_v10 = vand.u32 4294901760, %v8790_v44 }
0x1476   : > { %v8342_v54 = vand.u32 4294901760, %v8271_v14 }
0x1477   : > { %v15645_v3 = vsub.f32 %v8790_v44, %v8836_v10 }
0x1478   : > { %v8343_v17 = vsub.f32 %v8271_v14, %v8342_v54  ;;  %v8839_v14 = vand.u32 4294901760, %v8791_v51 }
0x1479   : > { %v8965_v44 = vand.u32 4294901760, %v15645_v3 }
0x147a   : > { %v8344_v48 = vand.u32 4294901760, %v8343_v17  ;;  %v15647_v11 = vsub.f32 %v8791_v51, %v8839_v14 }
0x147c   : > { %v8345_v61 = vsub.f32 %v8343_v17, %v8344_v48  ;;  %v8972_v51 = vand.u32 4294901760, %v15647_v11 }
0x147e   : > { %v8346_v1 = vand.u32 4294901760, %v8345_v61  ;;  %v15635_v61 = vsub.f32 %v8786_v58, %v8824_v5 }
0x1480   : > { %11942 = vmatmul.mubr.f32.vlgmr.msra.gmra.mrb[28].mxu1 %v8346_v1 }
0x1481   : > { %13105 = vmatpush3.bf16.msra.mxu1 %v13104_v43  ;;  %11952 = vmatprep.mubr.msk.f32.mxu1 %vm13393_vm1, %v13392_v2  ;;  %v8827_v43 = vand.u32 4294901760, %v8787_v16 }
0x1482   : > { %13106 = vmatprep.subr.bf16.mxu1 %v13394_v19 }
0x1483   : > { %v15609_v4 = vpack.c.bf16 %v8827_v43, %v8824_v5  ;;  %v15637_v1 = vsub.f32 %v8787_v16, %v8827_v43 }
0x1485   : > { %13108 = vmatpush3.bf16.msra.mxu1 %v13107_v26  ;;  %v8833_v26 = vand.u32 4294901760, %v8789_v25 }
0x1486   : > { %13109 = vmatprep.subr.bf16.mxu1 %v13394_v19 }
0x1487   : > { %v15641_v62 = vsub.f32 %v8789_v25, %v8833_v26  ;;  %v8951_v25 = vand.u32 4294901760, %v15639_v31 }
0x1488   : > { %11953 = vmatmul.mubr.f32.vlgmr.msra.gmra.mrb[30].mxu1 %v8342_v54 }
0x1489   : > { %13111 = vmatpush3.bf16.msra.mxu1 %v13110_v53  ;;  %11963 = vmatprep.mubr.msk.f32.mxu1 %vm13393_vm1, %v13392_v2 }
0x148a   : > { %13112 = vmatprep.subr.bf16.mxu1 %v13394_v19 }
0x148d   : > { %13114 = vmatpush3.bf16.msra.mxu1 %v13113_v55 }
0x148e   : > { %13115 = vmatprep.subr.bf16.mxu1 %v13394_v19 }
0x1490   : > { %11964 = vmatmul.mubr.f32.vlgmr.msra.gmra.mrb[32].mxu1 %v8343_v17  ;;  %v8902_v17 = vand.u32 4294901760, %v15583_v46 }
0x1491   : > { %13117 = vmatpush3.bf16.msra.mxu1 %v15522_v13  ;;  %11974 = vmatprep.mubr.msk.f32.mxu1 %vm13393_vm1, %v13392_v2 }
0x1492   : > { %13118 = vmatprep.subr.bf16.mxu1 %v13394_v19  ;;  %v8903_v41 = vsub.f32 %v15583_v46, %v8902_v17 }
0x1495   : > { %13120 = vmatpush3.bf16.msra.mxu1 %v13101_v29 }
0x1496   : > { %13121 = vmatprep.subr.bf16.mxu1 %v13394_v19 }
0x1498   : > { %11975 = vmatmul.mubr.f32.vlgmr.msra.gmra.mrb[34].mxu1 %v8344_v48 }
0x1499   : > { %13123 = vmatpush3.bf16.msra.mxu1 %v13122_v49  ;;  %11985 = vmatprep.mubr.msk.f32.mxu1 %vm13393_vm1, %v13392_v2 }
0x149a   : > { %13124 = vmatprep.subr.bf16.mxu1 %v13394_v19 }
0x149d   : > { %13126 = vmatpush3.bf16.msra.mxu1 %v13125_v9  ;;  %v15619_v9 = vpack.c.bf16 %v8833_v26, %v8830_v32  ;;  %v8958_v32 = vand.u32 4294901760, %v15641_v62 }
0x149e   : > { %13127 = vmatprep.subr.bf16.mxu1 %v13394_v19 }
0x14a0   : > { %11986 = vmatmul.mubr.f32.vlgmr.msra.gmra.mrb[36].mxu1 %v8342_v54 }
0x14a1   : > { %13129 = vmatpush3.bf16.msra.mxu1 %v15522_v13  ;;  %11996 = vmatprep.mubr.msk.f32.mxu1 %vm13393_vm1, %v13392_v2  ;;  %v15598_v13 = vpack.c.bf16 %v8821_v37, %v8818_v42  ;;  %v8904_v37 = vand.u32 4294901760, %v8903_v41 }
0x14a2   : > { %13130 = vmatprep.subr.bf16.mxu1 %v13394_v19 }
0x14a5   : > { %13132 = vmatpush3.bf16.msra.mxu1 %v13101_v29 }
0x14a6   : > { %13133 = vmatprep.subr.bf16.mxu1 %v13394_v19 }
0x14a8   : > { %11997 = vmatmul.mubr.f32.vlgmr.msra.gmra.mrb[38].mxu1 %v8342_v54  ;;  %v8895_v54 = vand.u32 4294901760, %v15581_v63 }
0x14a9   : > { %12023 = vmatprep.mubr.msk.f32.mxu1 %vm13393_vm1, %v13392_v2  ;;  %13135 = vmatpush3.bf16.msra.mxu1 %v15579_v59 }
0x14aa   : > { %13136 = vmatprep.subr.bf16.mxu1 %v13394_v19  ;;  %v8896_v27 = vsub.f32 %v15581_v63, %v8895_v54  ;;  %v13206_v8 = vpack.c.bf16 %v8902_v17, %v8895_v54 }
0x14ac   : > { %v8897_v42 = vand.u32 4294901760, %v8896_v27 }
0x14ad   : > { %13138 = vmatpush3.bf16.msra.mxu1 %v15592_v36 }
0x14ae   : > { %13139 = vmatprep.subr.bf16.mxu1 %v13394_v19 }
0x14b1   : > { %13141 = vmatpush3.bf16.msra.mxu1 %v15598_v13 }
0x14b2   : > { %13142 = vmatprep.subr.bf16.mxu1 %v13394_v19 }
0x14b5   : > { %13144 = vmatpush3.bf16.msra.mxu1 %v15609_v4 }
0x14b6   : > { %13145 = vmatprep.subr.bf16.mxu1 %v13394_v19 }
0x14b9   : > { %13147 = vmatpush3.bf16.msra.mxu1 %v15619_v9 }
0x14ba   : > { %13148 = vmatprep.subr.bf16.mxu1 %v13394_v19 }
0x1553   : > { %v8348_v39 = vpop.f32.mrb[28].mxu1 }
0x1554   : > { %v11943_v40 = vpop.f32.mrb[29].mxu1 }
0x1555   : > { %v8917_v40 = vsub.f32 %v15587_v7, %v8916_v38 }
0x155b   : > { %v8439_v35 = vpop.f32.mrb[30].mxu1 }
0x155c   : > { %v8440_v15 = vadd.f32 %v8439_v35, %v8348_v39  ;;  %v11954_v18 = vpop.f32.mrb[31].mxu1  ;;  %v8910_v39 = vsub.f32 %v15585_v30, %v8909_v34 }
0x155e   : > { %v8911_v18 = vand.u32 4294901760, %v8910_v39  ;;  %v13179_v39 = vpack.c.bf16 %v15637_v1, %v15635_v61 }
0x1563   : > { %v8519_v23 = vpop.f32.mrb[32].mxu1 }
0x1564   : > { %v8520_v6 = vadd.f32 %v8519_v23, %v8440_v15  ;;  %v11965_v28 = vpop.f32.mrb[33].mxu1  ;;  %v13152_v15 = vpack.c.bf16 %v8904_v37, %v8897_v42  ;;  %v8918_v23 = vand.u32 4294901760, %v8917_v40  ;;  %v13173_v42 = vpack.c.bf16 %v15587_v7, %v15585_v30 }
0x1565   : > { %v8930_v28 = vand.u32 4294901760, %v15594_v12  ;;  %v13176_v37 = vpack.c.bf16 %v15594_v12, %v15589_v56  ;;  %v13182_v40 = vpack.c.bf16 %v15641_v62, %v15639_v31  ;;  %v13218_v30 = vpack.c.bf16 %v8958_v32, %v8951_v25 }
0x1566   : > { %v13221_v7 = vpack.c.bf16 %v8972_v51, %v8965_v44 }
0x156b   : > { %v8596_v29 = vpop.f32.mrb[34].mxu1 }
0x156c   : > { %v8597_v20 = vadd.f32 %v8596_v29, %v8520_v6  ;;  %v11976_v47 = vpop.f32.mrb[35].mxu1  ;;  %v8923_v6 = vand.u32 4294901760, %v15589_v56  ;;  %v13155_v29 = vpack.c.bf16 %v8918_v23, %v8911_v18 }
0x156d   : > { %v8931_v47 = vsub.f32 %v15594_v12, %v8930_v28 }
0x1573   : > { %v8679_v45 = vpop.f32.mrb[36].mxu1 }
0x1574   : > { %v8680_v57 = vadd.f32 %v8679_v45, %v8597_v20  ;;  %v11987_v22 = vpop.f32.mrb[37].mxu1  ;;  %v8924_v20 = vsub.f32 %v15589_v56, %v8923_v6  ;;  %v8932_v45 = vand.u32 4294901760, %v8931_v47 }
0x1575   : > { %v8944_v22 = vand.u32 4294901760, %v15637_v1 }
0x1576   : > { %v8925_v0 = vand.u32 4294901760, %v8924_v20 }
0x1577   : > { %v8945_v5 = vsub.f32 %v15637_v1, %v8944_v22 }
0x1578   : > { %v13158_v58 = vpack.c.bf16 %v8932_v45, %v8925_v0 }
0x1579   : > { %v8946_v24 = vand.u32 4294901760, %v8945_v5 }
0x157b   : > { %v8754_v53 = vpop.f32.mrb[38].mxu1 }
0x157c   : > { %v8755_v55 = vadd.f32 %v8754_v53, %v8680_v57  ;;  %v11998_v49 = vpop.f32.mrb[39].mxu1  ;;  %v8937_v57 = vand.u32 4294901760, %v15635_v61  ;;  %v8952_v53 = vsub.f32 %v15639_v31, %v8951_v25 }
0x157e   : > { %v8758_v60 = vadd.f32 %v8755_v55, %v15349_v21  ;;  %v15643_v21 = vpack.c.bf16 %v8839_v14, %v8836_v10  ;;  %v8938_v16 = vsub.f32 %v15635_v61, %v8937_v57  ;;  %v8959_v55 = vsub.f32 %v15641_v62, %v8958_v32 }
0x157f   : > { %v8953_v49 = vand.u32 4294901760, %v8952_v53  ;;  %v8966_v10 = vsub.f32 %v15645_v3, %v8965_v44  ;;  %v8973_v14 = vsub.f32 %v15647_v11, %v8972_v51  ;;  %v13397_v53 = vmov 0  }
0x1580   : > { %v8764_v48 = vadd.f32 %v9577_v33, %v8758_v60  ;;  %13150 = vmatpush3.bf16.msra.mxu1 %v15643_v21  ;;  %v8939_v43 = vand.u32 4294901760, %v8938_v16  ;;  %v8960_v33 = vand.u32 4294901760, %v8959_v55  ;;  %13383 = vset.pattern.permute.xlu0 %v13397_v53 }
0x1581   : > { %13151 = vmatprep.subr.bf16.mxu1 %v13394_v19  ;;  %v8974_v27 = vand.u32 4294901760, %v8973_v14 }
0x1582   : > { %v8765_v52 = vmax.f32 %v8764_v48, 0.0  ;;  %v13161_v26 = vpack.c.bf16 %v8946_v24, %v8939_v43  ;;  %v13164_v60 = vpack.c.bf16 %v8960_v33, %v8953_v49  ;;  %v8967_v48 = vand.u32 4294901760, %v8966_v10  ;;  %v9578_v24 = vld [vmem:[#allocation2] ss:$0 sm:$0xff] }
0x1584   : > { %8771 = vrot.lane.b32.xlu0 %v8765_v52, %s13395_s22  ;;  %v8768_v50 = vrot.slane %v8765_v52, 1  ;;  %v13167_v41 = vpack.c.bf16 %v8974_v27, %v8967_v48  ;;  %v8766_v18 = vrot.slane %v8765_v52, 7 }
0x1586   : > { %v8769_v35 = vsel %vm13682_vm3, 0.0, %v8768_v50  ;;  %v13170_v50 = vpack.c.bf16 %v15583_v46, %v15581_v63  ;;  %v8767_v20 = vsel %vm13698_vm4, 0.0, %v8766_v18  ;;  %v13212_v63 = vpack.c.bf16 %v8930_v28, %v8923_v6 }
0x1587   : > { %8775 = vrot.lane.b32.xlu1 %v8769_v35, %s13396_s25  ;;  %v13185_v35 = vpack.c.bf16 %v15647_v11, %v15645_v3  ;;  %v13215_v46 = vpack.c.bf16 %v8944_v22, %v8937_v57 }
0x1588   : > { %8799 = vperm.xlu0 %13383, %v9578_v24  }
0x15f6   : > { %v8772_v23 = vpop.permute.xlu0 %8771 }
0x15f7   : > { %v8778_v47 = vsel %vm916_vm5, %v8767_v20, %v8772_v23 }
0x15f9   : > { %v8776_v0 = vpop.permute.xlu1 %8775 }
0x15fa   : > { %v8779_v45 = vsel %vm918_vm6, %v8778_v47, %v8776_v0 }
0x15fb   : > { %v8803_v16 = vsel %vm937_vm7, %v8779_v45, 0 }
0x15fc   : > { %v15718_v5 = vand.u32 4294901760, %v8803_v16 }
0x15fe   : > { %v8883_v43 = vsub.f32 %v8803_v16, %v15718_v5 }
0x1600   : > { %v8884_v55 = vand.u32 4294901760, %v8883_v43 }
0x1602   : > { %v8885_v52 = vsub.f32 %v8883_v43, %v8884_v55 }
0x1604   : > { %v8886_v49 = vand.u32 4294901760, %v8885_v52 }
0x1606   : > { %12024 = vmatmul.mubr.f32.vlgmr.msra.gmra.mrb[40].mxu1 %v8886_v49 }
0x1607   : > { %13153 = vmatpush3.bf16.msra.mxu1 %v13152_v15  ;;  %12050 = vmatprep.mubr.msk.f32.mxu1 %vm13393_vm1, %v13392_v2  ;;  %v13209_v15 = vpack.c.bf16 %v8916_v38, %v8909_v34 }
0x1608   : > { %13154 = vmatprep.subr.bf16.mxu1 %v13394_v19 }
0x160b   : > { %13156 = vmatpush3.bf16.msra.mxu1 %v13155_v29 }
0x160c   : > { %13157 = vmatprep.subr.bf16.mxu1 %v13394_v19 }
0x160f   : > { %13159 = vmatpush3.bf16.msra.mxu1 %v13158_v58 }
0x1610   : > { %13160 = vmatprep.subr.bf16.mxu1 %v13394_v19 }
0x1613   : > { %13162 = vmatpush3.bf16.msra.mxu1 %v13161_v26 }
0x1614   : > { %13163 = vmatprep.subr.bf16.mxu1 %v13394_v19 }
0x1617   : > { %13165 = vmatpush3.bf16.msra.mxu1 %v13164_v60 }
0x1618   : > { %13166 = vmatprep.subr.bf16.mxu1 %v13394_v19 }
0x161b   : > { %13168 = vmatpush3.bf16.msra.mxu1 %v13167_v41 }
0x161c   : > { %13169 = vmatprep.subr.bf16.mxu1 %v13394_v19 }
0x161e   : > { %12051 = vmatmul.mubr.f32.vlgmr.msra.gmra.mrb[40].mxu1 %v15718_v5 }
0x161f   : > { %13171 = vmatpush3.bf16.msra.mxu1 %v13170_v50  ;;  %12077 = vmatprep.mubr.msk.f32.mxu1 %vm13393_vm1, %v13392_v2 }
0x1620   : > { %13172 = vmatprep.subr.bf16.mxu1 %v13394_v19 }
0x1623   : > { %13174 = vmatpush3.bf16.msra.mxu1 %v13173_v42 }
0x1624   : > { %13175 = vmatprep.subr.bf16.mxu1 %v13394_v19 }
0x1627   : > { %13177 = vmatpush3.bf16.msra.mxu1 %v13176_v37 }
0x1628   : > { %13178 = vmatprep.subr.bf16.mxu1 %v13394_v19 }
0x162b   : > { %13180 = vmatpush3.bf16.msra.mxu1 %v13179_v39 }
0x162c   : > { %13181 = vmatprep.subr.bf16.mxu1 %v13394_v19 }
0x162f   : > { %13183 = vmatpush3.bf16.msra.mxu1 %v13182_v40 }
0x1630   : > { %13184 = vmatprep.subr.bf16.mxu1 %v13394_v19 }
0x1633   : > { %13186 = vmatpush3.bf16.msra.mxu1 %v13185_v35 }
0x1634   : > { %13187 = vmatprep.subr.bf16.mxu1 %v13394_v19 }
0x1636   : > { %12078 = vmatmul.mubr.f32.vlgmr.msra.gmra.mrb[40].mxu1 %v8883_v43 }
0x1637   : > { %13189 = vmatpush3.bf16.msra.mxu1 %v15579_v59  ;;  %12104 = vmatprep.mubr.msk.f32.mxu1 %vm13393_vm1, %v13392_v2 }
0x1638   : > { %13190 = vmatprep.subr.bf16.mxu1 %v13394_v19 }
0x163b   : > { %13192 = vmatpush3.bf16.msra.mxu1 %v15592_v36 }
0x163c   : > { %13193 = vmatprep.subr.bf16.mxu1 %v13394_v19 }
0x163f   : > { %13195 = vmatpush3.bf16.msra.mxu1 %v15598_v13 }
0x1640   : > { %13196 = vmatprep.subr.bf16.mxu1 %v13394_v19 }
0x1643   : > { %13198 = vmatpush3.bf16.msra.mxu1 %v15609_v4 }
0x1644   : > { %13199 = vmatprep.subr.bf16.mxu1 %v13394_v19 }
0x1647   : > { %13201 = vmatpush3.bf16.msra.mxu1 %v15619_v9 }
0x1648   : > { %13202 = vmatprep.subr.bf16.mxu1 %v13394_v19 }
0x164b   : > { %13204 = vmatpush3.bf16.msra.mxu1 %v15643_v21 }
0x164c   : > { %13205 = vmatprep.subr.bf16.mxu1 %v13394_v19 }
0x164e   : > { %12105 = vmatmul.mubr.f32.vlgmr.msra.gmra.mrb[40].mxu1 %v8884_v55 }
0x164f   : > { %13207 = vmatpush3.bf16.msra.mxu1 %v13206_v8  ;;  %12131 = vmatprep.mubr.msk.f32.mxu1 %vm13393_vm1, %v13392_v2 }
0x1650   : > { %13208 = vmatprep.subr.bf16.mxu1 %v13394_v19 }
0x1653   : > { %13210 = vmatpush3.bf16.msra.mxu1 %v13209_v15 }
0x1654   : > { %13211 = vmatprep.subr.bf16.mxu1 %v13394_v19 }
0x1657   : > { %13213 = vmatpush3.bf16.msra.mxu1 %v13212_v63 }
0x1658   : > { %13214 = vmatprep.subr.bf16.mxu1 %v13394_v19 }
0x165b   : > { %13216 = vmatpush3.bf16.msra.mxu1 %v13215_v46 }
0x165c   : > { %13217 = vmatprep.subr.bf16.mxu1 %v13394_v19 }
0x165f   : > { %13219 = vmatpush3.bf16.msra.mxu1 %v13218_v30 }
0x1660   : > { %13220 = vmatprep.subr.bf16.mxu1 %v13394_v19 }
0x1663   : > { %13222 = vmatpush3.bf16.msra.mxu1 %v13221_v7 }
0x1664   : > { %13223 = vmatprep.subr.bf16.mxu1 %v13394_v19 }
0x1666   : > { %12132 = vmatmul.mubr.f32.vlgmr.msra.gmra.mrb[40].mxu1 %v15718_v5 }
0x1667   : > { %13225 = vmatpush3.bf16.msra.mxu1 %v15579_v59  ;;  %12158 = vmatprep.mubr.msk.f32.mxu1 %vm13393_vm1, %v13392_v2  ;;  %v8800_v2 = vpop.permute.xlu0 %8799 }
0x1668   : > { %13226 = vmatprep.subr.bf16.mxu1 %v13394_v19 }
0x166b   : > { %13228 = vmatpush3.bf16.msra.mxu1 %v15592_v36 }
0x166c   : > { %13229 = vmatprep.subr.bf16.mxu1 %v13394_v19 }
0x166f   : > { %13231 = vmatpush3.bf16.msra.mxu1 %v15598_v13 }
0x1670   : > { %13232 = vmatprep.subr.bf16.mxu1 %v13394_v19 }
0x1673   : > { %13234 = vmatpush3.bf16.msra.mxu1 %v15609_v4 }
0x1674   : > { %13235 = vmatprep.subr.bf16.mxu1 %v13394_v19 }
0x1677   : > { %13237 = vmatpush3.bf16.msra.mxu1 %v15619_v9 }
0x1678   : > { %13238 = vmatprep.subr.bf16.mxu1 %v13394_v19 }
0x167b   : > { %13240 = vmatpush3.bf16.msra.mxu1 %v15643_v21 }
0x167e   : > { %12159 = vmatmul.mubr.f32.vlgmr.msra.gmra.mrb[40].mxu1 %v15718_v5 }
0x1751   : > { %v9390_v59 = vpop.f32.mrb[40].mxu1 }
0x1752   : > { %v13250_v56 = vadd.f32 %v9390_v59, %v8800_v2  ;;  %v12160_v36 = vpop.f32.mrb[41].mxu1 }
0x1754   : > { %9395 = vst.msk [vmem:[%s416_s29] sm:$0xff] %vm9394_vm0, %v13250_v56 }
0x1755 PF: > { %s25_s23 = sadd.s32 1, %s13390_s23  }
0x1756   : > { %p22_p4 = scmp.ge.s32.totalorder %s25_s23, 4  }
0x1758   :  { %24 = sbr.rel (!%p22_p4) target bundleno = 3 (0x3), region = 115 }

</bundles_post_ra>
